<compile_context>
chip_gen: v6e
topology: v6e:2x2x1
jax: 0.10.0
libtpu: 0.0.40
codegen_flags: <defaults>
</compile_context>

<pallas_src>
import functools

import jax
import jax.numpy as jnp
from jax.experimental import pallas as pl
from jax.experimental.pallas import tpu as pltpu


NODE_TILE = 256    # node-row tile (and fused-path node residency limit)
EDGE_TILE = 1024   # edge-row tile / E-chunk of the scatter reduction


def _round_up(n, m):
    return (n + m - 1) // m * m


def _pad_rows(n, tile):
    """Padded row count: multiple of 8; multiple of `tile` once n > tile."""
    return _round_up(n, min(tile, _round_up(n, 8)))


def _tile(m, tile):
    """Row tile for an already-padded row count m (m % tile == 0 by construction)."""
    return min(tile, m)


def _full_spec(arr):
    nd = arr.ndim
    return pl.BlockSpec(arr.shape, lambda *_: (0,) * nd)


# ----------------------------------------------------------------------------
# In-kernel helpers (scalar O3 tensor product, weight-net MLP, swish gate)
# ----------------------------------------------------------------------------
def _silu(x):
    return x * jax.nn.sigmoid(x)


def _attr_wide(attr, out_dim):
    """[tm, A] -> [tm, A*O]: each attr column lane-broadcast to O lanes.

    Built once per kernel and shared by every TP that uses the same attrs.
    """
    rows, num_attr = attr.shape
    cols = [jnp.broadcast_to(attr[:, a:a + 1], (rows, out_dim))
            for a in range(num_attr)]
    return jnp.concatenate(cols, axis=1)


def _fold(y, attr_wide, b_ref):
    """out[:, o] = b[o] + sum_a attr[:, a] * y[:, a*O + o]   (VALU only)."""
    O = b_ref.shape[1]
    A = attr_wide.shape[1] // O
    z = y * attr_wide
    acc = b_ref[...] + z[:, 0:O]
    for a in range(1, A):
        acc = acc + z[:, a * O:(a + 1) * O]
    return acc


def _tp(x, attr_wide, w_ref, b_ref):
    """Scalar-irreps tensor product: ONE bf16 MXU matmul + attr fold."""
    y = jnp.dot(x.astype(jnp.bfloat16), w_ref[...],
                preferred_element_type=jnp.float32)
    return _fold(y, attr_wide, b_ref)


def _mlp(d, w1_ref, b1_ref, w2_ref, b2_ref):
    """2-layer weight-net MLP (SiLU hidden), bf16 matmuls, f32 accumulation."""
    h = _silu(jnp.dot(d.astype(jnp.bfloat16), w1_ref[...],
                      preferred_element_type=jnp.float32) + b1_ref[...])
    return jnp.dot(h.astype(jnp.bfloat16), w2_ref[...],
                   preferred_element_type=jnp.float32) + b2_ref[...]


def _message_compute(amf, ea_wide, xi, xj, edge,
                     wamf_ref, wxi_ref, wxj_ref, we_ref, b1_ref,
                     w2_ref, b2_ref):
    """msg = gate(TP1(cat(amf, x_i, x_j, edge))) -> gate(TP2(.)), split weights."""
    y = amf * wamf_ref[...]                                   # [tm,1] x [1,A*H]
    y = y + jnp.dot(xi.astype(jnp.bfloat16), wxi_ref[...],
                    preferred_element_type=jnp.float32)
    y = y + jnp.dot(xj.astype(jnp.bfloat16), wxj_ref[...],
                    preferred_element_type=jnp.float32)
    y = y + jnp.dot(edge.astype(jnp.bfloat16), we_ref[...],
                    preferred_element_type=jnp.float32)
    m = _silu(_fold(y, ea_wide, b1_ref))
    return _silu(_tp(m, ea_wide, w2_ref, b2_ref))


def _scatter_accumulate(acc_ref, tgt_row, msg, node_base):
    """acc[n,:] += sum_{e: tgt[e]==node_base+n} msg[e,:] via in-kernel one-hot.

    Padded edges carry tgt == Np which matches no node row, so they drop out.
    """
    tn = acc_ref.shape[0]
    ec = tgt_row.shape[1]
    rows = jax.lax.broadcasted_iota(jnp.int32, (tn, ec), 0) + node_base
    onehot = jnp.where(rows == tgt_row, 1.0, 0.0).astype(jnp.bfloat16)
    acc_ref[...] += jnp.dot(onehot, msg.astype(jnp.bfloat16),
                            preferred_element_type=jnp.float32)


def _node_update_compute(x, nattr, agg, wx_ref, wa_ref, b1_ref, w2_ref, b2_ref):
    """upd1(cat(x, agg)) with split weights -> gate -> upd2 -> residual."""
    na_wide = _attr_wide(nattr, b1_ref.shape[1])
    y = jnp.dot(x.astype(jnp.bfloat16), wx_ref[...],
                preferred_element_type=jnp.float32)
    y = y + jnp.dot(agg.astype(jnp.bfloat16), wa_ref[...],
                    preferred_element_type=jnp.float32)
    u = _silu(_fold(y, na_wide, b1_ref))
    u = _tp(u, na_wide, w2_ref, b2_ref)
    return x + u


# ----------------------------------------------------------------------------
# Kernels
# ----------------------------------------------------------------------------
def _tp_single_kernel(x_ref, attr_ref, w_ref, b_ref, out_ref, *, gate):
    aw = _attr_wide(attr_ref[...], b_ref.shape[1])
    acc = _tp(x_ref[...], aw, w_ref, b_ref)
    if gate:
        acc = _silu(acc)
    out_ref[...] = acc.astype(out_ref.dtype)


def _edge_embed_kernel(eslab_ref, ns_ref, nt_ref, wd_ref, ws_ref, wt_ref, b_ref,
                       out_ref, *, A_E, D):
    slab = eslab_ref[...]
    ea_wide = _attr_wide(slab[:, 1:1 + A_E], b_ref.shape[1])
    d = slab[:, 1 + A_E:1 + A_E + D]
    y = jnp.dot(d.astype(jnp.bfloat16), wd_ref[...],
                preferred_element_type=jnp.float32)
    y = y + jnp.dot(ns_ref[...].astype(jnp.bfloat16), ws_ref[...],
                    preferred_element_type=jnp.float32)
    y = y + jnp.dot(nt_ref[...].astype(jnp.bfloat16), wt_ref[...],
                    preferred_element_type=jnp.float32)
    out_ref[...] = _fold(y, ea_wide, b_ref).astype(out_ref.dtype)


def _fused_msg_node_kernel(tgt_ref, eslab_ref, xi_ref, xj_ref, edge_ref,
                           x_ref, nattr_ref,
                           m_wamf_ref, m_wxi_ref, m_wxj_ref, m_we_ref, m_b1_ref,
                           m_w2_ref, m_b2_ref,
                           u_wx_ref, u_wa_ref, u_b1_ref, u_w2_ref, u_b2_ref,
                           out_ref, acc_ref, *, A_E):
    """Message kernel fused with the E-chunked scatter + node update.

    Single node tile resident; grid axis = E-chunk reduction ("arbitrary").
    The [ec, H] messages never leave VMEM.
    """
    k = pl.program_id(0)

    @pl.when(k == 0)
    def _():
        acc_ref[...] = jnp.zeros_like(acc_ref)

    slab = eslab_ref[...]
    amf = slab[:, 0:1]
    ea_wide = _attr_wide(slab[:, 1:1 + A_E], m_b1_ref.shape[1])
    msg = _message_compute(amf, ea_wide, xi_ref[...], xj_ref[...], edge_ref[...],
                           m_wamf_ref, m_wxi_ref, m_wxj_ref, m_we_ref,
                           m_b1_ref, m_w2_ref, m_b2_ref)
    _scatter_accumulate(acc_ref, tgt_ref[...], msg, 0)

    @pl.when(k == pl.num_programs(0) - 1)
    def _():
        out_ref[...] = _node_update_compute(
            x_ref[...], nattr_ref[...], acc_ref[...],
            u_wx_ref, u_wa_ref, u_b1_ref, u_w2_ref, u_b2_ref,
        ).astype(out_ref.dtype)


def _message_kernel(eslab_ref, xi_ref, xj_ref, edge_ref,
                    m_wamf_ref, m_wxi_ref, m_wxj_ref, m_we_ref, m_b1_ref,
                    m_w2_ref, m_b2_ref, out_ref, *, A_E):
    slab = eslab_ref[...]
    ea_wide = _attr_wide(slab[:, 1:1 + A_E], m_b1_ref.shape[1])
    msg = _message_compute(slab[:, 0:1], ea_wide, xi_ref[...], xj_ref[...],
                           edge_ref[...], m_wamf_ref, m_wxi_ref, m_wxj_ref,
                           m_we_ref, m_b1_ref, m_w2_ref, m_b2_ref)
    out_ref[...] = msg.astype(out_ref.dtype)          # bf16 scatter operand


def _node_update_kernel(tgt_ref, msg_ref, x_ref, nattr_ref,
                        u_wx_ref, u_wa_ref, u_b1_ref, u_w2_ref, u_b2_ref,
                        out_ref, acc_ref):
    i = pl.program_id(0)
    k = pl.program_id(1)

    @pl.when(k == 0)
    def _():
        acc_ref[...] = jnp.zeros_like(acc_ref)

    _scatter_accumulate(acc_ref, tgt_ref[...], msg_ref[...],
                        i * acc_ref.shape[0])

    @pl.when(k == pl.num_programs(1) - 1)
    def _():
        out_ref[...] = _node_update_compute(
            x_ref[...], nattr_ref[...], acc_ref[...],
            u_wx_ref, u_wa_ref, u_b1_ref, u_w2_ref, u_b2_ref,
        ).astype(out_ref.dtype)


def _edge_update_kernel(eslab_ref, xi_ref, xj_ref, edge_ref,
                        e_wxi_ref, e_wxj_ref, e_b1_ref,
                        mlp_w1_ref, mlp_b1_ref,
                        m1_w2_ref, m1_b2_ref, m2_w2_ref, m2_b2_ref,
                        e_w2_ref, e_b2_ref, out_ref, *, A_E, D):
    slab = eslab_ref[...]
    ea_wide = _attr_wide(slab[:, 1:1 + A_E], e_b1_ref.shape[1])
    d = slab[:, 1 + A_E:1 + A_E + D]
    # both distance-MLP first layers share d -> one wide matmul [D, 2*WH]
    WH = m1_w2_ref.shape[0]
    h = _silu(jnp.dot(d.astype(jnp.bfloat16), mlp_w1_ref[...],
                      preferred_element_type=jnp.float32) + mlp_b1_ref[...])
    wmod1 = jnp.dot(h[:, 0:WH].astype(jnp.bfloat16), m1_w2_ref[...],
                    preferred_element_type=jnp.float32) + m1_b2_ref[...]
    wmod2 = jnp.dot(h[:, WH:2 * WH].astype(jnp.bfloat16), m2_w2_ref[...],
                    preferred_element_type=jnp.float32) + m2_b2_ref[...]
    # edge_update_layer_1 on cat(x_i, x_j) with split weights
    y = jnp.dot(xi_ref[...].astype(jnp.bfloat16), e_wxi_ref[...],
                preferred_element_type=jnp.float32)
    y = y + jnp.dot(xj_ref[...].astype(jnp.bfloat16), e_wxj_ref[...],
                    preferred_element_type=jnp.float32)
    e = _silu(_fold(y, ea_wide, e_b1_ref) * wmod1)
    e = _silu(_tp(e, ea_wide, e_w2_ref, e_b2_ref) * wmod2)
    out_ref[...] = (edge_ref[...] + e).astype(out_ref.dtype)


def _edge_pre_kernel(eslab_ref, edge_ref, w_ref, b_ref,
                     mw1_ref, mb1_ref, mw2_ref, mb2_ref, out_ref, *, A_E, D):
    slab = eslab_ref[...]
    ea_wide = _attr_wide(slab[:, 1:1 + A_E], b_ref.shape[1])
    d = slab[:, 1 + A_E:1 + A_E + D]
    wmod = _mlp(d, mw1_ref, mb1_ref, mw2_ref, mb2_ref)
    acc = _tp(edge_ref[...], ea_wide, w_ref, b_ref)
    out_ref[...] = (acc * wmod).astype(out_ref.dtype)


# ----------------------------------------------------------------------------
# Wrappers
# ----------------------------------------------------------------------------
_PARALLEL = pltpu.CompilerParams(dimension_semantics=("parallel",))


def tp_single(x, attr, p, gate=False):
    M, F = x.shape
    A = attr.shape[1]
    O = p["b"].shape[1]
    tm = _tile(M, NODE_TILE)
    kernel = functools.partial(_tp_single_kernel, gate=gate)
    return pl.pallas_call(
        kernel,
        out_shape=jax.ShapeDtypeStruct((M, O), jnp.float32),
        grid=(M // tm,),
        in_specs=[
            pl.BlockSpec((tm, F), lambda i: (i, 0)),
            pl.BlockSpec((tm, A), lambda i: (i, 0)),
            _full_spec(p["W"]), _full_spec(p["b"]),
        ],
        out_specs=pl.BlockSpec((tm, O), lambda i: (i, 0)),
        compiler_params=_PARALLEL,
    )(x, attr, p["W"], p["b"])


def edge_embed(eslab, n_src, n_tgt, p, A_E, D):
    Ep, S = eslab.shape
    H = p["b"].shape[1]
    te = _tile(Ep, EDGE_TILE)
    kernel = functools.partial(_edge_embed_kernel, A_E=A_E, D=D)
    return pl.pallas_call(
        kernel,
        out_shape=jax.ShapeDtypeStruct((Ep, H), jnp.float32),
        grid=(Ep // te,),
        in_specs=[
            pl.BlockSpec((te, S), lambda i: (i, 0)),
            pl.BlockSpec((te, n_src.shape[1]), lambda i: (i, 0)),
            pl.BlockSpec((te, n_tgt.shape[1]), lambda i: (i, 0)),
            _full_spec(p["Ws"][0]), _full_spec(p["Ws"][1]),
            _full_spec(p["Ws"][2]), _full_spec(p["b"]),
        ],
        out_specs=pl.BlockSpec((te, H), lambda i: (i, 0)),
        compiler_params=_PARALLEL,
    )(eslab, n_src, n_tgt, p["Ws"][0], p["Ws"][1], p["Ws"][2], p["b"])


def fused_message_node(tgt_row, eslab, xi, xj, edge, x, nattr, lp, A_E):
    Np, H = x.shape
    Ep, S = eslab.shape
    A_N = nattr.shape[1]
    ec = _tile(Ep, EDGE_TILE)
    kernel = functools.partial(_fused_msg_node_kernel, A_E=A_E)
    weights = [lp["m_Wamf"], lp["m_Wxi"], lp["m_Wxj"], lp["m_We"], lp["m_b1"],
               lp["m_W2"], lp["m_b2"],
               lp["u_Wx"], lp["u_Wa"], lp["u_b1"], lp["u_W2"], lp["u_b2"]]
    return pl.pallas_call(
        kernel,
        out_shape=jax.ShapeDtypeStruct((Np, H), jnp.float32),
        grid=(Ep // ec,),
        in_specs=[
            pl.BlockSpec((1, ec), lambda k: (0, k)),     # target indices
            pl.BlockSpec((ec, S), lambda k: (k, 0)),     # packed edge constants
            pl.BlockSpec((ec, H), lambda k: (k, 0)),     # node[tgt] (x_i)
            pl.BlockSpec((ec, H), lambda k: (k, 0)),     # node[src] (x_j)
            pl.BlockSpec((ec, H), lambda k: (k, 0)),     # edge features
            pl.BlockSpec((Np, H), lambda k: (0, 0)),     # resident node state
            pl.BlockSpec((Np, A_N), lambda k: (0, 0)),   # resident node attrs
        ] + [_full_spec(w) for w in weights],
        out_specs=pl.BlockSpec((Np, H), lambda k: (0, 0)),
        scratch_shapes=[pltpu.VMEM((Np, H), jnp.float32)],
        compiler_params=pltpu.CompilerParams(dimension_semantics=("arbitrary",)),
    )(tgt_row, eslab, xi, xj, edge, x, nattr, *weights)


def message_pass(eslab, xi, xj, edge, lp, A_E):
    Ep, S = eslab.shape
    H = edge.shape[1]
    te = _tile(Ep, EDGE_TILE)
    kernel = functools.partial(_message_kernel, A_E=A_E)
    weights = [lp["m_Wamf"], lp["m_Wxi"], lp["m_Wxj"], lp["m_We"], lp["m_b1"],
               lp["m_W2"], lp["m_b2"]]
    return pl.pallas_call(
        kernel,
        out_shape=jax.ShapeDtypeStruct((Ep, H), jnp.bfloat16),
        grid=(Ep // te,),
        in_specs=[
            pl.BlockSpec((te, S), lambda i: (i, 0)),
            pl.BlockSpec((te, H), lambda i: (i, 0)),
            pl.BlockSpec((te, H), lambda i: (i, 0)),
            pl.BlockSpec((te, H), lambda i: (i, 0)),
        ] + [_full_spec(w) for w in weights],
        out_specs=pl.BlockSpec((te, H), lambda i: (i, 0)),
        compiler_params=_PARALLEL,
    )(eslab, xi, xj, edge, *weights)


def node_update(tgt_row, msg, x, nattr, lp):
    Np, H = x.shape
    Ep = msg.shape[0]
    A_N = nattr.shape[1]
    tn = _tile(Np, NODE_TILE)
    ec = _tile(Ep, EDGE_TILE)
    weights = [lp["u_Wx"], lp["u_Wa"], lp["u_b1"], lp["u_W2"], lp["u_b2"]]
    return pl.pallas_call(
        _node_update_kernel,
        out_shape=jax.ShapeDtypeStruct((Np, H), jnp.float32),
        grid=(Np // tn, Ep // ec),
        in_specs=[
            pl.BlockSpec((1, ec), lambda i, k: (0, k)),
            pl.BlockSpec((ec, H), lambda i, k: (k, 0)),
            pl.BlockSpec((tn, H), lambda i, k: (i, 0)),
            pl.BlockSpec((tn, A_N), lambda i, k: (i, 0)),
        ] + [_full_spec(w) for w in weights],
        out_specs=pl.BlockSpec((tn, H), lambda i, k: (i, 0)),
        scratch_shapes=[pltpu.VMEM((tn, H), jnp.float32)],
        compiler_params=pltpu.CompilerParams(
            dimension_semantics=("parallel", "arbitrary")),
    )(tgt_row, msg, x, nattr, *weights)


def edge_update(eslab, xi, xj, edge, lp, A_E, D):
    Ep, S = eslab.shape
    H = edge.shape[1]
    te = _tile(Ep, EDGE_TILE)
    kernel = functools.partial(_edge_update_kernel, A_E=A_E, D=D)
    weights = [lp["e_Wxi"], lp["e_Wxj"], lp["e_b1"],
               lp["e_mW1"], lp["e_mb1"],
               lp["e_m1W2"], lp["e_m1b2"], lp["e_m2W2"], lp["e_m2b2"],
               lp["e_W2"], lp["e_b2"]]
    return pl.pallas_call(
        kernel,
        out_shape=jax.ShapeDtypeStruct((Ep, H), jnp.float32),
        grid=(Ep // te,),
        in_specs=[
            pl.BlockSpec((te, S), lambda i: (i, 0)),
            pl.BlockSpec((te, H), lambda i: (i, 0)),
            pl.BlockSpec((te, H), lambda i: (i, 0)),
            pl.BlockSpec((te, H), lambda i: (i, 0)),
        ] + [_full_spec(w) for w in weights],
        out_specs=pl.BlockSpec((te, H), lambda i: (i, 0)),
        compiler_params=_PARALLEL,
    )(eslab, xi, xj, edge, *weights)


def edge_pre_pool(eslab, edge, p, pm, A_E, D):
    Ep, S = eslab.shape
    H = edge.shape[1]
    O = p["b"].shape[1]
    te = _tile(Ep, EDGE_TILE)
    kernel = functools.partial(_edge_pre_kernel, A_E=A_E, D=D)
    weights = [p["W"], p["b"], pm["W1"], pm["b1"], pm["W2"], pm["b2"]]
    return pl.pallas_call(
        kernel,
        out_shape=jax.ShapeDtypeStruct((Ep, O), jnp.float32),
        grid=(Ep // te,),
        in_specs=[
            pl.BlockSpec((te, S), lambda i: (i, 0)),
            pl.BlockSpec((te, H), lambda i: (i, 0)),
        ] + [_full_spec(w) for w in weights],
        out_specs=pl.BlockSpec((te, O), lambda i: (i, 0)),
        compiler_params=_PARALLEL,
    )(eslab, edge, *weights)


# ----------------------------------------------------------------------------
# Parameter init (deterministic, synthetic) — weights stored in MXU-ready form,
# split per input segment at init time (no per-call slicing of weights).
# ----------------------------------------------------------------------------
def _init_tp_weights(key, in_dim, attr_dim, out_dim):
    k1, k2 = jax.random.split(key)
    W = jax.random.normal(k1, (attr_dim, in_dim, out_dim), jnp.float32)
    W = W / jnp.sqrt(float(in_dim * attr_dim))
    b = 0.01 * jax.random.normal(k2, (out_dim,), jnp.float32)
    # Wr[f, a*O + o] = W[a, f, o]
    Wr = W.transpose(1, 0, 2).reshape(in_dim, attr_dim * out_dim)
    return Wr, b.reshape(1, out_dim)


def init_tp(key, in_dim, attr_dim, out_dim):
    Wr, b = _init_tp_weights(key, in_dim, attr_dim, out_dim)
    return {"W": Wr.astype(jnp.bfloat16), "b": b}


def init_tp_split(key, seg_dims, attr_dim, out_dim, keep_f32=()):
    """TP over a concatenated input, stored as per-segment weight blocks."""
    Wr, b = _init_tp_weights(key, sum(seg_dims), attr_dim, out_dim)
    parts, off = [], 0
    for i, s in enumerate(seg_dims):
        w = Wr[off:off + s]
        off += s
        parts.append(w if i in keep_f32 else w.astype(jnp.bfloat16))
    return {"Ws": tuple(parts), "b": b}


def init_mlp(key, in_dim, hidden, out_dim):
    k1, k2, k3, k4 = jax.random.split(key, 4)
    return {
        "W1": (jax.random.normal(k1, (in_dim, hidden), jnp.float32)
               / jnp.sqrt(float(in_dim))).astype(jnp.bfloat16),
        "b1": (0.01 * jax.random.normal(k2, (hidden,), jnp.float32)).reshape(1, hidden),
        "W2": (jax.random.normal(k3, (hidden, out_dim), jnp.float32)
               / jnp.sqrt(float(hidden))).astype(jnp.bfloat16),
        "b2": (0.01 * jax.random.normal(k4, (out_dim,), jnp.float32)).reshape(1, out_dim),
    }


# ----------------------------------------------------------------------------
# Model (scalar-irreps edgeSEGNN, outputType='edge2')
# ----------------------------------------------------------------------------
CFG = dict(
    N=8, E=16, H=32, F_IN=8, A_NODE=4, A_EDGE=4,
    GAUSS_BASE=12, BESSEL_BASE=4, D_DIST=16,
    WEIGHT_HIDDEN=32, EDGE_OUT=16, CONV_LAYERS=2,
    CUTOFF=8.0, GAUSS_WIDTH=250.0,
)


def init_params(key, cfg):
    H, D, WH = cfg["H"], cfg["D_DIST"], cfg["WEIGHT_HIDDEN"]
    keys = iter(jax.random.split(key, 128))
    params = {
        "node_emb": init_tp(next(keys), cfg["F_IN"], cfg["A_NODE"], H),
        # edge embedding acts on cat(dist, node[src], node[tgt])
        "edge_emb": init_tp_split(next(keys), (D, H, H), cfg["A_EDGE"], H),
        "edge_pre": init_tp(next(keys), H, cfg["A_EDGE"], cfg["EDGE_OUT"]),
        "edge_pre_mlp": init_mlp(next(keys), D, WH, cfg["EDGE_OUT"]),
        "node_pre": init_tp(next(keys), H, cfg["A_NODE"], cfg["EDGE_OUT"]),
        "layers": [],
    }
    for _ in range(cfg["CONV_LAYERS"]):
        # message layer 1 acts on cat(amf, x_i, x_j, edge); amf row kept f32
        msg1 = init_tp_split(next(keys), (1, H, H, H), cfg["A_EDGE"], H,
                             keep_f32=(0,))
        msg2 = init_tp(next(keys), H, cfg["A_EDGE"], H)
        upd1 = init_tp_split(next(keys), (H, H), cfg["A_NODE"], H)   # cat(x, agg)
        upd2 = init_tp(next(keys), H, cfg["A_NODE"], H)
        eup1 = init_tp_split(next(keys), (H, H), cfg["A_EDGE"], H)   # cat(x_i, x_j)
        eup2 = init_tp(next(keys), H, cfg["A_EDGE"], H)
        m1 = init_mlp(next(keys), D, WH, H)
        m2 = init_mlp(next(keys), D, WH, H)
        params["layers"].append({
            "m_Wamf": msg1["Ws"][0], "m_Wxi": msg1["Ws"][1],
            "m_Wxj": msg1["Ws"][2], "m_We": msg1["Ws"][3], "m_b1": msg1["b"],
            "m_W2": msg2["W"], "m_b2": msg2["b"],
            "u_Wx": upd1["Ws"][0], "u_Wa": upd1["Ws"][1], "u_b1": upd1["b"],
            "u_W2": upd2["W"], "u_b2": upd2["b"],
            "e_Wxi": eup1["Ws"][0], "e_Wxj": eup1["Ws"][1], "e_b1": eup1["b"],
            "e_W2": eup2["W"], "e_b2": eup2["b"],
            # merged first layer of the two distance-weight MLPs
            "e_mW1": jnp.concatenate([m1["W1"], m2["W1"]], axis=1),
            "e_mb1": jnp.concatenate([m1["b1"], m2["b1"]], axis=1),
            "e_m1W2": m1["W2"], "e_m1b2": m1["b2"],
            "e_m2W2": m2["W2"], "e_m2b2": m2["b2"],
        })
    return params


def distance_encoding(d, cfg):
    """gaussian_custom + bessel encoding of per-edge distances d: [E, 1]."""
    mu = jnp.linspace(0.0, cfg["CUTOFF"], cfg["GAUSS_BASE"])[None, :]
    gauss = jnp.exp(-cfg["GAUSS_WIDTH"] * (d - mu) ** 2)                 # [E, G]
    start, end = -0.001, cfg["CUTOFF"]
    c = end - start
    xs = d - start                                                       # [E, 1]
    roots = jnp.arange(1, cfg["BESSEL_BASE"] + 1, dtype=jnp.float32)[None, :] * jnp.pi
    bessel = jnp.sqrt(2.0 / c) * jnp.sin(roots * xs / c) / xs            # [E, B]
    return jnp.concatenate([gauss, bessel], axis=1)                      # [E, G+B]


def edgesegnn_forward(params, x, edge_index, edge_attr, node_attr, amf,
                      selfenergy, cfg, force_unfused=False):
    N, E = x.shape[0], edge_attr.shape[0]
    A_E, D = cfg["A_EDGE"], cfg["D_DIST"]
    Np, Ep = _pad_rows(N, NODE_TILE), _pad_rows(E, EDGE_TILE)

    # Pad every per-node / per-edge tensor ONCE.  Padded edges point at row Np
    # (never matched by the in-kernel one-hot) so they never contribute to the
    # aggregation; gathers clamp, padded rows stay finite and are sliced off.
    xp = jnp.pad(x, ((0, Np - N), (0, 0)))
    nattr = jnp.pad(node_attr, ((0, Np - N), (0, 0)))
    eattr = jnp.pad(edge_attr, ((0, Ep - E), (0, 0)))
    amf_p = jnp.pad(amf, ((0, Ep - E), (0, 0)))
    src = jnp.pad(edge_index[0], (0, Ep - E), constant_values=Np)
    tgt = jnp.pad(edge_index[1], (0, Ep - E), constant_values=Np)
    selfe = jnp.pad(selfenergy, (0, Ep - E), constant_values=False)

    dist = distance_encoding(amf_p, cfg)                                 # [Ep, D]
    # packed per-edge constants: [amf | eattr | dist] -> single slab DMA/tile
    eslab = jnp.concatenate([amf_p, eattr, dist], axis=1)                # [Ep, 1+A+D]
    # lane-dense target index row for in-kernel one-hot construction
    tgt_row = tgt.astype(jnp.int32).reshape(1, Ep)

    # embeddings
    node = tp_single(xp, nattr, params["node_emb"])
    edge = edge_embed(eslab, node[src], node[tgt], params["edge_emb"], A_E, D)

    use_fused = (Np <= NODE_TILE) and not force_unfused

    # message-passing layers
    for lp in params["layers"]:
        xi, xj = node[tgt], node[src]                  # x_i = target, x_j = source
        if use_fused:
            # messages + E-chunked scatter + node update in ONE pallas_call;
            # [Ep, H] messages never leave VMEM.
            node = fused_message_node(tgt_row, eslab, xi, xj, edge, node, nattr,
                                      lp, A_E)
        else:
            msg = message_pass(eslab, xi, xj, edge, lp, A_E)
            node = node_update(tgt_row, msg, node, nattr, lp)
        # edge update (uses updated node state; resnet)
        xi, xj = node[tgt], node[src]
        edge = edge_update(eslab, xi, xj, edge, lp, A_E, D)

    # outputType == 'edge2'
    edge = edge_pre_pool(eslab, edge, params["edge_pre"], params["edge_pre_mlp"],
                         A_E, D)
    node_out = tp_single(node, nattr, params["node_pre"])
    # self-energy edges take the (source) node prediction instead
    edge = jnp.where(selfe[:, None], node_out[src], edge)
    return edge[:E]


# ----------------------------------------------------------------------------
if __name__ == "__main__":
    cfg = CFG
    key = jax.random.PRNGKey(0)
    kp, kx, kna, kea, kd, ki = jax.random.split(key, 6)

    N, E = cfg["N"], cfg["E"]
    x = jax.random.normal(kx, (N, cfg["F_IN"]), jnp.float32)
    node_attr = jax.random.normal(kna, (N, cfg["A_NODE"]), jnp.float32)
    edge_attr = jax.random.normal(kea, (E, cfg["A_EDGE"]), jnp.float32)
    amf = jax.random.uniform(kd, (E, 1), jnp.float32, 0.1, cfg["CUTOFF"])  # distances

    src = jax.random.randint(ki, (E,), 0, N)
    tgt = jax.random.randint(jax.random.fold_in(ki, 1), (E,), 0, N)
    # make the first two edges self-loops so some selfenergy flags are True
    src = src.at[0].set(0).at[1].set(3)
    tgt = tgt.at[0].set(0).at[1].set(3)
    edge_index = jnp.stack([src, tgt], axis=0)
    selfenergy = src == tgt

    params = init_params(kp, cfg)

    fwd = jax.jit(functools.partial(edgesegnn_forward, cfg=cfg))
    out = jax.block_until_ready(
        fwd(params, x, edge_index, edge_attr, node_attr, amf, selfenergy))
    assert out.shape == (E, cfg["EDGE_OUT"]), out.shape
    assert bool(jnp.all(jnp.isfinite(out)))

    # cross-check the fused msg+node path against the generic tiled path
    fwd_ref = jax.jit(functools.partial(edgesegnn_forward, cfg=cfg,
                                        force_unfused=True))
    out_ref = jax.block_until_ready(
        fwd_ref(params, x, edge_index, edge_attr, node_attr, amf, selfenergy))
    max_err = float(jnp.max(jnp.abs(out - out_ref)))
    assert bool(jnp.allclose(out, out_ref, atol=5e-3, rtol=5e-3)), max_err

    print("KERNEL_OK")
</pallas_src>

<mosaic_0001>
module attributes {stable_mosaic.version = 11 : i64} {
  func.func @_tp_single_kernel(%arg0: i32, %arg1: memref<8x8xf32, #tpu.memory_space<vmem>>, %arg2: memref<8x4xf32, #tpu.memory_space<vmem>>, %arg3: memref<8x128xbf16, #tpu.memory_space<vmem>>, %arg4: memref<1x32xf32, #tpu.memory_space<vmem>>, %arg5: memref<8x32xf32, #tpu.memory_space<vmem>>) attributes {dimension_semantics = [#tpu.dimension_semantics<parallel>], iteration_bounds = array<i64: 1>, scalar_prefetch = 0 : i64, scratch_operands = 0 : i64, tpu.core_type = #tpu.core_type<tc>, window_params = [{transform_indices = @transform_0, window_bounds = array<i64: 8, 8>}, {transform_indices = @transform_1, window_bounds = array<i64: 8, 4>}, {pipeline_mode = #tpu.pipeline_mode<synchronous>, transform_indices = @transform_2, window_bounds = array<i64: 8, 128>}, {pipeline_mode = #tpu.pipeline_mode<synchronous>, transform_indices = @transform_3, window_bounds = array<i64: 1, 32>}, {transform_indices = @transform_4, window_bounds = array<i64: 8, 32>}]} {
    %c0 = arith.constant 0 : index
    %c0_0 = arith.constant 0 : index
    %0 = vector.load %arg2[%c0, %c0_0] : memref<8x4xf32, #tpu.memory_space<vmem>>, vector<8x4xf32>
    %1 = vector.extract_strided_slice %0 {offsets = [0, 0], sizes = [8, 1], strides = [1, 1]} : vector<8x4xf32> to vector<8x1xf32>
    %2 = vector.shape_cast %1 : vector<8x1xf32> to vector<8x1xf32>
    %3 = vector.broadcast %2 : vector<8x1xf32> to vector<8x32xf32>
    %4 = vector.extract_strided_slice %0 {offsets = [0, 1], sizes = [8, 1], strides = [1, 1]} : vector<8x4xf32> to vector<8x1xf32>
    %5 = vector.shape_cast %4 : vector<8x1xf32> to vector<8x1xf32>
    %6 = vector.broadcast %5 : vector<8x1xf32> to vector<8x32xf32>
    %7 = vector.extract_strided_slice %0 {offsets = [0, 2], sizes = [8, 1], strides = [1, 1]} : vector<8x4xf32> to vector<8x1xf32>
    %8 = vector.shape_cast %7 : vector<8x1xf32> to vector<8x1xf32>
    %9 = vector.broadcast %8 : vector<8x1xf32> to vector<8x32xf32>
    %10 = vector.extract_strided_slice %0 {offsets = [0, 3], sizes = [8, 1], strides = [1, 1]} : vector<8x4xf32> to vector<8x1xf32>
    %11 = vector.shape_cast %10 : vector<8x1xf32> to vector<8x1xf32>
    %12 = vector.broadcast %11 : vector<8x1xf32> to vector<8x32xf32>
    %13 = tpu.concatenate %3, %6, %9, %12 in 1 : vector<8x32xf32>, vector<8x32xf32>, vector<8x32xf32>, vector<8x32xf32> -> vector<8x128xf32>
    %c0_1 = arith.constant 0 : index
    %c0_2 = arith.constant 0 : index
    %14 = vector.load %arg1[%c0_1, %c0_2] : memref<8x8xf32, #tpu.memory_space<vmem>>, vector<8x8xf32>
    %15 = arith.truncf %14 : vector<8x8xf32> to vector<8x8xbf16>
    %c0_3 = arith.constant 0 : index
    %c0_4 = arith.constant 0 : index
    %16 = vector.load %arg3[%c0_3, %c0_4] : memref<8x128xbf16, #tpu.memory_space<vmem>>, vector<8x128xbf16>
    %cst = arith.constant dense<0.000000e+00> : vector<8x128xf32>
    %17 = tpu.matmul %15, %16, %cst {dimension_numbers = #tpu.dot_dimension_numbers<[1], [0], [0], [1], [0, 0, 1, 1], [], []>} : vector<8x8xbf16>, vector<8x128xbf16>, vector<8x128xf32> -> vector<8x128xf32>
    %18 = arith.mulf %17, %13 : vector<8x128xf32>
    %c0_5 = arith.constant 0 : index
    %c0_6 = arith.constant 0 : index
    %19 = vector.load %arg4[%c0_5, %c0_6] : memref<1x32xf32, #tpu.memory_space<vmem>>, vector<1x32xf32>
    %20 = vector.extract_strided_slice %18 {offsets = [0, 0], sizes = [8, 32], strides = [1, 1]} : vector<8x128xf32> to vector<8x32xf32>
    %21 = vector.broadcast %19 : vector<1x32xf32> to vector<8x32xf32>
    %22 = arith.addf %21, %20 : vector<8x32xf32>
    %23 = vector.extract_strided_slice %18 {offsets = [0, 32], sizes = [8, 32], strides = [1, 1]} : vector<8x128xf32> to vector<8x32xf32>
    %24 = arith.addf %22, %23 : vector<8x32xf32>
    %25 = vector.extract_strided_slice %18 {offsets = [0, 64], sizes = [8, 32], strides = [1, 1]} : vector<8x128xf32> to vector<8x32xf32>
    %26 = arith.addf %24, %25 : vector<8x32xf32>
    %27 = vector.extract_strided_slice %18 {offsets = [0, 96], sizes = [8, 32], strides = [1, 1]} : vector<8x128xf32> to vector<8x32xf32>
    %28 = arith.addf %26, %27 : vector<8x32xf32>
    %c0_7 = arith.constant 0 : index
    %c0_8 = arith.constant 0 : index
    %29 = vector.load %arg5[%c0_7, %c0_8] : memref<8x32xf32, #tpu.memory_space<vmem>>, vector<8x32xf32>
    tpu.vector_store %arg5[%c0_7, %c0_8], %28 {strides = array<i32>} : memref<8x32xf32, #tpu.memory_space<vmem>>, vector<8x32xf32>,
    return
  }
  func.func @transform_0(%arg0: i32) -> (i32, i32) {
    %c0_i32 = arith.constant 0 : i32
    %c0_i32_0 = arith.constant 0 : i32
    return %arg0, %c0_i32 : i32, i32
  }
  func.func @transform_1(%arg0: i32) -> (i32, i32) {
    %c0_i32 = arith.constant 0 : i32
    %c0_i32_0 = arith.constant 0 : i32
    return %arg0, %c0_i32 : i32, i32
  }
  func.func @transform_2(%arg0: i32) -> (i32, i32) {
    %c0_i32 = arith.constant 0 : i32
    %c0_i32_0 = arith.constant 0 : i32
    %c0_i32_1 = arith.constant 0 : i32
    return %c0_i32, %c0_i32_0 : i32, i32
  }
  func.func @transform_3(%arg0: i32) -> (i32, i32) {
    %c0_i32 = arith.constant 0 : i32
    %c0_i32_0 = arith.constant 0 : i32
    %c0_i32_1 = arith.constant 0 : i32
    return %c0_i32, %c0_i32_0 : i32, i32
  }
  func.func @transform_4(%arg0: i32) -> (i32, i32) {
    %c0_i32 = arith.constant 0 : i32
    %c0_i32_0 = arith.constant 0 : i32
    return %arg0, %c0_i32 : i32, i32
  }
}

module attributes {stable_mosaic.version = 11 : i64} {
  func.func @_edge_embed_kernel(%arg0: i32, %arg1: memref<16x21xf32, #tpu.memory_space<vmem>>, %arg2: memref<16x32xf32, #tpu.memory_space<vmem>>, %arg3: memref<16x32xf32, #tpu.memory_space<vmem>>, %arg4: memref<16x128xbf16, #tpu.memory_space<vmem>>, %arg5: memref<32x128xbf16, #tpu.memory_space<vmem>>, %arg6: memref<32x128xbf16, #tpu.memory_space<vmem>>, %arg7: memref<1x32xf32, #tpu.memory_space<vmem>>, %arg8: memref<16x32xf32, #tpu.memory_space<vmem>>) attributes {dimension_semantics = [#tpu.dimension_semantics<parallel>], iteration_bounds = array<i64: 1>, scalar_prefetch = 0 : i64, scratch_operands = 0 : i64, tpu.core_type = #tpu.core_type<tc>, window_params = [{transform_indices = @transform_0, window_bounds = array<i64: 16, 21>}, {transform_indices = @transform_1, window_bounds = array<i64: 16, 32>}, {transform_indices = @transform_2, window_bounds = array<i64: 16, 32>}, {pipeline_mode = #tpu.pipeline_mode<synchronous>, transform_indices = @transform_3, window_bounds = array<i64: 16, 128>}, {pipeline_mode = #tpu.pipeline_mode<synchronous>, transform_indices = @transform_4, window_bounds = array<i64: 32, 128>}, {pipeline_mode = #tpu.pipeline_mode<synchronous>, transform_indices = @transform_5, window_bounds = array<i64: 32, 128>}, {pipeline_mode = #tpu.pipeline_mode<synchronous>, transform_indices = @transform_6, window_bounds = array<i64: 1, 32>}, {transform_indices = @transform_7, window_bounds = array<i64: 16, 32>}]} {
    %c0 = arith.constant 0 : index
    %c0_0 = arith.constant 0 : index
    %0 = vector.load %arg1[%c0, %c0_0] : memref<16x21xf32, #tpu.memory_space<vmem>>, vector<16x21xf32>
    %1 = vector.extract_strided_slice %0 {offsets = [0, 1], sizes = [16, 4], strides = [1, 1]} : vector<16x21xf32> to vector<16x4xf32>
    %2 = vector.extract_strided_slice %1 {offsets = [0, 0], sizes = [16, 1], strides = [1, 1]} : vector<16x4xf32> to vector<16x1xf32>
    %3 = vector.shape_cast %2 : vector<16x1xf32> to vector<16x1xf32>
    %4 = vector.broadcast %3 : vector<16x1xf32> to vector<16x32xf32>
    %5 = vector.extract_strided_slice %1 {offsets = [0, 1], sizes = [16, 1], strides = [1, 1]} : vector<16x4xf32> to vector<16x1xf32>
    %6 = vector.shape_cast %5 : vector<16x1xf32> to vector<16x1xf32>
    %7 = vector.broadcast %6 : vector<16x1xf32> to vector<16x32xf32>
    %8 = vector.extract_strided_slice %1 {offsets = [0, 2], sizes = [16, 1], strides = [1, 1]} : vector<16x4xf32> to vector<16x1xf32>
    %9 = vector.shape_cast %8 : vector<16x1xf32> to vector<16x1xf32>
    %10 = vector.broadcast %9 : vector<16x1xf32> to vector<16x32xf32>
    %11 = vector.extract_strided_slice %1 {offsets = [0, 3], sizes = [16, 1], strides = [1, 1]} : vector<16x4xf32> to vector<16x1xf32>
    %12 = vector.shape_cast %11 : vector<16x1xf32> to vector<16x1xf32>
    %13 = vector.broadcast %12 : vector<16x1xf32> to vector<16x32xf32>
    %14 = tpu.concatenate %4, %7, %10, %13 in 1 : vector<16x32xf32>, vector<16x32xf32>, vector<16x32xf32>, vector<16x32xf32> -> vector<16x128xf32>
    %15 = vector.extract_strided_slice %0 {offsets = [0, 5], sizes = [16, 16], strides = [1, 1]} : vector<16x21xf32> to vector<16x16xf32>
    %16 = arith.truncf %15 : vector<16x16xf32> to vector<16x16xbf16>
    %c0_1 = arith.constant 0 : index
    %c0_2 = arith.constant 0 : index
    %17 = vector.load %arg4[%c0_1, %c0_2] : memref<16x128xbf16, #tpu.memory_space<vmem>>, vector<16x128xbf16>
    %cst = arith.constant dense<0.000000e+00> : vector<16x128xf32>
    %18 = tpu.matmul %16, %17, %cst {dimension_numbers = #tpu.dot_dimension_numbers<[1], [0], [0], [1], [0, 0, 1, 1], [], []>} : vector<16x16xbf16>, vector<16x128xbf16>, vector<16x128xf32> -> vector<16x128xf32>
    %c0_3 = arith.constant 0 : index
    %c0_4 = arith.constant 0 : index
    %19 = vector.load %arg2[%c0_3, %c0_4] : memref<16x32xf32, #tpu.memory_space<vmem>>, vector<16x32xf32>
    %20 = arith.truncf %19 : vector<16x32xf32> to vector<16x32xbf16>
    %c0_5 = arith.constant 0 : index
    %c0_6 = arith.constant 0 : index
    %21 = vector.load %arg5[%c0_5, %c0_6] : memref<32x128xbf16, #tpu.memory_space<vmem>>, vector<32x128xbf16>
    %cst_7 = arith.constant dense<0.000000e+00> : vector<16x128xf32>
    %22 = tpu.matmul %20, %21, %cst_7 {dimension_numbers = #tpu.dot_dimension_numbers<[1], [0], [0], [1], [0, 0, 1, 1], [], []>} : vector<16x32xbf16>, vector<32x128xbf16>, vector<16x128xf32> -> vector<16x128xf32>
    %23 = arith.addf %18, %22 : vector<16x128xf32>
    %c0_8 = arith.constant 0 : index
    %c0_9 = arith.constant 0 : index
    %24 = vector.load %arg3[%c0_8, %c0_9] : memref<16x32xf32, #tpu.memory_space<vmem>>, vector<16x32xf32>
    %25 = arith.truncf %24 : vector<16x32xf32> to vector<16x32xbf16>
    %c0_10 = arith.constant 0 : index
    %c0_11 = arith.constant 0 : index
    %26 = vector.load %arg6[%c0_10, %c0_11] : memref<32x128xbf16, #tpu.memory_space<vmem>>, vector<32x128xbf16>
    %cst_12 = arith.constant dense<0.000000e+00> : vector<16x128xf32>
    %27 = tpu.matmul %25, %26, %cst_12 {dimension_numbers = #tpu.dot_dimension_numbers<[1], [0], [0], [1], [0, 0, 1, 1], [], []>} : vector<16x32xbf16>, vector<32x128xbf16>, vector<16x128xf32> -> vector<16x128xf32>
    %28 = arith.addf %23, %27 : vector<16x128xf32>
    %29 = arith.mulf %28, %14 : vector<16x128xf32>
    %c0_13 = arith.constant 0 : index
    %c0_14 = arith.constant 0 : index
    %30 = vector.load %arg7[%c0_13, %c0_14] : memref<1x32xf32, #tpu.memory_space<vmem>>, vector<1x32xf32>
    %31 = vector.extract_strided_slice %29 {offsets = [0, 0], sizes = [16, 32], strides = [1, 1]} : vector<16x128xf32> to vector<16x32xf32>
    %32 = vector.broadcast %30 : vector<1x32xf32> to vector<16x32xf32>
    %33 = arith.addf %32, %31 : vector<16x32xf32>
    %34 = vector.extract_strided_slice %29 {offsets = [0, 32], sizes = [16, 32], strides = [1, 1]} : vector<16x128xf32> to vector<16x32xf32>
    %35 = arith.addf %33, %34 : vector<16x32xf32>
    %36 = vector.extract_strided_slice %29 {offsets = [0, 64], sizes = [16, 32], strides = [1, 1]} : vector<16x128xf32> to vector<16x32xf32>
    %37 = arith.addf %35, %36 : vector<16x32xf32>
    %38 = vector.extract_strided_slice %29 {offsets = [0, 96], sizes = [16, 32], strides = [1, 1]} : vector<16x128xf32> to vector<16x32xf32>
    %39 = arith.addf %37, %38 : vector<16x32xf32>
    %c0_15 = arith.constant 0 : index
    %c0_16 = arith.constant 0 : index
    %40 = vector.load %arg8[%c0_15, %c0_16] : memref<16x32xf32, #tpu.memory_space<vmem>>, vector<16x32xf32>
    tpu.vector_store %arg8[%c0_15, %c0_16], %39 {strides = array<i32>} : memref<16x32xf32, #tpu.memory_space<vmem>>, vector<16x32xf32>,
    return
  }
  func.func @transform_0(%arg0: i32) -> (i32, i32) {
    %c0_i32 = arith.constant 0 : i32
    %c0_i32_0 = arith.constant 0 : i32
    return %arg0, %c0_i32 : i32, i32
  }
  func.func @transform_1(%arg0: i32) -> (i32, i32) {
    %c0_i32 = arith.constant 0 : i32
    %c0_i32_0 = arith.constant 0 : i32
    return %arg0, %c0_i32 : i32, i32
  }
  func.func @transform_2(%arg0: i32) -> (i32, i32) {
    %c0_i32 = arith.constant 0 : i32
    %c0_i32_0 = arith.constant 0 : i32
    return %arg0, %c0_i32 : i32, i32
  }
  func.func @transform_3(%arg0: i32) -> (i32, i32) {
    %c0_i32 = arith.constant 0 : i32
    %c0_i32_0 = arith.constant 0 : i32
    %c0_i32_1 = arith.constant 0 : i32
    return %c0_i32, %c0_i32_0 : i32, i32
  }
  func.func @transform_4(%arg0: i32) -> (i32, i32) {
    %c0_i32 = arith.constant 0 : i32
    %c0_i32_0 = arith.constant 0 : i32
    %c0_i32_1 = arith.constant 0 : i32
    return %c0_i32, %c0_i32_0 : i32, i32
  }
  func.func @transform_5(%arg0: i32) -> (i32, i32) {
    %c0_i32 = arith.constant 0 : i32
    %c0_i32_0 = arith.constant 0 : i32
    %c0_i32_1 = arith.constant 0 : i32
    return %c0_i32, %c0_i32_0 : i32, i32
  }
  func.func @transform_6(%arg0: i32) -> (i32, i32) {
    %c0_i32 = arith.constant 0 : i32
    %c0_i32_0 = arith.constant 0 : i32
    %c0_i32_1 = arith.constant 0 : i32
    return %c0_i32, %c0_i32_0 : i32, i32
  }
  func.func @transform_7(%arg0: i32) -> (i32, i32) {
    %c0_i32 = arith.constant 0 : i32
    %c0_i32_0 = arith.constant 0 : i32
    return %arg0, %c0_i32 : i32, i32
  }
}

module attributes {stable_mosaic.version = 11 : i64} {
  func.func @_fused_msg_node_kernel(%arg0: i32, %arg1: memref<1x16xi32, #tpu.memory_space<vmem>>, %arg2: memref<16x21xf32, #tpu.memory_space<vmem>>, %arg3: memref<16x32xf32, #tpu.memory_space<vmem>>, %arg4: memref<16x32xf32, #tpu.memory_space<vmem>>, %arg5: memref<16x32xf32, #tpu.memory_space<vmem>>, %arg6: memref<8x32xf32, #tpu.memory_space<vmem>>, %arg7: memref<8x4xf32, #tpu.memory_space<vmem>>, %arg8: memref<1x128xf32, #tpu.memory_space<vmem>>, %arg9: memref<32x128xbf16, #tpu.memory_space<vmem>>, %arg10: memref<32x128xbf16, #tpu.memory_space<vmem>>, %arg11: memref<32x128xbf16, #tpu.memory_space<vmem>>, %arg12: memref<1x32xf32, #tpu.memory_space<vmem>>, %arg13: memref<32x128xbf16, #tpu.memory_space<vmem>>, %arg14: memref<1x32xf32, #tpu.memory_space<vmem>>, %arg15: memref<32x128xbf16, #tpu.memory_space<vmem>>, %arg16: memref<32x128xbf16, #tpu.memory_space<vmem>>, %arg17: memref<1x32xf32, #tpu.memory_space<vmem>>, %arg18: memref<32x128xbf16, #tpu.memory_space<vmem>>, %arg19: memref<1x32xf32, #tpu.memory_space<vmem>>, %arg20: memref<8x32xf32, #tpu.memory_space<vmem>>, %arg21: memref<8x32xf32, #tpu.memory_space<vmem>>) attributes {dimension_semantics = [#tpu.dimension_semantics<arbitrary>], iteration_bounds = array<i64: 1>, scalar_prefetch = 0 : i64, scratch_operands = 1 : i64, tpu.core_type = #tpu.core_type<tc>, window_params = [{transform_indices = @transform_0, window_bounds = array<i64: 1, 16>}, {transform_indices = @transform_1, window_bounds = array<i64: 16, 21>}, {transform_indices = @transform_2, window_bounds = array<i64: 16, 32>}, {transform_indices = @transform_3, window_bounds = array<i64: 16, 32>}, {transform_indices = @transform_4, window_bounds = array<i64: 16, 32>}, {pipeline_mode = #tpu.pipeline_mode<synchronous>, transform_indices = @transform_5, window_bounds = array<i64: 8, 32>}, {pipeline_mode = #tpu.pipeline_mode<synchronous>, transform_indices = @transform_6, window_bounds = array<i64: 8, 4>}, {pipeline_mode = #tpu.pipeline_mode<synchronous>, transform_indices = @transform_7, window_bounds = array<i64: 1, 128>}, {pipeline_mode = #tpu.pipeline_mode<synchronous>, transform_indices = @transform_8, window_bounds = array<i64: 32, 128>}, {pipeline_mode = #tpu.pipeline_mode<synchronous>, transform_indices = @transform_9, window_bounds = array<i64: 32, 128>}, {pipeline_mode = #tpu.pipeline_mode<synchronous>, transform_indices = @transform_10, window_bounds = array<i64: 32, 128>}, {pipeline_mode = #tpu.pipeline_mode<synchronous>, transform_indices = @transform_11, window_bounds = array<i64: 1, 32>}, {pipeline_mode = #tpu.pipeline_mode<synchronous>, transform_indices = @transform_12, window_bounds = array<i64: 32, 128>}, {pipeline_mode = #tpu.pipeline_mode<synchronous>, transform_indices = @transform_13, window_bounds = array<i64: 1, 32>}, {pipeline_mode = #tpu.pipeline_mode<synchronous>, transform_indices = @transform_14, window_bounds = array<i64: 32, 128>}, {pipeline_mode = #tpu.pipeline_mode<synchronous>, transform_indices = @transform_15, window_bounds = array<i64: 32, 128>}, {pipeline_mode = #tpu.pipeline_mode<synchronous>, transform_indices = @transform_16, window_bounds = array<i64: 1, 32>}, {pipeline_mode = #tpu.pipeline_mode<synchronous>, transform_indices = @transform_17, window_bounds = array<i64: 32, 128>}, {pipeline_mode = #tpu.pipeline_mode<synchronous>, transform_indices = @transform_18, window_bounds = array<i64: 1, 32>}, {pipeline_mode = #tpu.pipeline_mode<synchronous>, transform_indices = @transform_19, window_bounds = array<i64: 8, 32>}]} {
    %c0_i32 = arith.constant 0 : i32
    %0 = arith.cmpi eq, %arg0, %c0_i32 : i32
    %1 = arith.extui %0 : i1 to i32
    %c0_i32_0 = arith.constant 0 : i32
    %2 = arith.cmpi ne, %1, %c0_i32_0 : i32
    scf.if %2 {
      %cst_39 = arith.constant 0.000000e+00 : f32
      %93 = vector.broadcast %cst_39 : f32 to vector<8x32xf32>
      %c0_40 = arith.constant 0 : index
      %c0_41 = arith.constant 0 : index
      %94 = vector.load %arg21[%c0_40, %c0_41] : memref<8x32xf32, #tpu.memory_space<vmem>>, vector<8x32xf32>
      tpu.vector_store %arg21[%c0_40, %c0_41], %93 {strides = array<i32>} : memref<8x32xf32, #tpu.memory_space<vmem>>, vector<8x32xf32>,
    } else {
    }
    %c0 = arith.constant 0 : index
    %c0_1 = arith.constant 0 : index
    %3 = vector.load %arg2[%c0, %c0_1] : memref<16x21xf32, #tpu.memory_space<vmem>>, vector<16x21xf32>
    %4 = vector.extract_strided_slice %3 {offsets = [0, 0], sizes = [16, 1], strides = [1, 1]} : vector<16x21xf32> to vector<16x1xf32>
    %5 = vector.extract_strided_slice %3 {offsets = [0, 1], sizes = [16, 4], strides = [1, 1]} : vector<16x21xf32> to vector<16x4xf32>
    %6 = vector.extract_strided_slice %5 {offsets = [0, 0], sizes = [16, 1], strides = [1, 1]} : vector<16x4xf32> to vector<16x1xf32>
    %7 = vector.shape_cast %6 : vector<16x1xf32> to vector<16x1xf32>
    %8 = vector.broadcast %7 : vector<16x1xf32> to vector<16x32xf32>
    %9 = vector.extract_strided_slice %5 {offsets = [0, 1], sizes = [16, 1], strides = [1, 1]} : vector<16x4xf32> to vector<16x1xf32>
    %10 = vector.shape_cast %9 : vector<16x1xf32> to vector<16x1xf32>
    %11 = vector.broadcast %10 : vector<16x1xf32> to vector<16x32xf32>
    %12 = vector.extract_strided_slice %5 {offsets = [0, 2], sizes = [16, 1], strides = [1, 1]} : vector<16x4xf32> to vector<16x1xf32>
    %13 = vector.shape_cast %12 : vector<16x1xf32> to vector<16x1xf32>
    %14 = vector.broadcast %13 : vector<16x1xf32> to vector<16x32xf32>
    %15 = vector.extract_strided_slice %5 {offsets = [0, 3], sizes = [16, 1], strides = [1, 1]} : vector<16x4xf32> to vector<16x1xf32>
    %16 = vector.shape_cast %15 : vector<16x1xf32> to vector<16x1xf32>
    %17 = vector.broadcast %16 : vector<16x1xf32> to vector<16x32xf32>
    %18 = tpu.concatenate %8, %11, %14, %17 in 1 : vector<16x32xf32>, vector<16x32xf32>, vector<16x32xf32>, vector<16x32xf32> -> vector<16x128xf32>
    %c0_2 = arith.constant 0 : index
    %c0_3 = arith.constant 0 : index
    %19 = vector.load %arg3[%c0_2, %c0_3] : memref<16x32xf32, #tpu.memory_space<vmem>>, vector<16x32xf32>
    %c0_4 = arith.constant 0 : index
    %c0_5 = arith.constant 0 : index
    %20 = vector.load %arg4[%c0_4, %c0_5] : memref<16x32xf32, #tpu.memory_space<vmem>>, vector<16x32xf32>
    %c0_6 = arith.constant 0 : index
    %c0_7 = arith.constant 0 : index
    %21 = vector.load %arg5[%c0_6, %c0_7] : memref<16x32xf32, #tpu.memory_space<vmem>>, vector<16x32xf32>
    %c0_8 = arith.constant 0 : index
    %c0_9 = arith.constant 0 : index
    %22 = vector.load %arg8[%c0_8, %c0_9] : memref<1x128xf32, #tpu.memory_space<vmem>>, vector<1x128xf32>
    %23 = vector.broadcast %4 : vector<16x1xf32> to vector<16x128xf32>
    %24 = vector.broadcast %22 : vector<1x128xf32> to vector<16x128xf32>
    %25 = arith.mulf %23, %24 : vector<16x128xf32>
    %26 = arith.truncf %19 : vector<16x32xf32> to vector<16x32xbf16>
    %c0_10 = arith.constant 0 : index
    %c0_11 = arith.constant 0 : index
    %27 = vector.load %arg9[%c0_10, %c0_11] : memref<32x128xbf16, #tpu.memory_space<vmem>>, vector<32x128xbf16>
    %cst = arith.constant dense<0.000000e+00> : vector<16x128xf32>
    %28 = tpu.matmul %26, %27, %cst {dimension_numbers = #tpu.dot_dimension_numbers<[1], [0], [0], [1], [0, 0, 1, 1], [], []>} : vector<16x32xbf16>, vector<32x128xbf16>, vector<16x128xf32> -> vector<16x128xf32>
    %29 = arith.addf %25, %28 : vector<16x128xf32>
    %30 = arith.truncf %20 : vector<16x32xf32> to vector<16x32xbf16>
    %c0_12 = arith.constant 0 : index
    %c0_13 = arith.constant 0 : index
    %31 = vector.load %arg10[%c0_12, %c0_13] : memref<32x128xbf16, #tpu.memory_space<vmem>>, vector<32x128xbf16>
    %cst_14 = arith.constant dense<0.000000e+00> : vector<16x128xf32>
    %32 = tpu.matmul %30, %31, %cst_14 {dimension_numbers = #tpu.dot_dimension_numbers<[1], [0], [0], [1], [0, 0, 1, 1], [], []>} : vector<16x32xbf16>, vector<32x128xbf16>, vector<16x128xf32> -> vector<16x128xf32>
    %33 = arith.addf %29, %32 : vector<16x128xf32>
    %34 = arith.truncf %21 : vector<16x32xf32> to vector<16x32xbf16>
    %c0_15 = arith.constant 0 : index
    %c0_16 = arith.constant 0 : index
    %35 = vector.load %arg11[%c0_15, %c0_16] : memref<32x128xbf16, #tpu.memory_space<vmem>>, vector<32x128xbf16>
    %cst_17 = arith.constant dense<0.000000e+00> : vector<16x128xf32>
    %36 = tpu.matmul %34, %35, %cst_17 {dimension_numbers = #tpu.dot_dimension_numbers<[1], [0], [0], [1], [0, 0, 1, 1], [], []>} : vector<16x32xbf16>, vector<32x128xbf16>, vector<16x128xf32> -> vector<16x128xf32>
    %37 = arith.addf %33, %36 : vector<16x128xf32>
    %38 = arith.mulf %37, %18 : vector<16x128xf32>
    %c0_18 = arith.constant 0 : index
    %c0_19 = arith.constant 0 : index
    %39 = vector.load %arg12[%c0_18, %c0_19] : memref<1x32xf32, #tpu.memory_space<vmem>>, vector<1x32xf32>
    %40 = vector.extract_strided_slice %38 {offsets = [0, 0], sizes = [16, 32], strides = [1, 1]} : vector<16x128xf32> to vector<16x32xf32>
    %41 = vector.broadcast %39 : vector<1x32xf32> to vector<16x32xf32>
    %42 = arith.addf %41, %40 : vector<16x32xf32>
    %43 = vector.extract_strided_slice %38 {offsets = [0, 32], sizes = [16, 32], strides = [1, 1]} : vector<16x128xf32> to vector<16x32xf32>
    %44 = arith.addf %42, %43 : vector<16x32xf32>
    %45 = vector.extract_strided_slice %38 {offsets = [0, 64], sizes = [16, 32], strides = [1, 1]} : vector<16x128xf32> to vector<16x32xf32>
    %46 = arith.addf %44, %45 : vector<16x32xf32>
    %47 = vector.extract_strided_slice %38 {offsets = [0, 96], sizes = [16, 32], strides = [1, 1]} : vector<16x128xf32> to vector<16x32xf32>
    %48 = arith.addf %46, %47 : vector<16x32xf32>
    %49 = arith.negf %48 : vector<16x32xf32>
    %50 = math.exp %49 : vector<16x32xf32>
    %cst_20 = arith.constant 1.000000e+00 : f32
    %51 = vector.broadcast %cst_20 : f32 to vector<16x32xf32>
    %52 = arith.addf %51, %50 : vector<16x32xf32>
    %53 = arith.divf %51, %52 : vector<16x32xf32>
    %54 = arith.mulf %48, %53 : vector<16x32xf32>
    %55 = arith.truncf %54 : vector<16x32xf32> to vector<16x32xbf16>
    %c0_21 = arith.constant 0 : index
    %c0_22 = arith.constant 0 : index
    %56 = vector.load %arg13[%c0_21, %c0_22] : memref<32x128xbf16, #tpu.memory_space<vmem>>, vector<32x128xbf16>
    %cst_23 = arith.constant dense<0.000000e+00> : vector<16x128xf32>
    %57 = tpu.matmul %55, %56, %cst_23 {dimension_numbers = #tpu.dot_dimension_numbers<[1], [0], [0], [1], [0, 0, 1, 1], [], []>} : vector<16x32xbf16>, vector<32x128xbf16>, vector<16x128xf32> -> vector<16x128xf32>
    %58 = arith.mulf %57, %18 : vector<16x128xf32>
    %c0_24 = arith.constant 0 : index
    %c0_25 = arith.constant 0 : index
    %59 = vector.load %arg14[%c0_24, %c0_25] : memref<1x32xf32, #tpu.memory_space<vmem>>, vector<1x32xf32>
    %60 = vector.extract_strided_slice %58 {offsets = [0, 0], sizes = [16, 32], strides = [1, 1]} : vector<16x128xf32> to vector<16x32xf32>
    %61 = vector.broadcast %59 : vector<1x32xf32> to vector<16x32xf32>
    %62 = arith.addf %61, %60 : vector<16x32xf32>
    %63 = vector.extract_strided_slice %58 {offsets = [0, 32], sizes = [16, 32], strides = [1, 1]} : vector<16x128xf32> to vector<16x32xf32>
    %64 = arith.addf %62, %63 : vector<16x32xf32>
    %65 = vector.extract_strided_slice %58 {offsets = [0, 64], sizes = [16, 32], strides = [1, 1]} : vector<16x128xf32> to vector<16x32xf32>
    %66 = arith.addf %64, %65 : vector<16x32xf32>
    %67 = vector.extract_strided_slice %58 {offsets = [0, 96], sizes = [16, 32], strides = [1, 1]} : vector<16x128xf32> to vector<16x32xf32>
    %68 = arith.addf %66, %67 : vector<16x32xf32>
    %69 = arith.negf %68 : vector<16x32xf32>
    %70 = math.exp %69 : vector<16x32xf32>
    %cst_26 = arith.constant 1.000000e+00 : f32
    %71 = vector.broadcast %cst_26 : f32 to vector<16x32xf32>
    %72 = arith.addf %71, %70 : vector<16x32xf32>
    %73 = arith.divf %71, %72 : vector<16x32xf32>
    %74 = arith.mulf %68, %73 : vector<16x32xf32>
    %c0_27 = arith.constant 0 : index
    %c0_28 = arith.constant 0 : index
    %75 = vector.load %arg1[%c0_27, %c0_28] : memref<1x16xi32, #tpu.memory_space<vmem>>, vector<1x16xi32>
    %76 = tpu.iota {dimensions = array<i32: 0>} : vector<8x16xi32>
    %c0_i32_29 = arith.constant 0 : i32
    %77 = vector.broadcast %c0_i32_29 : i32 to vector<8x16xi32>
    %78 = arith.addi %76, %77 : vector<8x16xi32>
    %79 = vector.broadcast %75 : vector<1x16xi32> to vector<8x16xi32>
    %80 = arith.cmpi eq, %78, %79 : vector<8x16xi32>
    %cst_30 = arith.constant 1.000000e+00 : f32
    %cst_31 = arith.constant 0.000000e+00 : f32
    %81 = vector.broadcast %cst_30 : f32 to vector<8x16xf32>
    %82 = vector.broadcast %cst_31 : f32 to vector<8x16xf32>
    %83 = arith.select %80, %81, %82 : vector<8x16xi1>, vector<8x16xf32>
    %84 = arith.truncf %83 : vector<8x16xf32> to vector<8x16xbf16>
    %c0_32 = arith.constant 0 : index
    %c0_33 = arith.constant 0 : index
    %85 = vector.load %arg21[%c0_32, %c0_33] : memref<8x32xf32, #tpu.memory_space<vmem>>, vector<8x32xf32>
    %86 = arith.truncf %74 : vector<16x32xf32> to vector<16x32xbf16>
    %cst_34 = arith.constant dense<0.000000e+00> : vector<8x32xf32>
    %87 = tpu.matmul %84, %86, %cst_34 {dimension_numbers = #tpu.dot_dimension_numbers<[1], [0], [0], [1], [0, 0, 1, 1], [], []>} : vector<8x16xbf16>, vector<16x32xbf16>, vector<8x32xf32> -> vector<8x32xf32>
    %88 = arith.addf %85, %87 : vector<8x32xf32>
    %c0_35 = arith.constant 0 : index
    %c0_36 = arith.constant 0 : index
    %89 = vector.load %arg21[%c0_35, %c0_36] : memref<8x32xf32, #tpu.memory_space<vmem>>, vector<8x32xf32>
    tpu.vector_store %arg21[%c0_35, %c0_36], %88 {strides = array<i32>} : memref<8x32xf32, #tpu.memory_space<vmem>>, vector<8x32xf32>,
    %c0_i32_37 = arith.constant 0 : i32
    %90 = arith.cmpi eq, %arg0, %c0_i32_37 : i32
    %91 = arith.extui %90 : i1 to i32
    %c0_i32_38 = arith.constant 0 : i32
    %92 = arith.cmpi ne, %91, %c0_i32_38 : i32
    scf.if %92 {
      %c0_39 = arith.constant 0 : index
      %c0_40 = arith.constant 0 : index
      %93 = vector.load %arg6[%c0_39, %c0_40] : memref<8x32xf32, #tpu.memory_space<vmem>>, vector<8x32xf32>
      %c0_41 = arith.constant 0 : index
      %c0_42 = arith.constant 0 : index
      %94 = vector.load %arg7[%c0_41, %c0_42] : memref<8x4xf32, #tpu.memory_space<vmem>>, vector<8x4xf32>
      %c0_43 = arith.constant 0 : index
      %c0_44 = arith.constant 0 : index
      %95 = vector.load %arg21[%c0_43, %c0_44] : memref<8x32xf32, #tpu.memory_space<vmem>>, vector<8x32xf32>
      %96 = vector.extract_strided_slice %94 {offsets = [0, 0], sizes = [8, 1], strides = [1, 1]} : vector<8x4xf32> to vector<8x1xf32>
      %97 = vector.shape_cast %96 : vector<8x1xf32> to vector<8x1xf32>
      %98 = vector.broadcast %97 : vector<8x1xf32> to vector<8x32xf32>
      %99 = vector.extract_strided_slice %94 {offsets = [0, 1], sizes = [8, 1], strides = [1, 1]} : vector<8x4xf32> to vector<8x1xf32>
      %100 = vector.shape_cast %99 : vector<8x1xf32> to vector<8x1xf32>
      %101 = vector.broadcast %100 : vector<8x1xf32> to vector<8x32xf32>
      %102 = vector.extract_strided_slice %94 {offsets = [0, 2], sizes = [8, 1], strides = [1, 1]} : vector<8x4xf32> to vector<8x1xf32>
      %103 = vector.shape_cast %102 : vector<8x1xf32> to vector<8x1xf32>
      %104 = vector.broadcast %103 : vector<8x1xf32> to vector<8x32xf32>
      %105 = vector.extract_strided_slice %94 {offsets = [0, 3], sizes = [8, 1], strides = [1, 1]} : vector<8x4xf32> to vector<8x1xf32>
      %106 = vector.shape_cast %105 : vector<8x1xf32> to vector<8x1xf32>
      %107 = vector.broadcast %106 : vector<8x1xf32> to vector<8x32xf32>
      %108 = tpu.concatenate %98, %101, %104, %107 in 1 : vector<8x32xf32>, vector<8x32xf32>, vector<8x32xf32>, vector<8x32xf32> -> vector<8x128xf32>
      %109 = arith.truncf %93 : vector<8x32xf32> to vector<8x32xbf16>
      %c0_45 = arith.constant 0 : index
      %c0_46 = arith.constant 0 : index
      %110 = vector.load %arg15[%c0_45, %c0_46] : memref<32x128xbf16, #tpu.memory_space<vmem>>, vector<32x128xbf16>
      %cst_47 = arith.constant dense<0.000000e+00> : vector<8x128xf32>
      %111 = tpu.matmul %109, %110, %cst_47 {dimension_numbers = #tpu.dot_dimension_numbers<[1], [0], [0], [1], [0, 0, 1, 1], [], []>} : vector<8x32xbf16>, vector<32x128xbf16>, vector<8x128xf32> -> vector<8x128xf32>
      %112 = arith.truncf %95 : vector<8x32xf32> to vector<8x32xbf16>
      %c0_48 = arith.constant 0 : index
      %c0_49 = arith.constant 0 : index
      %113 = vector.load %arg16[%c0_48, %c0_49] : memref<32x128xbf16, #tpu.memory_space<vmem>>, vector<32x128xbf16>
      %cst_50 = arith.constant dense<0.000000e+00> : vector<8x128xf32>
      %114 = tpu.matmul %112, %113, %cst_50 {dimension_numbers = #tpu.dot_dimension_numbers<[1], [0], [0], [1], [0, 0, 1, 1], [], []>} : vector<8x32xbf16>, vector<32x128xbf16>, vector<8x128xf32> -> vector<8x128xf32>
      %115 = arith.addf %111, %114 : vector<8x128xf32>
      %116 = arith.mulf %115, %108 : vector<8x128xf32>
      %c0_51 = arith.constant 0 : index
      %c0_52 = arith.constant 0 : index
      %117 = vector.load %arg17[%c0_51, %c0_52] : memref<1x32xf32, #tpu.memory_space<vmem>>, vector<1x32xf32>
      %118 = vector.extract_strided_slice %116 {offsets = [0, 0], sizes = [8, 32], strides = [1, 1]} : vector<8x128xf32> to vector<8x32xf32>
      %119 = vector.broadcast %117 : vector<1x32xf32> to vector<8x32xf32>
      %120 = arith.addf %119, %118 : vector<8x32xf32>
      %121 = vector.extract_strided_slice %116 {offsets = [0, 32], sizes = [8, 32], strides = [1, 1]} : vector<8x128xf32> to vector<8x32xf32>
      %122 = arith.addf %120, %121 : vector<8x32xf32>
      %123 = vector.extract_strided_slice %116 {offsets = [0, 64], sizes = [8, 32], strides = [1, 1]} : vector<8x128xf32> to vector<8x32xf32>
      %124 = arith.addf %122, %123 : vector<8x32xf32>
      %125 = vector.extract_strided_slice %116 {offsets = [0, 96], sizes = [8, 32], strides = [1, 1]} : vector<8x128xf32> to vector<8x32xf32>
      %126 = arith.addf %124, %125 : vector<8x32xf32>
      %127 = arith.negf %126 : vector<8x32xf32>
      %128 = math.exp %127 : vector<8x32xf32>
      %cst_53 = arith.constant 1.000000e+00 : f32
      %129 = vector.broadcast %cst_53 : f32 to vector<8x32xf32>
      %130 = arith.addf %129, %128 : vector<8x32xf32>
      %131 = arith.divf %129, %130 : vector<8x32xf32>
      %132 = arith.mulf %126, %131 : vector<8x32xf32>
      %133 = arith.truncf %132 : vector<8x32xf32> to vector<8x32xbf16>
      %c0_54 = arith.constant 0 : index
      %c0_55 = arith.constant 0 : index
      %134 = vector.load %arg18[%c0_54, %c0_55] : memref<32x128xbf16, #tpu.memory_space<vmem>>, vector<32x128xbf16>
      %cst_56 = arith.constant dense<0.000000e+00> : vector<8x128xf32>
      %135 = tpu.matmul %133, %134, %cst_56 {dimension_numbers = #tpu.dot_dimension_numbers<[1], [0], [0], [1], [0, 0, 1, 1], [], []>} : vector<8x32xbf16>, vector<32x128xbf16>, vector<8x128xf32> -> vector<8x128xf32>
      %136 = arith.mulf %135, %108 : vector<8x128xf32>
      %c0_57 = arith.constant 0 : index
      %c0_58 = arith.constant 0 : index
      %137 = vector.load %arg19[%c0_57, %c0_58] : memref<1x32xf32, #tpu.memory_space<vmem>>, vector<1x32xf32>
      %138 = vector.extract_strided_slice %136 {offsets = [0, 0], sizes = [8, 32], strides = [1, 1]} : vector<8x128xf32> to vector<8x32xf32>
      %139 = vector.broadcast %137 : vector<1x32xf32> to vector<8x32xf32>
      %140 = arith.addf %139, %138 : vector<8x32xf32>
      %141 = vector.extract_strided_slice %136 {offsets = [0, 32], sizes = [8, 32], strides = [1, 1]} : vector<8x128xf32> to vector<8x32xf32>
      %142 = arith.addf %140, %141 : vector<8x32xf32>
      %143 = vector.extract_strided_slice %136 {offsets = [0, 64], sizes = [8, 32], strides = [1, 1]} : vector<8x128xf32> to vector<8x32xf32>
      %144 = arith.addf %142, %143 : vector<8x32xf32>
      %145 = vector.extract_strided_slice %136 {offsets = [0, 96], sizes = [8, 32], strides = [1, 1]} : vector<8x128xf32> to vector<8x32xf32>
      %146 = arith.addf %144, %145 : vector<8x32xf32>
      %147 = arith.addf %93, %146 : vector<8x32xf32>
      %c0_59 = arith.constant 0 : index
      %c0_60 = arith.constant 0 : index
      %148 = vector.load %arg20[%c0_59, %c0_60] : memref<8x32xf32, #tpu.memory_space<vmem>>, vector<8x32xf32>
      tpu.vector_store %arg20[%c0_59, %c0_60], %147 {strides = array<i32>} : memref<8x32xf32, #tpu.memory_space<vmem>>, vector<8x32xf32>,
    } else {
    }
    return
  }
  func.func @transform_0(%arg0: i32) -> (i32, i32) {
    %c0_i32 = arith.constant 0 : i32
    %c0_i32_0 = arith.constant 0 : i32
    return %c0_i32, %arg0 : i32, i32
  }
  func.func @transform_1(%arg0: i32) -> (i32, i32) {
    %c0_i32 = arith.constant 0 : i32
    %c0_i32_0 = arith.constant 0 : i32
    return %arg0, %c0_i32 : i32, i32
  }
  func.func @transform_2(%arg0: i32) -> (i32, i32) {
    %c0_i32 = arith.constant 0 : i32
    %c0_i32_0 = arith.constant 0 : i32
    return %arg0, %c0_i32 : i32, i32
  }
  func.func @transform_3(%arg0: i32) -> (i32, i32) {
    %c0_i32 = arith.constant 0 : i32
    %c0_i32_0 = arith.constant 0 : i32
    return %arg0, %c0_i32 : i32, i32
  }
  func.func @transform_4(%arg0: i32) -> (i32, i32) {
    %c0_i32 = arith.constant 0 : i32
    %c0_i32_0 = arith.constant 0 : i32
    return %arg0, %c0_i32 : i32, i32
  }
  func.func @transform_5(%arg0: i32) -> (i32, i32) {
    %c0_i32 = arith.constant 0 : i32
    %c0_i32_0 = arith.constant 0 : i32
    %c0_i32_1 = arith.constant 0 : i32
    return %c0_i32, %c0_i32_0 : i32, i32
  }
  func.func @transform_6(%arg0: i32) -> (i32, i32) {
    %c0_i32 = arith.constant 0 : i32
    %c0_i32_0 = arith.constant 0 : i32
    %c0_i32_1 = arith.constant 0 : i32
    return %c0_i32, %c0_i32_0 : i32, i32
  }
  func.func @transform_7(%arg0: i32) -> (i32, i32) {
    %c0_i32 = arith.constant 0 : i32
    %c0_i32_0 = arith.constant 0 : i32
    %c0_i32_1 = arith.constant 0 : i32
    return %c0_i32, %c0_i32_0 : i32, i32
  }
  func.func @transform_8(%arg0: i32) -> (i32, i32) {
    %c0_i32 = arith.constant 0 : i32
    %c0_i32_0 = arith.constant 0 : i32
    %c0_i32_1 = arith.constant 0 : i32
    return %c0_i32, %c0_i32_0 : i32, i32
  }
  func.func @transform_9(%arg0: i32) -> (i32, i32) {
    %c0_i32 = arith.constant 0 : i32
    %c0_i32_0 = arith.constant 0 : i32
    %c0_i32_1 = arith.constant 0 : i32
    return %c0_i32, %c0_i32_0 : i32, i32
  }
  func.func @transform_10(%arg0: i32) -> (i32, i32) {
    %c0_i32 = arith.constant 0 : i32
    %c0_i32_0 = arith.constant 0 : i32
    %c0_i32_1 = arith.constant 0 : i32
    return %c0_i32, %c0_i32_0 : i32, i32
  }
  func.func @transform_11(%arg0: i32) -> (i32, i32) {
    %c0_i32 = arith.constant 0 : i32
    %c0_i32_0 = arith.constant 0 : i32
    %c0_i32_1 = arith.constant 0 : i32
    return %c0_i32, %c0_i32_0 : i32, i32
  }
  func.func @transform_12(%arg0: i32) -> (i32, i32) {
    %c0_i32 = arith.constant 0 : i32
    %c0_i32_0 = arith.constant 0 : i32
    %c0_i32_1 = arith.constant 0 : i32
    return %c0_i32, %c0_i32_0 : i32, i32
  }
  func.func @transform_13(%arg0: i32) -> (i32, i32) {
    %c0_i32 = arith.constant 0 : i32
    %c0_i32_0 = arith.constant 0 : i32
    %c0_i32_1 = arith.constant 0 : i32
    return %c0_i32, %c0_i32_0 : i32, i32
  }
  func.func @transform_14(%arg0: i32) -> (i32, i32) {
    %c0_i32 = arith.constant 0 : i32
    %c0_i32_0 = arith.constant 0 : i32
    %c0_i32_1 = arith.constant 0 : i32
    return %c0_i32, %c0_i32_0 : i32, i32
  }
  func.func @transform_15(%arg0: i32) -> (i32, i32) {
    %c0_i32 = arith.constant 0 : i32
    %c0_i32_0 = arith.constant 0 : i32
    %c0_i32_1 = arith.constant 0 : i32
    return %c0_i32, %c0_i32_0 : i32, i32
  }
  func.func @transform_16(%arg0: i32) -> (i32, i32) {
    %c0_i32 = arith.constant 0 : i32
    %c0_i32_0 = arith.constant 0 : i32
    %c0_i32_1 = arith.constant 0 : i32
    return %c0_i32, %c0_i32_0 : i32, i32
  }
  func.func @transform_17(%arg0: i32) -> (i32, i32) {
    %c0_i32 = arith.constant 0 : i32
    %c0_i32_0 = arith.constant 0 : i32
    %c0_i32_1 = arith.constant 0 : i32
    return %c0_i32, %c0_i32_0 : i32, i32
  }
  func.func @transform_18(%arg0: i32) -> (i32, i32) {
    %c0_i32 = arith.constant 0 : i32
    %c0_i32_0 = arith.constant 0 : i32
    %c0_i32_1 = arith.constant 0 : i32
    return %c0_i32, %c0_i32_0 : i32, i32
  }
  func.func @transform_19(%arg0: i32) -> (i32, i32) {
    %c0_i32 = arith.constant 0 : i32
    %c0_i32_0 = arith.constant 0 : i32
    %c0_i32_1 = arith.constant 0 : i32
    return %c0_i32, %c0_i32_0 : i32, i32
  }
}

module attributes {stable_mosaic.version = 11 : i64} {
  func.func @_edge_update_kernel(%arg0: i32, %arg1: memref<16x21xf32, #tpu.memory_space<vmem>>, %arg2: memref<16x32xf32, #tpu.memory_space<vmem>>, %arg3: memref<16x32xf32, #tpu.memory_space<vmem>>, %arg4: memref<16x32xf32, #tpu.memory_space<vmem>>, %arg5: memref<32x128xbf16, #tpu.memory_space<vmem>>, %arg6: memref<32x128xbf16, #tpu.memory_space<vmem>>, %arg7: memref<1x32xf32, #tpu.memory_space<vmem>>, %arg8: memref<16x64xbf16, #tpu.memory_space<vmem>>, %arg9: memref<1x64xf32, #tpu.memory_space<vmem>>, %arg10: memref<32x32xbf16, #tpu.memory_space<vmem>>, %arg11: memref<1x32xf32, #tpu.memory_space<vmem>>, %arg12: memref<32x32xbf16, #tpu.memory_space<vmem>>, %arg13: memref<1x32xf32, #tpu.memory_space<vmem>>, %arg14: memref<32x128xbf16, #tpu.memory_space<vmem>>, %arg15: memref<1x32xf32, #tpu.memory_space<vmem>>, %arg16: memref<16x32xf32, #tpu.memory_space<vmem>>) attributes {dimension_semantics = [#tpu.dimension_semantics<parallel>], iteration_bounds = array<i64: 1>, scalar_prefetch = 0 : i64, scratch_operands = 0 : i64, tpu.core_type = #tpu.core_type<tc>, window_params = [{transform_indices = @transform_0, window_bounds = array<i64: 16, 21>}, {transform_indices = @transform_1, window_bounds = array<i64: 16, 32>}, {transform_indices = @transform_2, window_bounds = array<i64: 16, 32>}, {transform_indices = @transform_3, window_bounds = array<i64: 16, 32>}, {pipeline_mode = #tpu.pipeline_mode<synchronous>, transform_indices = @transform_4, window_bounds = array<i64: 32, 128>}, {pipeline_mode = #tpu.pipeline_mode<synchronous>, transform_indices = @transform_5, window_bounds = array<i64: 32, 128>}, {pipeline_mode = #tpu.pipeline_mode<synchronous>, transform_indices = @transform_6, window_bounds = array<i64: 1, 32>}, {pipeline_mode = #tpu.pipeline_mode<synchronous>, transform_indices = @transform_7, window_bounds = array<i64: 16, 64>}, {pipeline_mode = #tpu.pipeline_mode<synchronous>, transform_indices = @transform_8, window_bounds = array<i64: 1, 64>}, {pipeline_mode = #tpu.pipeline_mode<synchronous>, transform_indices = @transform_9, window_bounds = array<i64: 32, 32>}, {pipeline_mode = #tpu.pipeline_mode<synchronous>, transform_indices = @transform_10, window_bounds = array<i64: 1, 32>}, {pipeline_mode = #tpu.pipeline_mode<synchronous>, transform_indices = @transform_11, window_bounds = array<i64: 32, 32>}, {pipeline_mode = #tpu.pipeline_mode<synchronous>, transform_indices = @transform_12, window_bounds = array<i64: 1, 32>}, {pipeline_mode = #tpu.pipeline_mode<synchronous>, transform_indices = @transform_13, window_bounds = array<i64: 32, 128>}, {pipeline_mode = #tpu.pipeline_mode<synchronous>, transform_indices = @transform_14, window_bounds = array<i64: 1, 32>}, {transform_indices = @transform_15, window_bounds = array<i64: 16, 32>}]} {
    %c0 = arith.constant 0 : index
    %c0_0 = arith.constant 0 : index
    %0 = vector.load %arg1[%c0, %c0_0] : memref<16x21xf32, #tpu.memory_space<vmem>>, vector<16x21xf32>
    %1 = vector.extract_strided_slice %0 {offsets = [0, 1], sizes = [16, 4], strides = [1, 1]} : vector<16x21xf32> to vector<16x4xf32>
    %2 = vector.extract_strided_slice %1 {offsets = [0, 0], sizes = [16, 1], strides = [1, 1]} : vector<16x4xf32> to vector<16x1xf32>
    %3 = vector.shape_cast %2 : vector<16x1xf32> to vector<16x1xf32>
    %4 = vector.broadcast %3 : vector<16x1xf32> to vector<16x32xf32>
    %5 = vector.extract_strided_slice %1 {offsets = [0, 1], sizes = [16, 1], strides = [1, 1]} : vector<16x4xf32> to vector<16x1xf32>
    %6 = vector.shape_cast %5 : vector<16x1xf32> to vector<16x1xf32>
    %7 = vector.broadcast %6 : vector<16x1xf32> to vector<16x32xf32>
    %8 = vector.extract_strided_slice %1 {offsets = [0, 2], sizes = [16, 1], strides = [1, 1]} : vector<16x4xf32> to vector<16x1xf32>
    %9 = vector.shape_cast %8 : vector<16x1xf32> to vector<16x1xf32>
    %10 = vector.broadcast %9 : vector<16x1xf32> to vector<16x32xf32>
    %11 = vector.extract_strided_slice %1 {offsets = [0, 3], sizes = [16, 1], strides = [1, 1]} : vector<16x4xf32> to vector<16x1xf32>
    %12 = vector.shape_cast %11 : vector<16x1xf32> to vector<16x1xf32>
    %13 = vector.broadcast %12 : vector<16x1xf32> to vector<16x32xf32>
    %14 = tpu.concatenate %4, %7, %10, %13 in 1 : vector<16x32xf32>, vector<16x32xf32>, vector<16x32xf32>, vector<16x32xf32> -> vector<16x128xf32>
    %15 = vector.extract_strided_slice %0 {offsets = [0, 5], sizes = [16, 16], strides = [1, 1]} : vector<16x21xf32> to vector<16x16xf32>
    %16 = arith.truncf %15 : vector<16x16xf32> to vector<16x16xbf16>
    %c0_1 = arith.constant 0 : index
    %c0_2 = arith.constant 0 : index
    %17 = vector.load %arg8[%c0_1, %c0_2] : memref<16x64xbf16, #tpu.memory_space<vmem>>, vector<16x64xbf16>
    %cst = arith.constant dense<0.000000e+00> : vector<16x64xf32>
    %18 = tpu.matmul %16, %17, %cst {dimension_numbers = #tpu.dot_dimension_numbers<[1], [0], [0], [1], [0, 0, 1, 1], [], []>} : vector<16x16xbf16>, vector<16x64xbf16>, vector<16x64xf32> -> vector<16x64xf32>
    %c0_3 = arith.constant 0 : index
    %c0_4 = arith.constant 0 : index
    %19 = vector.load %arg9[%c0_3, %c0_4] : memref<1x64xf32, #tpu.memory_space<vmem>>, vector<1x64xf32>
    %20 = vector.broadcast %19 : vector<1x64xf32> to vector<16x64xf32>
    %21 = arith.addf %18, %20 : vector<16x64xf32>
    %22 = arith.negf %21 : vector<16x64xf32>
    %23 = math.exp %22 : vector<16x64xf32>
    %cst_5 = arith.constant 1.000000e+00 : f32
    %24 = vector.broadcast %cst_5 : f32 to vector<16x64xf32>
    %25 = arith.addf %24, %23 : vector<16x64xf32>
    %26 = arith.divf %24, %25 : vector<16x64xf32>
    %27 = arith.mulf %21, %26 : vector<16x64xf32>
    %28 = vector.extract_strided_slice %27 {offsets = [0, 0], sizes = [16, 32], strides = [1, 1]} : vector<16x64xf32> to vector<16x32xf32>
    %29 = arith.truncf %28 : vector<16x32xf32> to vector<16x32xbf16>
    %c0_6 = arith.constant 0 : index
    %c0_7 = arith.constant 0 : index
    %30 = vector.load %arg10[%c0_6, %c0_7] : memref<32x32xbf16, #tpu.memory_space<vmem>>, vector<32x32xbf16>
    %cst_8 = arith.constant dense<0.000000e+00> : vector<16x32xf32>
    %31 = tpu.matmul %29, %30, %cst_8 {dimension_numbers = #tpu.dot_dimension_numbers<[1], [0], [0], [1], [0, 0, 1, 1], [], []>} : vector<16x32xbf16>, vector<32x32xbf16>, vector<16x32xf32> -> vector<16x32xf32>
    %c0_9 = arith.constant 0 : index
    %c0_10 = arith.constant 0 : index
    %32 = vector.load %arg11[%c0_9, %c0_10] : memref<1x32xf32, #tpu.memory_space<vmem>>, vector<1x32xf32>
    %33 = vector.broadcast %32 : vector<1x32xf32> to vector<16x32xf32>
    %34 = arith.addf %31, %33 : vector<16x32xf32>
    %35 = vector.extract_strided_slice %27 {offsets = [0, 32], sizes = [16, 32], strides = [1, 1]} : vector<16x64xf32> to vector<16x32xf32>
    %36 = arith.truncf %35 : vector<16x32xf32> to vector<16x32xbf16>
    %c0_11 = arith.constant 0 : index
    %c0_12 = arith.constant 0 : index
    %37 = vector.load %arg12[%c0_11, %c0_12] : memref<32x32xbf16, #tpu.memory_space<vmem>>, vector<32x32xbf16>
    %cst_13 = arith.constant dense<0.000000e+00> : vector<16x32xf32>
    %38 = tpu.matmul %36, %37, %cst_13 {dimension_numbers = #tpu.dot_dimension_numbers<[1], [0], [0], [1], [0, 0, 1, 1], [], []>} : vector<16x32xbf16>, vector<32x32xbf16>, vector<16x32xf32> -> vector<16x32xf32>
    %c0_14 = arith.constant 0 : index
    %c0_15 = arith.constant 0 : index
    %39 = vector.load %arg13[%c0_14, %c0_15] : memref<1x32xf32, #tpu.memory_space<vmem>>, vector<1x32xf32>
    %40 = vector.broadcast %39 : vector<1x32xf32> to vector<16x32xf32>
    %41 = arith.addf %38, %40 : vector<16x32xf32>
    %c0_16 = arith.constant 0 : index
    %c0_17 = arith.constant 0 : index
    %42 = vector.load %arg2[%c0_16, %c0_17] : memref<16x32xf32, #tpu.memory_space<vmem>>, vector<16x32xf32>
    %43 = arith.truncf %42 : vector<16x32xf32> to vector<16x32xbf16>
    %c0_18 = arith.constant 0 : index
    %c0_19 = arith.constant 0 : index
    %44 = vector.load %arg5[%c0_18, %c0_19] : memref<32x128xbf16, #tpu.memory_space<vmem>>, vector<32x128xbf16>
    %cst_20 = arith.constant dense<0.000000e+00> : vector<16x128xf32>
    %45 = tpu.matmul %43, %44, %cst_20 {dimension_numbers = #tpu.dot_dimension_numbers<[1], [0], [0], [1], [0, 0, 1, 1], [], []>} : vector<16x32xbf16>, vector<32x128xbf16>, vector<16x128xf32> -> vector<16x128xf32>
    %c0_21 = arith.constant 0 : index
    %c0_22 = arith.constant 0 : index
    %46 = vector.load %arg3[%c0_21, %c0_22] : memref<16x32xf32, #tpu.memory_space<vmem>>, vector<16x32xf32>
    %47 = arith.truncf %46 : vector<16x32xf32> to vector<16x32xbf16>
    %c0_23 = arith.constant 0 : index
    %c0_24 = arith.constant 0 : index
    %48 = vector.load %arg6[%c0_23, %c0_24] : memref<32x128xbf16, #tpu.memory_space<vmem>>, vector<32x128xbf16>
    %cst_25 = arith.constant dense<0.000000e+00> : vector<16x128xf32>
    %49 = tpu.matmul %47, %48, %cst_25 {dimension_numbers = #tpu.dot_dimension_numbers<[1], [0], [0], [1], [0, 0, 1, 1], [], []>} : vector<16x32xbf16>, vector<32x128xbf16>, vector<16x128xf32> -> vector<16x128xf32>
    %50 = arith.addf %45, %49 : vector<16x128xf32>
    %51 = arith.mulf %50, %14 : vector<16x128xf32>
    %c0_26 = arith.constant 0 : index
    %c0_27 = arith.constant 0 : index
    %52 = vector.load %arg7[%c0_26, %c0_27] : memref<1x32xf32, #tpu.memory_space<vmem>>, vector<1x32xf32>
    %53 = vector.extract_strided_slice %51 {offsets = [0, 0], sizes = [16, 32], strides = [1, 1]} : vector<16x128xf32> to vector<16x32xf32>
    %54 = vector.broadcast %52 : vector<1x32xf32> to vector<16x32xf32>
    %55 = arith.addf %54, %53 : vector<16x32xf32>
    %56 = vector.extract_strided_slice %51 {offsets = [0, 32], sizes = [16, 32], strides = [1, 1]} : vector<16x128xf32> to vector<16x32xf32>
    %57 = arith.addf %55, %56 : vector<16x32xf32>
    %58 = vector.extract_strided_slice %51 {offsets = [0, 64], sizes = [16, 32], strides = [1, 1]} : vector<16x128xf32> to vector<16x32xf32>
    %59 = arith.addf %57, %58 : vector<16x32xf32>
    %60 = vector.extract_strided_slice %51 {offsets = [0, 96], sizes = [16, 32], strides = [1, 1]} : vector<16x128xf32> to vector<16x32xf32>
    %61 = arith.addf %59, %60 : vector<16x32xf32>
    %62 = arith.mulf %61, %34 : vector<16x32xf32>
    %63 = arith.negf %62 : vector<16x32xf32>
    %64 = math.exp %63 : vector<16x32xf32>
    %cst_28 = arith.constant 1.000000e+00 : f32
    %65 = vector.broadcast %cst_28 : f32 to vector<16x32xf32>
    %66 = arith.addf %65, %64 : vector<16x32xf32>
    %67 = arith.divf %65, %66 : vector<16x32xf32>
    %68 = arith.mulf %62, %67 : vector<16x32xf32>
    %69 = arith.truncf %68 : vector<16x32xf32> to vector<16x32xbf16>
    %c0_29 = arith.constant 0 : index
    %c0_30 = arith.constant 0 : index
    %70 = vector.load %arg14[%c0_29, %c0_30] : memref<32x128xbf16, #tpu.memory_space<vmem>>, vector<32x128xbf16>
    %cst_31 = arith.constant dense<0.000000e+00> : vector<16x128xf32>
    %71 = tpu.matmul %69, %70, %cst_31 {dimension_numbers = #tpu.dot_dimension_numbers<[1], [0], [0], [1], [0, 0, 1, 1], [], []>} : vector<16x32xbf16>, vector<32x128xbf16>, vector<16x128xf32> -> vector<16x128xf32>
    %72 = arith.mulf %71, %14 : vector<16x128xf32>
    %c0_32 = arith.constant 0 : index
    %c0_33 = arith.constant 0 : index
    %73 = vector.load %arg15[%c0_32, %c0_33] : memref<1x32xf32, #tpu.memory_space<vmem>>, vector<1x32xf32>
    %74 = vector.extract_strided_slice %72 {offsets = [0, 0], sizes = [16, 32], strides = [1, 1]} : vector<16x128xf32> to vector<16x32xf32>
    %75 = vector.broadcast %73 : vector<1x32xf32> to vector<16x32xf32>
    %76 = arith.addf %75, %74 : vector<16x32xf32>
    %77 = vector.extract_strided_slice %72 {offsets = [0, 32], sizes = [16, 32], strides = [1, 1]} : vector<16x128xf32> to vector<16x32xf32>
    %78 = arith.addf %76, %77 : vector<16x32xf32>
    %79 = vector.extract_strided_slice %72 {offsets = [0, 64], sizes = [16, 32], strides = [1, 1]} : vector<16x128xf32> to vector<16x32xf32>
    %80 = arith.addf %78, %79 : vector<16x32xf32>
    %81 = vector.extract_strided_slice %72 {offsets = [0, 96], sizes = [16, 32], strides = [1, 1]} : vector<16x128xf32> to vector<16x32xf32>
    %82 = arith.addf %80, %81 : vector<16x32xf32>
    %83 = arith.mulf %82, %41 : vector<16x32xf32>
    %84 = arith.negf %83 : vector<16x32xf32>
    %85 = math.exp %84 : vector<16x32xf32>
    %cst_34 = arith.constant 1.000000e+00 : f32
    %86 = vector.broadcast %cst_34 : f32 to vector<16x32xf32>
    %87 = arith.addf %86, %85 : vector<16x32xf32>
    %88 = arith.divf %86, %87 : vector<16x32xf32>
    %89 = arith.mulf %83, %88 : vector<16x32xf32>
    %c0_35 = arith.constant 0 : index
    %c0_36 = arith.constant 0 : index
    %90 = vector.load %arg4[%c0_35, %c0_36] : memref<16x32xf32, #tpu.memory_space<vmem>>, vector<16x32xf32>
    %91 = arith.addf %90, %89 : vector<16x32xf32>
    %c0_37 = arith.constant 0 : index
    %c0_38 = arith.constant 0 : index
    %92 = vector.load %arg16[%c0_37, %c0_38] : memref<16x32xf32, #tpu.memory_space<vmem>>, vector<16x32xf32>
    tpu.vector_store %arg16[%c0_37, %c0_38], %91 {strides = array<i32>} : memref<16x32xf32, #tpu.memory_space<vmem>>, vector<16x32xf32>,
    return
  }
  func.func @transform_0(%arg0: i32) -> (i32, i32) {
    %c0_i32 = arith.constant 0 : i32
    %c0_i32_0 = arith.constant 0 : i32
    return %arg0, %c0_i32 : i32, i32
  }
  func.func @transform_1(%arg0: i32) -> (i32, i32) {
    %c0_i32 = arith.constant 0 : i32
    %c0_i32_0 = arith.constant 0 : i32
    return %arg0, %c0_i32 : i32, i32
  }
  func.func @transform_2(%arg0: i32) -> (i32, i32) {
    %c0_i32 = arith.constant 0 : i32
    %c0_i32_0 = arith.constant 0 : i32
    return %arg0, %c0_i32 : i32, i32
  }
  func.func @transform_3(%arg0: i32) -> (i32, i32) {
    %c0_i32 = arith.constant 0 : i32
    %c0_i32_0 = arith.constant 0 : i32
    return %arg0, %c0_i32 : i32, i32
  }
  func.func @transform_4(%arg0: i32) -> (i32, i32) {
    %c0_i32 = arith.constant 0 : i32
    %c0_i32_0 = arith.constant 0 : i32
    %c0_i32_1 = arith.constant 0 : i32
    return %c0_i32, %c0_i32_0 : i32, i32
  }
  func.func @transform_5(%arg0: i32) -> (i32, i32) {
    %c0_i32 = arith.constant 0 : i32
    %c0_i32_0 = arith.constant 0 : i32
    %c0_i32_1 = arith.constant 0 : i32
    return %c0_i32, %c0_i32_0 : i32, i32
  }
  func.func @transform_6(%arg0: i32) -> (i32, i32) {
    %c0_i32 = arith.constant 0 : i32
    %c0_i32_0 = arith.constant 0 : i32
    %c0_i32_1 = arith.constant 0 : i32
    return %c0_i32, %c0_i32_0 : i32, i32
  }
  func.func @transform_7(%arg0: i32) -> (i32, i32) {
    %c0_i32 = arith.constant 0 : i32
    %c0_i32_0 = arith.constant 0 : i32
    %c0_i32_1 = arith.constant 0 : i32
    return %c0_i32, %c0_i32_0 : i32, i32
  }
  func.func @transform_8(%arg0: i32) -> (i32, i32) {
    %c0_i32 = arith.constant 0 : i32
    %c0_i32_0 = arith.constant 0 : i32
    %c0_i32_1 = arith.constant 0 : i32
    return %c0_i32, %c0_i32_0 : i32, i32
  }
  func.func @transform_9(%arg0: i32) -> (i32, i32) {
    %c0_i32 = arith.constant 0 : i32
    %c0_i32_0 = arith.constant 0 : i32
    %c0_i32_1 = arith.constant 0 : i32
    return %c0_i32, %c0_i32_0 : i32, i32
  }
  func.func @transform_10(%arg0: i32) -> (i32, i32) {
    %c0_i32 = arith.constant 0 : i32
    %c0_i32_0 = arith.constant 0 : i32
    %c0_i32_1 = arith.constant 0 : i32
    return %c0_i32, %c0_i32_0 : i32, i32
  }
  func.func @transform_11(%arg0: i32) -> (i32, i32) {
    %c0_i32 = arith.constant 0 : i32
    %c0_i32_0 = arith.constant 0 : i32
    %c0_i32_1 = arith.constant 0 : i32
    return %c0_i32, %c0_i32_0 : i32, i32
  }
  func.func @transform_12(%arg0: i32) -> (i32, i32) {
    %c0_i32 = arith.constant 0 : i32
    %c0_i32_0 = arith.constant 0 : i32
    %c0_i32_1 = arith.constant 0 : i32
    return %c0_i32, %c0_i32_0 : i32, i32
  }
  func.func @transform_13(%arg0: i32) -> (i32, i32) {
    %c0_i32 = arith.constant 0 : i32
    %c0_i32_0 = arith.constant 0 : i32
    %c0_i32_1 = arith.constant 0 : i32
    return %c0_i32, %c0_i32_0 : i32, i32
  }
  func.func @transform_14(%arg0: i32) -> (i32, i32) {
    %c0_i32 = arith.constant 0 : i32
    %c0_i32_0 = arith.constant 0 : i32
    %c0_i32_1 = arith.constant 0 : i32
    return %c0_i32, %c0_i32_0 : i32, i32
  }
  func.func @transform_15(%arg0: i32) -> (i32, i32) {
    %c0_i32 = arith.constant 0 : i32
    %c0_i32_0 = arith.constant 0 : i32
    return %arg0, %c0_i32 : i32, i32
  }
}

module attributes {stable_mosaic.version = 11 : i64} {
  func.func @_tp_single_kernel(%arg0: i32, %arg1: memref<8x32xf32, #tpu.memory_space<vmem>>, %arg2: memref<8x4xf32, #tpu.memory_space<vmem>>, %arg3: memref<32x64xbf16, #tpu.memory_space<vmem>>, %arg4: memref<1x16xf32, #tpu.memory_space<vmem>>, %arg5: memref<8x16xf32, #tpu.memory_space<vmem>>) attributes {dimension_semantics = [#tpu.dimension_semantics<parallel>], iteration_bounds = array<i64: 1>, scalar_prefetch = 0 : i64, scratch_operands = 0 : i64, tpu.core_type = #tpu.core_type<tc>, window_params = [{transform_indices = @transform_0, window_bounds = array<i64: 8, 32>}, {transform_indices = @transform_1, window_bounds = array<i64: 8, 4>}, {pipeline_mode = #tpu.pipeline_mode<synchronous>, transform_indices = @transform_2, window_bounds = array<i64: 32, 64>}, {pipeline_mode = #tpu.pipeline_mode<synchronous>, transform_indices = @transform_3, window_bounds = array<i64: 1, 16>}, {transform_indices = @transform_4, window_bounds = array<i64: 8, 16>}]} {
    %c0 = arith.constant 0 : index
    %c0_0 = arith.constant 0 : index
    %0 = vector.load %arg2[%c0, %c0_0] : memref<8x4xf32, #tpu.memory_space<vmem>>, vector<8x4xf32>
    %1 = vector.extract_strided_slice %0 {offsets = [0, 0], sizes = [8, 1], strides = [1, 1]} : vector<8x4xf32> to vector<8x1xf32>
    %2 = vector.shape_cast %1 : vector<8x1xf32> to vector<8x1xf32>
    %3 = vector.broadcast %2 : vector<8x1xf32> to vector<8x16xf32>
    %4 = vector.extract_strided_slice %0 {offsets = [0, 1], sizes = [8, 1], strides = [1, 1]} : vector<8x4xf32> to vector<8x1xf32>
    %5 = vector.shape_cast %4 : vector<8x1xf32> to vector<8x1xf32>
    %6 = vector.broadcast %5 : vector<8x1xf32> to vector<8x16xf32>
    %7 = vector.extract_strided_slice %0 {offsets = [0, 2], sizes = [8, 1], strides = [1, 1]} : vector<8x4xf32> to vector<8x1xf32>
    %8 = vector.shape_cast %7 : vector<8x1xf32> to vector<8x1xf32>
    %9 = vector.broadcast %8 : vector<8x1xf32> to vector<8x16xf32>
    %10 = vector.extract_strided_slice %0 {offsets = [0, 3], sizes = [8, 1], strides = [1, 1]} : vector<8x4xf32> to vector<8x1xf32>
    %11 = vector.shape_cast %10 : vector<8x1xf32> to vector<8x1xf32>
    %12 = vector.broadcast %11 : vector<8x1xf32> to vector<8x16xf32>
    %13 = tpu.concatenate %3, %6, %9, %12 in 1 : vector<8x16xf32>, vector<8x16xf32>, vector<8x16xf32>, vector<8x16xf32> -> vector<8x64xf32>
    %c0_1 = arith.constant 0 : index
    %c0_2 = arith.constant 0 : index
    %14 = vector.load %arg1[%c0_1, %c0_2] : memref<8x32xf32, #tpu.memory_space<vmem>>, vector<8x32xf32>
    %15 = arith.truncf %14 : vector<8x32xf32> to vector<8x32xbf16>
    %c0_3 = arith.constant 0 : index
    %c0_4 = arith.constant 0 : index
    %16 = vector.load %arg3[%c0_3, %c0_4] : memref<32x64xbf16, #tpu.memory_space<vmem>>, vector<32x64xbf16>
    %cst = arith.constant dense<0.000000e+00> : vector<8x64xf32>
    %17 = tpu.matmul %15, %16, %cst {dimension_numbers = #tpu.dot_dimension_numbers<[1], [0], [0], [1], [0, 0, 1, 1], [], []>} : vector<8x32xbf16>, vector<32x64xbf16>, vector<8x64xf32> -> vector<8x64xf32>
    %18 = arith.mulf %17, %13 : vector<8x64xf32>
    %c0_5 = arith.constant 0 : index
    %c0_6 = arith.constant 0 : index
    %19 = vector.load %arg4[%c0_5, %c0_6] : memref<1x16xf32, #tpu.memory_space<vmem>>, vector<1x16xf32>
    %20 = vector.extract_strided_slice %18 {offsets = [0, 0], sizes = [8, 16], strides = [1, 1]} : vector<8x64xf32> to vector<8x16xf32>
    %21 = vector.broadcast %19 : vector<1x16xf32> to vector<8x16xf32>
    %22 = arith.addf %21, %20 : vector<8x16xf32>
    %23 = vector.extract_strided_slice %18 {offsets = [0, 16], sizes = [8, 16], strides = [1, 1]} : vector<8x64xf32> to vector<8x16xf32>
    %24 = arith.addf %22, %23 : vector<8x16xf32>
    %25 = vector.extract_strided_slice %18 {offsets = [0, 32], sizes = [8, 16], strides = [1, 1]} : vector<8x64xf32> to vector<8x16xf32>
    %26 = arith.addf %24, %25 : vector<8x16xf32>
    %27 = vector.extract_strided_slice %18 {offsets = [0, 48], sizes = [8, 16], strides = [1, 1]} : vector<8x64xf32> to vector<8x16xf32>
    %28 = arith.addf %26, %27 : vector<8x16xf32>
    %c0_7 = arith.constant 0 : index
    %c0_8 = arith.constant 0 : index
    %29 = vector.load %arg5[%c0_7, %c0_8] : memref<8x16xf32, #tpu.memory_space<vmem>>, vector<8x16xf32>
    tpu.vector_store %arg5[%c0_7, %c0_8], %28 {strides = array<i32>} : memref<8x16xf32, #tpu.memory_space<vmem>>, vector<8x16xf32>,
    return
  }
  func.func @transform_0(%arg0: i32) -> (i32, i32) {
    %c0_i32 = arith.constant 0 : i32
    %c0_i32_0 = arith.constant 0 : i32
    return %arg0, %c0_i32 : i32, i32
  }
  func.func @transform_1(%arg0: i32) -> (i32, i32) {
    %c0_i32 = arith.constant 0 : i32
    %c0_i32_0 = arith.constant 0 : i32
    return %arg0, %c0_i32 : i32, i32
  }
  func.func @transform_2(%arg0: i32) -> (i32, i32) {
    %c0_i32 = arith.constant 0 : i32
    %c0_i32_0 = arith.constant 0 : i32
    %c0_i32_1 = arith.constant 0 : i32
    return %c0_i32, %c0_i32_0 : i32, i32
  }
  func.func @transform_3(%arg0: i32) -> (i32, i32) {
    %c0_i32 = arith.constant 0 : i32
    %c0_i32_0 = arith.constant 0 : i32
    %c0_i32_1 = arith.constant 0 : i32
    return %c0_i32, %c0_i32_0 : i32, i32
  }
  func.func @transform_4(%arg0: i32) -> (i32, i32) {
    %c0_i32 = arith.constant 0 : i32
    %c0_i32_0 = arith.constant 0 : i32
    return %arg0, %c0_i32 : i32, i32
  }
}

module attributes {stable_mosaic.version = 11 : i64} {
  func.func @_edge_pre_kernel(%arg0: i32, %arg1: memref<16x21xf32, #tpu.memory_space<vmem>>, %arg2: memref<16x32xf32, #tpu.memory_space<vmem>>, %arg3: memref<32x64xbf16, #tpu.memory_space<vmem>>, %arg4: memref<1x16xf32, #tpu.memory_space<vmem>>, %arg5: memref<16x32xbf16, #tpu.memory_space<vmem>>, %arg6: memref<1x32xf32, #tpu.memory_space<vmem>>, %arg7: memref<32x16xbf16, #tpu.memory_space<vmem>>, %arg8: memref<1x16xf32, #tpu.memory_space<vmem>>, %arg9: memref<16x16xf32, #tpu.memory_space<vmem>>) attributes {dimension_semantics = [#tpu.dimension_semantics<parallel>], iteration_bounds = array<i64: 1>, scalar_prefetch = 0 : i64, scratch_operands = 0 : i64, tpu.core_type = #tpu.core_type<tc>, window_params = [{transform_indices = @transform_0, window_bounds = array<i64: 16, 21>}, {transform_indices = @transform_1, window_bounds = array<i64: 16, 32>}, {pipeline_mode = #tpu.pipeline_mode<synchronous>, transform_indices = @transform_2, window_bounds = array<i64: 32, 64>}, {pipeline_mode = #tpu.pipeline_mode<synchronous>, transform_indices = @transform_3, window_bounds = array<i64: 1, 16>}, {pipeline_mode = #tpu.pipeline_mode<synchronous>, transform_indices = @transform_4, window_bounds = array<i64: 16, 32>}, {pipeline_mode = #tpu.pipeline_mode<synchronous>, transform_indices = @transform_5, window_bounds = array<i64: 1, 32>}, {pipeline_mode = #tpu.pipeline_mode<synchronous>, transform_indices = @transform_6, window_bounds = array<i64: 32, 16>}, {pipeline_mode = #tpu.pipeline_mode<synchronous>, transform_indices = @transform_7, window_bounds = array<i64: 1, 16>}, {transform_indices = @transform_8, window_bounds = array<i64: 16, 16>}]} {
    %c0 = arith.constant 0 : index
    %c0_0 = arith.constant 0 : index
    %0 = vector.load %arg1[%c0, %c0_0] : memref<16x21xf32, #tpu.memory_space<vmem>>, vector<16x21xf32>
    %1 = vector.extract_strided_slice %0 {offsets = [0, 1], sizes = [16, 4], strides = [1, 1]} : vector<16x21xf32> to vector<16x4xf32>
    %2 = vector.extract_strided_slice %1 {offsets = [0, 0], sizes = [16, 1], strides = [1, 1]} : vector<16x4xf32> to vector<16x1xf32>
    %3 = vector.shape_cast %2 : vector<16x1xf32> to vector<16x1xf32>
    %4 = vector.broadcast %3 : vector<16x1xf32> to vector<16x16xf32>
    %5 = vector.extract_strided_slice %1 {offsets = [0, 1], sizes = [16, 1], strides = [1, 1]} : vector<16x4xf32> to vector<16x1xf32>
    %6 = vector.shape_cast %5 : vector<16x1xf32> to vector<16x1xf32>
    %7 = vector.broadcast %6 : vector<16x1xf32> to vector<16x16xf32>
    %8 = vector.extract_strided_slice %1 {offsets = [0, 2], sizes = [16, 1], strides = [1, 1]} : vector<16x4xf32> to vector<16x1xf32>
    %9 = vector.shape_cast %8 : vector<16x1xf32> to vector<16x1xf32>
    %10 = vector.broadcast %9 : vector<16x1xf32> to vector<16x16xf32>
    %11 = vector.extract_strided_slice %1 {offsets = [0, 3], sizes = [16, 1], strides = [1, 1]} : vector<16x4xf32> to vector<16x1xf32>
    %12 = vector.shape_cast %11 : vector<16x1xf32> to vector<16x1xf32>
    %13 = vector.broadcast %12 : vector<16x1xf32> to vector<16x16xf32>
    %14 = tpu.concatenate %4, %7, %10, %13 in 1 : vector<16x16xf32>, vector<16x16xf32>, vector<16x16xf32>, vector<16x16xf32> -> vector<16x64xf32>
    %15 = vector.extract_strided_slice %0 {offsets = [0, 5], sizes = [16, 16], strides = [1, 1]} : vector<16x21xf32> to vector<16x16xf32>
    %16 = arith.truncf %15 : vector<16x16xf32> to vector<16x16xbf16>
    %c0_1 = arith.constant 0 : index
    %c0_2 = arith.constant 0 : index
    %17 = vector.load %arg5[%c0_1, %c0_2] : memref<16x32xbf16, #tpu.memory_space<vmem>>, vector<16x32xbf16>
    %cst = arith.constant dense<0.000000e+00> : vector<16x32xf32>
    %18 = tpu.matmul %16, %17, %cst {dimension_numbers = #tpu.dot_dimension_numbers<[1], [0], [0], [1], [0, 0, 1, 1], [], []>} : vector<16x16xbf16>, vector<16x32xbf16>, vector<16x32xf32> -> vector<16x32xf32>
    %c0_3 = arith.constant 0 : index
    %c0_4 = arith.constant 0 : index
    %19 = vector.load %arg6[%c0_3, %c0_4] : memref<1x32xf32, #tpu.memory_space<vmem>>, vector<1x32xf32>
    %20 = vector.broadcast %19 : vector<1x32xf32> to vector<16x32xf32>
    %21 = arith.addf %18, %20 : vector<16x32xf32>
    %22 = arith.negf %21 : vector<16x32xf32>
    %23 = math.exp %22 : vector<16x32xf32>
    %cst_5 = arith.constant 1.000000e+00 : f32
    %24 = vector.broadcast %cst_5 : f32 to vector<16x32xf32>
    %25 = arith.addf %24, %23 : vector<16x32xf32>
    %26 = arith.divf %24, %25 : vector<16x32xf32>
    %27 = arith.mulf %21, %26 : vector<16x32xf32>
    %28 = arith.truncf %27 : vector<16x32xf32> to vector<16x32xbf16>
    %c0_6 = arith.constant 0 : index
    %c0_7 = arith.constant 0 : index
    %29 = vector.load %arg7[%c0_6, %c0_7] : memref<32x16xbf16, #tpu.memory_space<vmem>>, vector<32x16xbf16>
    %cst_8 = arith.constant dense<0.000000e+00> : vector<16x16xf32>
    %30 = tpu.matmul %28, %29, %cst_8 {dimension_numbers = #tpu.dot_dimension_numbers<[1], [0], [0], [1], [0, 0, 1, 1], [], []>} : vector<16x32xbf16>, vector<32x16xbf16>, vector<16x16xf32> -> vector<16x16xf32>
    %c0_9 = arith.constant 0 : index
    %c0_10 = arith.constant 0 : index
    %31 = vector.load %arg8[%c0_9, %c0_10] : memref<1x16xf32, #tpu.memory_space<vmem>>, vector<1x16xf32>
    %32 = vector.broadcast %31 : vector<1x16xf32> to vector<16x16xf32>
    %33 = arith.addf %30, %32 : vector<16x16xf32>
    %c0_11 = arith.constant 0 : index
    %c0_12 = arith.constant 0 : index
    %34 = vector.load %arg2[%c0_11, %c0_12] : memref<16x32xf32, #tpu.memory_space<vmem>>, vector<16x32xf32>
    %35 = arith.truncf %34 : vector<16x32xf32> to vector<16x32xbf16>
    %c0_13 = arith.constant 0 : index
    %c0_14 = arith.constant 0 : index
    %36 = vector.load %arg3[%c0_13, %c0_14] : memref<32x64xbf16, #tpu.memory_space<vmem>>, vector<32x64xbf16>
    %cst_15 = arith.constant dense<0.000000e+00> : vector<16x64xf32>
    %37 = tpu.matmul %35, %36, %cst_15 {dimension_numbers = #tpu.dot_dimension_numbers<[1], [0], [0], [1], [0, 0, 1, 1], [], []>} : vector<16x32xbf16>, vector<32x64xbf16>, vector<16x64xf32> -> vector<16x64xf32>
    %38 = arith.mulf %37, %14 : vector<16x64xf32>
    %c0_16 = arith.constant 0 : index
    %c0_17 = arith.constant 0 : index
    %39 = vector.load %arg4[%c0_16, %c0_17] : memref<1x16xf32, #tpu.memory_space<vmem>>, vector<1x16xf32>
    %40 = vector.extract_strided_slice %38 {offsets = [0, 0], sizes = [16, 16], strides = [1, 1]} : vector<16x64xf32> to vector<16x16xf32>
    %41 = vector.broadcast %39 : vector<1x16xf32> to vector<16x16xf32>
    %42 = arith.addf %41, %40 : vector<16x16xf32>
    %43 = vector.extract_strided_slice %38 {offsets = [0, 16], sizes = [16, 16], strides = [1, 1]} : vector<16x64xf32> to vector<16x16xf32>
    %44 = arith.addf %42, %43 : vector<16x16xf32>
    %45 = vector.extract_strided_slice %38 {offsets = [0, 32], sizes = [16, 16], strides = [1, 1]} : vector<16x64xf32> to vector<16x16xf32>
    %46 = arith.addf %44, %45 : vector<16x16xf32>
    %47 = vector.extract_strided_slice %38 {offsets = [0, 48], sizes = [16, 16], strides = [1, 1]} : vector<16x64xf32> to vector<16x16xf32>
    %48 = arith.addf %46, %47 : vector<16x16xf32>
    %49 = arith.mulf %48, %33 : vector<16x16xf32>
    %c0_18 = arith.constant 0 : index
    %c0_19 = arith.constant 0 : index
    %50 = vector.load %arg9[%c0_18, %c0_19] : memref<16x16xf32, #tpu.memory_space<vmem>>, vector<16x16xf32>
    tpu.vector_store %arg9[%c0_18, %c0_19], %49 {strides = array<i32>} : memref<16x16xf32, #tpu.memory_space<vmem>>, vector<16x16xf32>,
    return
  }
  func.func @transform_0(%arg0: i32) -> (i32, i32) {
    %c0_i32 = arith.constant 0 : i32
    %c0_i32_0 = arith.constant 0 : i32
    return %arg0, %c0_i32 : i32, i32
  }
  func.func @transform_1(%arg0: i32) -> (i32, i32) {
    %c0_i32 = arith.constant 0 : i32
    %c0_i32_0 = arith.constant 0 : i32
    return %arg0, %c0_i32 : i32, i32
  }
  func.func @transform_2(%arg0: i32) -> (i32, i32) {
    %c0_i32 = arith.constant 0 : i32
    %c0_i32_0 = arith.constant 0 : i32
    %c0_i32_1 = arith.constant 0 : i32
    return %c0_i32, %c0_i32_0 : i32, i32
  }
  func.func @transform_3(%arg0: i32) -> (i32, i32) {
    %c0_i32 = arith.constant 0 : i32
    %c0_i32_0 = arith.constant 0 : i32
    %c0_i32_1 = arith.constant 0 : i32
    return %c0_i32, %c0_i32_0 : i32, i32
  }
  func.func @transform_4(%arg0: i32) -> (i32, i32) {
    %c0_i32 = arith.constant 0 : i32
    %c0_i32_0 = arith.constant 0 : i32
    %c0_i32_1 = arith.constant 0 : i32
    return %c0_i32, %c0_i32_0 : i32, i32
  }
  func.func @transform_5(%arg0: i32) -> (i32, i32) {
    %c0_i32 = arith.constant 0 : i32
    %c0_i32_0 = arith.constant 0 : i32
    %c0_i32_1 = arith.constant 0 : i32
    return %c0_i32, %c0_i32_0 : i32, i32
  }
  func.func @transform_6(%arg0: i32) -> (i32, i32) {
    %c0_i32 = arith.constant 0 : i32
    %c0_i32_0 = arith.constant 0 : i32
    %c0_i32_1 = arith.constant 0 : i32
    return %c0_i32, %c0_i32_0 : i32, i32
  }
  func.func @transform_7(%arg0: i32) -> (i32, i32) {
    %c0_i32 = arith.constant 0 : i32
    %c0_i32_0 = arith.constant 0 : i32
    %c0_i32_1 = arith.constant 0 : i32
    return %c0_i32, %c0_i32_0 : i32, i32
  }
  func.func @transform_8(%arg0: i32) -> (i32, i32) {
    %c0_i32 = arith.constant 0 : i32
    %c0_i32_0 = arith.constant 0 : i32
    return %arg0, %c0_i32 : i32, i32
  }
}

</mosaic_0001>

<bundles_post_ra>
// kernel: edgesegnn_forward.9
= control target key start
LH: loop header
LB: loop body
LE: loop exit
PB: predicated region body
PF: predicated region fallthrough
CT: control target
= control target key end

     0   :  { %v361_v2 = vmov 0.0   ;;  %vm362_vm0 = vmmov 0   ;;  %v363_v6 = vmov 1   ;;  %vm63_vm1 = vcmask 261120   ;;  %s370_s20 = smov 32   ;;  %s462_s0 = inlined_call_operand.vmem [shape: f32[16,21], index: 0, kind: input, shape index: {}]   ;;  %s463_s4 = inlined_call_operand.vmem [shape: bf16[32,128], index: 4, kind: input, shape index: {}]   ;;  %s464_s3 = inlined_call_operand.vmem [shape: bf16[16,128], index: 3, kind: input, shape index: {}]   ;;  %s465_s1 = inlined_call_operand.vmem [shape: f32[16,32], index: 1, kind: input, shape index: {}]   ;;  %s466_s5 = inlined_call_operand.vmem [shape: bf16[32,128], index: 5, kind: input, shape index: {}]   ;;  %s467_s2 = inlined_call_operand.vmem [shape: f32[16,32], index: 2, kind: input, shape index: {}]   ;;  %s468_s6 = inlined_call_operand.vmem [shape: f32[1,32], index: 6, kind: input, shape index: {}]   ;;  %s469_s7 = inlined_call_operand.vmem [shape: f32[16,32], index: 7, kind: output, shape index: {}]  }
   0x1   :  { %v27_v0 = vld [vmem:[%s462_s0] sm:$0xff]  ;;  %v28_v1 = vld [vmem:[%s462_s0 + $0x8] sm:$0xff]  ;;  %317 = vmatprep.subr.bf16.mxu0 %v361_v2  ;;  %325 = vmatprep.subr.bf16.mxu1 %v361_v2  ;;  %s364_s0 = smov 123   ;;  %v365_v11 = vmov 2   ;;  %v366_v12 = vmov 3   ;;  %v367_v13 = vmov 4  }
   0x2   :  { %v72_v3 = vpack.c.bf16 %v28_v1, %v27_v0  ;;  %v356_v4 = vld [vmem:[%s463_s4 + $0x8] sm:$0xff]   ;;  %321 = vmatprep.mubr.msk.bf16.mxu0 %vm362_vm0, %v361_v2  ;;  %327 = vmatprep.mubr.msk.bf16.mxu1 %vm362_vm0, %v361_v2  ;;  %v357_v5 = vld [vmem:[%s464_s3] sm:$0xff]   ;;  %vm147_vm2 = vcmask 130048   ;;  %vm66_vm3 = vcmask 523264   ;;  %vm69_vm4 = vcmask 785408  }
   0x3   :  { %350 = vset.pattern.permute.xlu1 %v363_v6  ;;  %349 = vset.pattern.permute.xlu0 %v363_v6  ;;  %v358_v7 = vld [vmem:[%s463_s4] sm:$0xff]   ;;  %v76_v9 = vld [vmem:[%s465_s1 + $0x8] sm:$0xff] }
   0x4   :  { %139 = vrot.lane.b32.xlu0 %v72_v3, %s364_s0  ;;  %318 = vmatpush3.bf16.msra.mxu0 %v356_v4  ;;  %v75_v8 = vld [vmem:[%s465_s1] sm:$0xff]  ;;  %v359_v14 = vld [vmem:[%s466_s5 + $0x8] sm:$0xff]  }
   0x5   :  { %319 = vmatprep.subr.bf16.mxu0 %v361_v2  ;;  %326 = vmatpush3.bf16.msra.mxu1 %v357_v5  ;;  %v77_v10 = vpack.c.bf16 %v76_v9, %v75_v8  ;;  %v360_v16 = vld [vmem:[%s466_s5] sm:$0xff]   ;;  %v193_v18 = vld [vmem:[%s467_s2 + $0x8] sm:$0xff]  ;;  %s369_s5 = smov 96  }
   0x6   :  { %331 = vmatprep.subr.bf16.mxu1 %v361_v2  ;;  %36 = vperm.xlu1 %350, %v28_v1   ;;  %v192_v17 = vld [vmem:[%s467_s2] sm:$0xff]  ;;  %s368_s2 = smov 64  }
   0x7   :  { %v194_v19 = vpack.c.bf16 %v193_v18, %v192_v17  ;;  %v308_v52 = vld [vmem:[%s468_s6] ss:$0 sm:$0xff] }
   0x8   :  { %320 = vmatpush3.bf16.msra.mxu0 %v358_v7  ;;  %31 = vperm.xlu0 %349, %v27_v0  }
   0xa   :  { %351 = vset.pattern.permute.xlu1 %v365_v11 }
   0xb   :  { %322 = vmatmul.mubr.msk.bf16.vlgmr.msra.gmra.mxu0 %vm63_vm1, %v77_v10  ;;  %40 = vperm.xlu1 %351, %v27_v0  }
   0xc   :  { %352 = vset.pattern.permute.xlu0 %v366_v12 }
   0xd   :  { %48 = vperm.xlu0 %352, %v27_v0  }
   0xf   :  { %44 = vperm.xlu1 %351, %v28_v1  }
  0x11   :  { %355 = vset.pattern.permute.xlu0 %v367_v13 }
  0x12   :  { %60 = vperm.xlu0 %355, %v28_v1  }
  0x13   :  { %353 = vset.pattern.permute.xlu1 %v366_v12 }
  0x14   :  { %52 = vperm.xlu1 %353, %v28_v1  }
  0x18   :  { %354 = vset.pattern.permute.xlu1 %v367_v13 }
  0x19   :  { %56 = vperm.xlu1 %354, %v27_v0  }
  0x76   :  { %v140_v15 = vpop.permute.xlu0 %139 }
  0x77   :  { %328 = vmatmul.mubr.msk.bf16.vlgmr.msra.gmra.mxu1 %vm147_vm2, %v140_v15 }
  0x78   :  { %332 = vmatpush3.bf16.msra.mxu1 %v359_v14  ;;  %335 = vmatprep.mubr.msk.bf16.mxu1 %vm362_vm0, %v361_v2 }
  0x79   :  { %333 = vmatprep.subr.bf16.mxu1 %v361_v2 }
  0x7c   :  { %334 = vmatpush3.bf16.msra.mxu1 %v360_v16 }
  0x7f   :  { %336 = vmatmul.mubr.msk.bf16.vlgmr.msra.gmra.mxu1 %vm63_vm1, %v194_v19 }
  0x81   :  { %v37_v24 = vpop.permute.xlu1 %36 }
  0x83   :  { %v32_v27 = vpop.permute.xlu0 %31 }
  0x86   :  { %v41_v25 = vpop.permute.xlu1 %40 }
  0x87   :  { %v64_v31 = vsel %vm63_vm1, %v32_v27, %v41_v25 }
  0x88   :  { %v49_v33 = vpop.permute.xlu0 %48 }
  0x89   :  { %v67_v35 = vsel %vm66_vm3, %v64_v31, %v49_v33 }
  0x8a   :  { %v45_v26 = vpop.permute.xlu1 %44 }
  0x8b   :  { %v65_v38 = vsel %vm63_vm1, %v37_v24, %v45_v26 }
  0x8d   :  { %v61_v44 = vpop.permute.xlu0 %60 }
  0x8f   :  { %v53_v30 = vpop.permute.xlu1 %52 }
  0x90   :  { %v68_v43 = vsel %vm66_vm3, %v65_v38, %v53_v30 }
  0x91   :  { %v71_v49 = vsel %vm69_vm4, %v68_v43, %v61_v44 }
  0x94   :  { %v57_v36 = vpop.permute.xlu1 %56 }
  0x95   :  { %v70_v41 = vsel %vm69_vm4, %v67_v35, %v57_v36 }
  0xcb   :  { %v131_v20 = vpop.f32.mrf.mxu0 }
  0xcd   :  { %v323_v21 = vpop.f32.mrf.mxu0 }
  0xcf   :  { %v134_v22 = vpop.f32.mrf.mxu0 }
  0xd1   :  { %v324_v23 = vpop.f32.mrf.mxu0 }
 0x137   :  { %v185_v28 = vpop.f32.mrf.mxu1 }
 0x138   :  { %v186_v37 = vadd.f32 %v185_v28, %v131_v20 }
 0x139   :  { %v329_v29 = vpop.f32.mrf.mxu1 }
 0x13b   :  { %v188_v32 = vpop.f32.mrf.mxu1 }
 0x13c   :  { %v189_v45 = vadd.f32 %v188_v32, %v134_v22 }
 0x13d   :  { %v330_v34 = vpop.f32.mrf.mxu1 }
 0x13f   :  { %v248_v39 = vpop.f32.mrf.mxu1 }
 0x140   :  { %v255_v40 = vadd.f32 %v248_v39, %v186_v37 }
 0x141   :  { %v337_v42 = vpop.f32.mrf.mxu1 }
 0x142   :  { %v257_v46 = vmul.f32 %v255_v40, %v70_v41 }
 0x143   :  { %v251_v47 = vpop.f32.mrf.mxu1 }
 0x144   :  { %v256_v48 = vadd.f32 %v251_v47, %v189_v45  ;;  %278 = vrot.lane.b32.xlu0 %v257_v46, %s368_s2  ;;  %270 = vrot.lane.b32.xlu1 %v257_v46, %s369_s5  ;;  %v266_v53 = vadd.f32 %v308_v52, %v257_v46 }
 0x145   :  { %v338_v50 = vpop.f32.mrf.mxu1 }
 0x146   :  { %v258_v51 = vmul.f32 %v256_v48, %v71_v49 }
 0x148   :  { %286 = vrot.lane.b32.xlu0 %v257_v46, %s370_s20  ;;  %272 = vrot.lane.b32.xlu1 %v258_v51, %s369_s5  ;;  %v267_v61 = vadd.f32 %v308_v52, %v258_v51 }
 0x14c   :  { %280 = vrot.lane.b32.xlu1 %v258_v51, %s368_s2 }
 0x150   :  { %288 = vrot.lane.b32.xlu1 %v258_v51, %s370_s20 }
 0x1b6   :  { %v271_v54 = vpop.permute.xlu1 %270  ;;  %v279_v55 = vpop.permute.xlu0 %278 }
 0x1b7   :  { %v276_v56 = vadd.f32 %v271_v54, %v266_v53 }
 0x1b9   :  { %v284_v57 = vadd.f32 %v279_v55, %v276_v56 }
 0x1ba   :  { %v273_v58 = vpop.permute.xlu1 %272  ;;  %v287_v59 = vpop.permute.xlu0 %286 }
 0x1bb   :  { %v292_v60 = vadd.f32 %v287_v59, %v284_v57  ;;  %v277_v63 = vadd.f32 %v273_v58, %v267_v61 }
 0x1bd   :  { %294 = vst.msk [vmem:[%s469_s7] sm:$0xff] %vm63_vm1, %v292_v60 }
 0x1be   :  { %v281_v62 = vpop.permute.xlu1 %280 }
 0x1bf   :  { %v285_v0 = vadd.f32 %v281_v62, %v277_v63 }
 0x1c2   :  { %v289_v1 = vpop.permute.xlu1 %288 }
 0x1c3   :  { %v293_v2 = vadd.f32 %v289_v1, %v285_v0 }
 0x1c5   :  { %295 = vst.msk [vmem:[%s469_s7 + $0x8] sm:$0xff] %vm63_vm1, %v293_v2 }

// kernel: edgesegnn_forward.8
= control target key start
LH: loop header
LB: loop body
LE: loop exit
PB: predicated region body
PF: predicated region fallthrough
CT: control target
= control target key end

     0   :  { %vm49_vm0 = vcmask 1043456   ;;  %v144_v0 = vmov 0.0   ;;  %vm145_vm1 = vmmov 0   ;;  %v146_v6 = vmov 0   ;;  %s195_s2 = inlined_call_operand.vmem [shape: bf16[8,128], index: 2, kind: input, shape index: {}]   ;;  %s196_s0 = inlined_call_operand.vmem [shape: f32[8,8], index: 0, kind: input, shape index: {}]   ;;  %s197_s1 = inlined_call_operand.vmem [shape: f32[8,4], index: 1, kind: input, shape index: {}]   ;;  %s198_s3 = inlined_call_operand.vmem [shape: f32[1,32], index: 3, kind: input, shape index: {}]   ;;  %s199_s4 = inlined_call_operand.vmem [shape: f32[8,32], index: 4, kind: output, shape index: {}]  }
   0x1   :  { %124 = vmatprep.subr.bf16.mxu0 %v144_v0  ;;  %v44_v1 = vld [vmem:[%s195_s2] sm:$0xf]  ;;  %126 = vmatprep.mubr.msk.bf16.mxu0 %vm145_vm1, %v144_v0  ;;  %v147_v7 = vmov 2   ;;  %vm45_vm2 = vcmask 64512   ;;  %v148_v8 = vmov 1   ;;  %v149_v9 = vmov 3  }
   0x2   :  { %v42_v2 = vld [vmem:[%s196_s0] sm:$0xff]  ;;  %v51_v4 = vsel %vm49_vm0, %v44_v1, 0  ;;  %139 = vset.pattern.permute.xlu0 %v146_v6  ;;  %141 = vset.pattern.permute.xlu1 %v147_v7  ;;  %vm36_vm3 = vcmask 261120   ;;  %vm38_vm4 = vcmask 523264   ;;  %vm40_vm5 = vcmask 785408   ;;  %s150_s0 = smov 64  }
   0x3   :  { %v18_v3 = vld [vmem:[%s197_s1] sm:$0xff]  ;;  %v43_v5 = vpack.c.bf16 %v42_v2, %v42_v2  ;;  %125 = vmatpush3.bf16.msra.mxu0 %v51_v4  ;;  %s151_s1 = smov 96   ;;  %s152_s2 = smov 32  }
   0x4   :  { %21 = vperm.xlu0 %139, %v18_v3   ;;  %29 = vperm.xlu1 %141, %v18_v3   ;;  %v121_v22 = vld [vmem:[%s198_s3] ss:$0 sm:$0xff] }
   0x6   :  { %127 = vmatmul.mubr.msk.bf16.vlgmr.msra.gmra.mxu0 %vm45_vm2, %v43_v5 }
   0x8   :  { %140 = vset.pattern.permute.xlu0 %v148_v8  ;;  %142 = vset.pattern.permute.xlu1 %v149_v9 }
   0x9   :  { %25 = vperm.xlu0 %140, %v18_v3   ;;  %33 = vperm.xlu1 %142, %v18_v3  }
   0xd   :  { %143 = vset.pattern.permute.xlu0 %v149_v9 }
  0x7f   :  { %v22_v10 = vpop.permute.xlu0 %21  ;;  %v30_v11 = vpop.permute.xlu1 %29 }
  0x84   :  { %v26_v12 = vpop.permute.xlu0 %25  ;;  %v34_v14 = vpop.permute.xlu1 %33 }
  0x85   :  { %v37_v13 = vsel %vm36_vm3, %v22_v10, %v26_v12 }
  0x86   :  { %v39_v15 = vsel %vm38_vm4, %v37_v13, %v30_v11 }
  0x87   :  { %v41_v16 = vsel %vm40_vm5, %v39_v15, %v34_v14 }
  0xc6   :  { %v87_v17 = vpop.f32.mrf.mxu0 }
  0xc7   :  { %v93_v18 = vmul.f32 %v87_v17, %v41_v16 }
  0xc8   :  { %v128_v19 = vpop.f32.mrf.mxu0 }
  0xc9   :  { %107 = vrot.lane.b32.xlu0 %v93_v18, %s150_s0  ;;  %103 = vrot.lane.b32.xlu1 %v93_v18, %s151_s1  ;;  %v101_v23 = vadd.f32 %v121_v22, %v93_v18 }
  0xca   :  { %v90_v20 = vpop.f32.mrf.mxu0 }
  0xcc   :  { %v129_v21 = vpop.f32.mrf.mxu0 }
  0xcd   :  { %111 = vrot.lane.b32.xlu1 %v93_v18, %s152_s2 }
 0x13b   :  { %v104_v24 = vpop.permute.xlu1 %103  ;;  %v108_v26 = vpop.permute.xlu0 %107 }
 0x13c   :  { %v106_v25 = vadd.f32 %v104_v24, %v101_v23 }
 0x13e   :  { %v110_v27 = vadd.f32 %v108_v26, %v106_v25 }
 0x13f   :  { %v112_v28 = vpop.permute.xlu1 %111 }
 0x140   :  { %v114_v29 = vadd.f32 %v112_v28, %v110_v27 }
 0x142   :  { %115 = vst.msk [vmem:[%s199_s4] sm:$0xff] %vm36_vm3, %v114_v29 }

// kernel: edgesegnn_forward.10
= control target key start
LH: loop header
LB: loop body
LE: loop exit
PB: predicated region body
PF: predicated region fallthrough
CT: control target
= control target key end

     0   :  { %vm67_vm0 = vcmask 261120   ;;  %v983_v0 = vmov 0.0   ;;  %vm984_vm1 = vmmov 0   ;;  %v985_v4 = vmov 1   ;;  %s1267_s8 = inlined_call_operand.vmem [shape: bf16[32,128], index: 8, kind: input, shape index: {}]   ;;  %s1268_s9 = inlined_call_operand.vmem [shape: bf16[32,128], index: 9, kind: input, shape index: {}]   ;;  %s1269_s2 = inlined_call_operand.vmem [shape: f32[16,32], index: 2, kind: input, shape index: {}]   ;;  %s1270_s3 = inlined_call_operand.vmem [shape: f32[16,32], index: 3, kind: input, shape index: {}]   ;;  %s1271_s10 = inlined_call_operand.vmem [shape: bf16[32,128], index: 10, kind: input, shape index: {}]   ;;  %s1272_s1 = inlined_call_operand.vmem [shape: f32[16,21], index: 1, kind: input, shape index: {}]   ;;  %s1273_s4 = inlined_call_operand.vmem [shape: f32[16,32], index: 4, kind: input, shape index: {}]   ;;  %s1274_s7 = inlined_call_operand.vmem [shape: f32[1,128], index: 7, kind: input, shape index: {}]   ;;  %s1275_s12 = inlined_call_operand.vmem [shape: bf16[32,128], index: 12, kind: input, shape index: {}]   ;;  %s1276_s11 = inlined_call_operand.vmem [shape: f32[1,32], index: 11, kind: input, shape index: {}]   ;;  %s1277_s13 = inlined_call_operand.vmem [shape: f32[1,32], index: 13, kind: input, shape index: {}]   ;;  %s1278_s0 = inlined_call_operand.vmem [shape: s32[1,16], index: 0, kind: input, shape index: {}]   ;;  %s1279_s14 = inlined_call_operand.vmem [shape: bf16[32,128], index: 14, kind: input, shape index: {}]   ;;  %s1280_s15 = inlined_call_operand.vmem [shape: bf16[32,128], index: 15, kind: input, shape index: {}]   ;;  %s1281_s5 = inlined_call_operand.vmem [shape: f32[8,32], index: 5, kind: input, shape index: {}]   ;;  %s1282_s6 = inlined_call_operand.vmem [shape: f32[8,4], index: 6, kind: input, shape index: {}]   ;;  %s1283_s17 = inlined_call_operand.vmem [shape: bf16[32,128], index: 17, kind: input, shape index: {}]   ;;  %s1284_s16 = inlined_call_operand.vmem [shape: f32[1,32], index: 16, kind: input, shape index: {}]   ;;  %s1285_s18 = inlined_call_operand.vmem [shape: f32[1,32], index: 18, kind: input, shape index: {}]   ;;  %s1286_s19 = inlined_call_operand.vmem [shape: f32[8,32], index: 19, kind: output, shape index: {}]  }
   0x1   :  { %1291 = sst [smem:[#allocation3_spill]] %s1267_s8  ;;  %866 = vmatprep.subr.bf16.mxu0 %v983_v0  ;;  %874 = vmatprep.subr.bf16.mxu1 %v983_v0  ;;  %68 = vst.msk [vmem:[#allocation2] sm:$0xff] %vm67_vm0, %v983_v0  ;;  %v986_v9 = vmov 0   ;;  %v953_v13 = vld [vmem:[%s1271_s10 + $0x8] sm:$0xff]   ;;  %v69_v14 = vld [vmem:[%s1272_s1] sm:$0xff]  ;;  %v987_v20 = vmov 2  }
   0x2   :  { %1292 = sst [smem:[#allocation4_spill]] %s1268_s9  ;;  %870 = vmatprep.mubr.msk.bf16.mxu0 %vm984_vm1, %v983_v0  ;;  %878 = vmatprep.mubr.msk.bf16.mxu1 %vm984_vm1, %v983_v0  ;;  %v954_v15 = vld [vmem:[%s1271_s10] sm:$0xff]   ;;  %v119_v17 = vld [vmem:[%s1273_s4 + $0x8] sm:$0xff]  ;;  %v988_v21 = vmov 3   ;;  %v989_v22 = vmov 4   ;;  %vm108_vm2 = vcmask 523264  }
   0x3   :  { %1293 = sst [smem:[#allocation5_spill]] %s1269_s2  ;;  %939 = vset.pattern.permute.xlu1 %v985_v4  ;;  %938 = vset.pattern.permute.xlu0 %v986_v9  ;;  %v118_v16 = vld [vmem:[%s1273_s4] sm:$0xff]  ;;  %v70_v18 = vld [vmem:[%s1272_s1 + $0x8] sm:$0xff]  ;;  %vm111_vm3 = vcmask 785408   ;;  %s991_s10 = smov 64   ;;  %vm501_vm5 = vcmask 130048  }
   0x4   :  { %1294 = sst [smem:[#allocation6_spill]] %s1270_s3  ;;  %73 = vperm.xlu1 %939, %v69_v14   ;;  %122 = vperm.xlu0 %938, %v69_v14   ;;  %v263_v19 = vpack.c.bf16 %v119_v17, %v118_v16  ;;  %v810_v27 = vld [vmem:[%s1274_s7] ss:$0 sm:$0xff]  ;;  %s990_s7 = smov 96   ;;  %v955_v62 = vld [vmem:[%s1275_s12 + $0x8] sm:$0xff]  }
   0x5   :  { %s1295_s20 = sld [smem:[#allocation3_spill]]  ;;  %v956_v63 = vld [vmem:[%s1275_s12] sm:$0xff]  }
   0x6   :  { %s1296_s22 = sld [smem:[#allocation4_spill]] }
   0x7   :  { %s1297_s27 = sld [smem:[#allocation5_spill]] }
   0x8   :  { %78 = vperm.xlu1 %939, %v70_v18   ;;  %126 = vperm.xlu0 %938, %v70_v18  }
   0xb   :  { %v949_v1 = vld [vmem:[%s1295_s20 + $0x8] sm:$0xff]   ;;  %v951_v3 = vld [vmem:[%s1295_s20] sm:$0xff]   ;;  %s1298_s20 = sld [smem:[#allocation6_spill]] }
   0xc   :  { %v950_v2 = vld [vmem:[%s1296_s22 + $0x8] sm:$0xff]   ;;  %867 = vmatpush3.bf16.msra.mxu0 %v949_v1  ;;  %v952_v5 = vld [vmem:[%s1296_s22] sm:$0xff]   ;;  %941 = vset.pattern.permute.xlu1 %v987_v20 }
   0xd   :  { %875 = vmatpush3.bf16.msra.mxu1 %v950_v2  ;;  %868 = vmatprep.subr.bf16.mxu0 %v983_v0  ;;  %v114_v6 = vld [vmem:[%s1297_s27] sm:$0xff]  ;;  %v115_v7 = vld [vmem:[%s1297_s27 + $0x8] sm:$0xff] }
   0xe   :  { %876 = vmatprep.subr.bf16.mxu1 %v983_v0  ;;  %v137_v10 = vpack.c.bf16 %v115_v7, %v114_v6  ;;  %86 = vperm.xlu1 %941, %v70_v18   ;;  %v820_v1 = vld [vmem:[%s1276_s11] ss:$0 sm:$0xff] }
   0xf   :  { %940 = vset.pattern.permute.xlu0 %v987_v20 }
  0x10   :  { %869 = vmatpush3.bf16.msra.mxu0 %v951_v3  ;;  %82 = vperm.xlu0 %940, %v69_v14  }
  0x11   :  { %v116_v8 = vld [vmem:[%s1298_s20] sm:$0xff]  ;;  %v117_v11 = vld [vmem:[%s1298_s20 + $0x8] sm:$0xff]  ;;  %877 = vmatpush3.bf16.msra.mxu1 %v952_v5  ;;  %882 = vmatprep.subr.bf16.mxu0 %v983_v0  ;;  %s992_s20 = smov 32  }
  0x12   :  { %v200_v12 = vpack.c.bf16 %v117_v11, %v116_v8  ;;  %890 = vmatprep.subr.bf16.mxu1 %v983_v0  ;;  %942 = vset.pattern.permute.xlu1 %v988_v21 }
  0x13   :  { %871 = vmatmul.mubr.msk.bf16.vlgmr.msra.gmra.mxu0 %vm67_vm0, %v137_v10  ;;  %90 = vperm.xlu1 %942, %v69_v14  }
  0x14   :  { %879 = vmatmul.mubr.msk.bf16.vlgmr.msra.gmra.mxu1 %vm67_vm0, %v200_v12  ;;  %883 = vmatpush3.bf16.msra.mxu0 %v953_v13 }
  0x15   :  { %884 = vmatprep.subr.bf16.mxu0 %v983_v0  ;;  %886 = vmatprep.mubr.msk.bf16.mxu0 %vm984_vm1, %v983_v0 }
  0x16   :  { %894 = vmatprep.mubr.msk.bf16.mxu1 %vm984_vm1, %v983_v0  ;;  %943 = vset.pattern.permute.xlu0 %v988_v21 }
  0x17   :  { %94 = vperm.xlu0 %943, %v70_v18   ;;  %944 = vset.pattern.permute.xlu1 %v989_v22 }
  0x18   :  { %885 = vmatpush3.bf16.msra.mxu0 %v954_v15  ;;  %98 = vperm.xlu1 %944, %v69_v14  }
  0x19   :  { %898 = vmatprep.subr.bf16.mxu0 %v983_v0  ;;  %891 = vmatpush3.bf16.msra.mxu1 %v955_v62 }
  0x1a   :  { %892 = vmatprep.subr.bf16.mxu1 %v983_v0 }
  0x1b   :  { %887 = vmatmul.mubr.msk.bf16.vlgmr.msra.gmra.mxu0 %vm67_vm0, %v263_v19  ;;  %945 = vset.pattern.permute.xlu0 %v986_v9 }
  0x1c   :  { %900 = vmatprep.mubr.msk.bf16.mxu0 %vm984_vm1, %v983_v0  ;;  %102 = vperm.xlu1 %944, %v70_v18  }
  0x1d   :  { %893 = vmatpush3.bf16.msra.mxu1 %v956_v63 }
  0x1e   :  { %904 = vmatprep.subr.bf16.mxu1 %v983_v0 }
  0x20   :  { %946 = vset.pattern.permute.xlu1 %v985_v4 }
  0x7f   :  { %v74_v23 = vpop.permute.xlu1 %73  ;;  %v123_v25 = vpop.permute.xlu0 %122 }
  0x80   :  { %v135_v29 = vmul.f32 %v810_v27, %v123_v25 }
  0x83   :  { %v79_v24 = vpop.permute.xlu1 %78  ;;  %v127_v28 = vpop.permute.xlu0 %126 }
  0x84   :  { %v136_v39 = vmul.f32 %v810_v27, %v127_v28 }
  0x89   :  { %v87_v26 = vpop.permute.xlu1 %86 }
  0x8a   :  { %v107_v47 = vsel %vm67_vm0, %v79_v24, %v87_v26 }
  0x8b   :  { %v83_v33 = vpop.permute.xlu0 %82 }
  0x8c   :  { %v106_v37 = vsel %vm67_vm0, %v74_v23, %v83_v33 }
  0x8e   :  { %v91_v30 = vpop.permute.xlu1 %90 }
  0x8f   :  { %v109_v43 = vsel %vm108_vm2, %v106_v37, %v91_v30 }
  0x92   :  { %v95_v48 = vpop.permute.xlu0 %94 }
  0x93   :  { %v99_v40 = vpop.permute.xlu1 %98  ;;  %v110_v53 = vsel %vm108_vm2, %v107_v47, %v95_v48 }
  0x94   :  { %v112_v51 = vsel %vm111_vm3, %v109_v43, %v99_v40 }
  0x97   :  { %v103_v54 = vpop.permute.xlu1 %102 }
  0x98   :  { %v113_v59 = vsel %vm111_vm3, %v110_v53, %v103_v54 }
  0xd3   :  { %v191_v31 = vpop.f32.mrf.mxu0 }
  0xd4   :  { %v254_v32 = vpop.f32.mrf.mxu1  ;;  %v198_v35 = vadd.f32 %v191_v31, %v135_v29 }
  0xd5   :  { %v872_v34 = vpop.f32.mrf.mxu0 }
  0xd6   :  { %v880_v36 = vpop.f32.mrf.mxu1  ;;  %v261_v44 = vadd.f32 %v254_v32, %v198_v35  ;;  %v826_v35 = vld [vmem:[%s1277_s13] ss:$0 sm:$0xff] }
  0xd7   :  { %v194_v38 = vpop.f32.mrf.mxu0 }
  0xd8   :  { %v257_v41 = vpop.f32.mrf.mxu1  ;;  %v199_v45 = vadd.f32 %v194_v38, %v136_v39 }
  0xd9   :  { %v873_v42 = vpop.f32.mrf.mxu0 }
  0xda   :  { %v881_v46 = vpop.f32.mrf.mxu1  ;;  %v262_v55 = vadd.f32 %v257_v41, %v199_v45 }
  0xdb   :  { %v317_v49 = vpop.f32.mrf.mxu0 }
  0xdc   :  { %v324_v50 = vadd.f32 %v317_v49, %v261_v44 }
  0xdd   :  { %v888_v52 = vpop.f32.mrf.mxu0 }
  0xde   :  { %v326_v56 = vmul.f32 %v324_v50, %v112_v51 }
  0xdf   :  { %v320_v57 = vpop.f32.mrf.mxu0 }
  0xe0   :  { %v325_v58 = vadd.f32 %v320_v57, %v262_v55  ;;  %339 = vrot.lane.b32.xlu0 %v326_v56, %s990_s7  ;;  %v335_v3 = vadd.f32 %v820_v1, %v326_v56 }
  0xe1   :  { %v889_v60 = vpop.f32.mrf.mxu0 }
  0xe2   :  { %v327_v61 = vmul.f32 %v325_v58, %v113_v59  ;;  %v829_v58 = vld [vmem:[%s1278_s0] ss:$0 sm:$0xff] }
  0xe4   :  { %347 = vrot.lane.b32.xlu0 %v326_v56, %s991_s10  ;;  %341 = vrot.lane.b32.xlu1 %v327_v61, %s990_s7  ;;  %v336_v7 = vadd.f32 %v820_v1, %v327_v61 }
  0xe8   :  { %355 = vrot.lane.b32.xlu0 %v326_v56, %s992_s20  ;;  %349 = vrot.lane.b32.xlu1 %v327_v61, %s991_s10  ;;  %v490_v56 = vlaneseq }
  0xea   :  { %v491_v57 = vshrl.u32 %v490_v56, 7 }
  0xec   :  { %357 = vrot.lane.b32.xlu1 %v327_v61, %s992_s20  ;;  %vm496_vm4 = vcmp.eq.s32.totalorder %v491_v57, %v829_v58 }
  0xed   :  { %v497_v63 = vsel %vm496_vm4, 1.0, %v983_v0 }
 0x152   :  { %v340_v2 = vpop.permute.xlu0 %339 }
 0x153   :  { %v345_v6 = vadd.f32 %v340_v2, %v335_v3  ;;  %v498_v2 = vpack.c.bf16 %v497_v63, %v497_v63  ;;  %v957_v3 = vld [vmem:[%s1279_s14 + $0x8] sm:$0xff]  }
 0x156   :  { %v342_v4 = vpop.permute.xlu1 %341  ;;  %v348_v5 = vpop.permute.xlu0 %347 }
 0x157   :  { %v353_v8 = vadd.f32 %v348_v5, %v345_v6  ;;  %v346_v11 = vadd.f32 %v342_v4, %v336_v7  ;;  %v959_v4 = vld [vmem:[%s1279_s14] sm:$0xff]   ;;  %v958_v5 = vld [vmem:[%s1280_s15 + $0x8] sm:$0xff]  }
 0x158   :  { %v960_v6 = vld [vmem:[%s1280_s15] sm:$0xff]  }
 0x159   :  { %v1223_v7 = vld [vmem:[%s1281_s5] sm:$0xff] }
 0x15a   :  { %v350_v9 = vpop.permute.xlu1 %349  ;;  %v356_v10 = vpop.permute.xlu0 %355 }
 0x15b   :  { %v361_v12 = vadd.f32 %v356_v10, %v353_v8  ;;  %v354_v13 = vadd.f32 %v350_v9, %v346_v11  ;;  %v573_v8 = vpack.c.bf16 %v1223_v7, %v1223_v7  ;;  %v551_v9 = vld [vmem:[%s1282_s6] sm:$0xff] }
 0x15c   :  { %v499_v10 = vld [vmem:[#allocation2] sm:$0xff] }
 0x15d   :  { %v821_v14 = vmul.f32 -1.442695, %v361_v12 }
 0x15e   :  { %v358_v15 = vpop.permute.xlu1 %357 }
 0x15f   :  { %963 = vpow2.f32 %v821_v14  ;;  %v362_v16 = vadd.f32 %v358_v15, %v354_v13 }
 0x161   :  { %v822_v17 = vmul.f32 -1.442695, %v362_v16 }
 0x163   :  { %965 = vpow2.f32 %v822_v17 }
 0x16c   :  { %v964_v18 = vpop.eup %963 }
 0x16d   :  { %v369_v19 = vadd.f32 1.0, %v964_v18 }
 0x16f   :  { %967 = vrcp.f32 %v369_v19 }
 0x170   :  { %v966_v22 = vpop.eup %965 }
 0x171   :  { %v370_v23 = vadd.f32 1.0, %v966_v22 }
 0x173   :  { %969 = vrcp.f32 %v370_v23 }
 0x17c   :  { %v968_v24 = vpop.eup %967 }
 0x17d   :  { %v375_v26 = vmul.f32 %v968_v24, %v361_v12 }
 0x180   :  { %v970_v25 = vpop.eup %969 }
 0x181   :  { %v376_v27 = vmul.f32 %v970_v25, %v362_v16 }
 0x183   :  { %v377_v28 = vpack.c.bf16 %v376_v27, %v375_v26 }
 0x185   :  { %895 = vmatmul.mubr.msk.bf16.vlgmr.msra.gmra.mxu1 %vm67_vm0, %v377_v28 }
 0x186   :  { %908 = vmatprep.mubr.msk.bf16.mxu1 %vm984_vm1, %v983_v0  ;;  %905 = vmatpush3.bf16.msra.mxu1 %v958_v5 }
 0x187   :  { %906 = vmatprep.subr.bf16.mxu1 %v983_v0 }
 0x18a   :  { %907 = vmatpush3.bf16.msra.mxu1 %v960_v6 }
 0x18b   :  { %920 = vmatprep.subr.bf16.mxu1 %v983_v0 }
 0x245   :  { %v431_v29 = vpop.f32.mrf.mxu1 }
 0x246   :  { %v438_v30 = vmul.f32 %v431_v29, %v112_v51 }
 0x247   :  { %v896_v31 = vpop.f32.mrf.mxu1 }
 0x248   :  { %451 = vrot.lane.b32.xlu0 %v438_v30, %s990_s7  ;;  %v447_v37 = vadd.f32 %v826_v35, %v438_v30 }
 0x249   :  { %v434_v32 = vpop.f32.mrf.mxu1 }
 0x24a   :  { %v439_v33 = vmul.f32 %v434_v32, %v113_v59 }
 0x24b   :  { %v897_v34 = vpop.f32.mrf.mxu1 }
 0x24c   :  { %459 = vrot.lane.b32.xlu0 %v438_v30, %s991_s10  ;;  %453 = vrot.lane.b32.xlu1 %v439_v33, %s990_s7  ;;  %v448_v42 = vadd.f32 %v826_v35, %v439_v33  ;;  %v961_v35 = vld [vmem:[%s1283_s17 + $0x8] sm:$0xff]  }
 0x250   :  { %467 = vrot.lane.b32.xlu0 %v438_v30, %s992_s20  ;;  %461 = vrot.lane.b32.xlu1 %v439_v33, %s991_s10 }
 0x254   :  { %469 = vrot.lane.b32.xlu1 %v439_v33, %s992_s20  ;;  %555 = vperm.xlu0 %945, %v551_v9  }
 0x258   :  { %559 = vperm.xlu1 %946, %v551_v9   ;;  %948 = vset.pattern.permute.xlu0 %v988_v21 }
 0x259   :  { %567 = vperm.xlu0 %948, %v551_v9  }
 0x25c   :  { %947 = vset.pattern.permute.xlu1 %v987_v20 }
 0x25d   :  { %563 = vperm.xlu1 %947, %v551_v9  }
 0x2ba   :  { %v452_v36 = vpop.permute.xlu0 %451 }
 0x2bb   :  { %v457_v40 = vadd.f32 %v452_v36, %v447_v37  ;;  %v962_v36 = vld [vmem:[%s1283_s17] sm:$0xff]  }
 0x2bc   :  { %v837_v37 = vld [vmem:[%s1284_s16] ss:$0 sm:$0xff] }
 0x2be   :  { %v460_v38 = vpop.permute.xlu0 %459  ;;  %v454_v39 = vpop.permute.xlu1 %453 }
 0x2bf   :  { %v465_v41 = vadd.f32 %v460_v38, %v457_v40  ;;  %v458_v45 = vadd.f32 %v454_v39, %v448_v42 }
 0x2c2   :  { %v468_v43 = vpop.permute.xlu0 %467  ;;  %v462_v44 = vpop.permute.xlu1 %461 }
 0x2c3   :  { %v473_v46 = vadd.f32 %v468_v43, %v465_v41  ;;  %v466_v48 = vadd.f32 %v462_v44, %v458_v45 }
 0x2c5   :  { %v827_v47 = vmul.f32 -1.442695, %v473_v46 }
 0x2c6   :  { %v470_v49 = vpop.permute.xlu1 %469 }
 0x2c7   :  { %971 = vpow2.f32 %v827_v47  ;;  %v474_v50 = vadd.f32 %v470_v49, %v466_v48 }
 0x2c9   :  { %v828_v51 = vmul.f32 -1.442695, %v474_v50 }
 0x2cb   :  { %973 = vpow2.f32 %v828_v51 }
 0x2cf   :  { %v556_v23 = vpop.permute.xlu0 %555 }
 0x2d3   :  { %v560_v22 = vpop.permute.xlu1 %559 }
 0x2d4   :  { %v972_v52 = vpop.eup %971  ;;  %v570_v24 = vsel %vm67_vm0, %v556_v23, %v560_v22  ;;  %v568_v27 = vpop.permute.xlu0 %567 }
 0x2d5   :  { %v481_v53 = vadd.f32 1.0, %v972_v52 }
 0x2d7   :  { %975 = vrcp.f32 %v481_v53 }
 0x2d8   :  { %v974_v54 = vpop.eup %973  ;;  %v564_v25 = vpop.permute.xlu1 %563 }
 0x2d9   :  { %v482_v55 = vadd.f32 1.0, %v974_v54  ;;  %v571_v26 = vsel %vm108_vm2, %v570_v24, %v564_v25 }
 0x2da   :  { %v572_v30 = vsel %vm111_vm3, %v571_v26, %v568_v27 }
 0x2db   :  { %977 = vrcp.f32 %v482_v55  ;;  %v842_v55 = vld [vmem:[%s1285_s18] ss:$0 sm:$0xff] }
 0x2e4   :  { %v976_v59 = vpop.eup %975 }
 0x2e5   :  { %v487_v61 = vmul.f32 %v976_v59, %v473_v46 }
 0x2e8   :  { %v978_v60 = vpop.eup %977 }
 0x2e9   :  { %v488_v62 = vmul.f32 %v978_v60, %v474_v50 }
 0x2eb   :  { %v500_v1 = vpack.c.bf16 %v488_v62, %v487_v61 }
 0x2ed   :  { %899 = vmatpush3.bf16.msra.mxu0 %v500_v1 }
 0x2ee   :  { %912 = vmatprep.subr.bf16.mxu0 %v983_v0 }
 0x2f0   :  { %901 = vmatmul.mubr.msk.bf16.vlgmr.msra.gmra.mxu0 %vm501_vm5, %v498_v2 }
 0x2f1   :  { %916 = vmatprep.mubr.msk.bf16.mxu0 %vm984_vm1, %v983_v0  ;;  %913 = vmatpush3.bf16.msra.mxu0 %v957_v3 }
 0x2f2   :  { %914 = vmatprep.subr.bf16.mxu0 %v983_v0 }
 0x2f5   :  { %915 = vmatpush3.bf16.msra.mxu0 %v959_v4 }
 0x2f8   :  { %917 = vmatmul.mubr.msk.bf16.vlgmr.msra.gmra.mxu0 %vm67_vm0, %v573_v8 }
 0x3b0   :  { %v539_v11 = vpop.f32.mrf.mxu0 }
 0x3b1   :  { %v545_v12 = vadd.f32 %v539_v11, %v499_v10 }
 0x3b2   :  { %v902_v13 = vpop.f32.mrf.mxu0 }
 0x3b3   :  { %546 = vst.msk [vmem:[#allocation2] sm:$0xff] %vm67_vm0, %v545_v12 }
 0x3b4   :  { %v542_v14 = vpop.f32.mrf.mxu0 }
 0x3b6   :  { %v903_v15 = vpop.f32.mrf.mxu0 }
 0x3b8   :  { %v687_v20 = vpop.f32.mrf.mxu0 }
 0x3ba   :  { %v552_v16 = vld [vmem:[#allocation2] sm:$0xff]  ;;  %v918_v18 = vpop.f32.mrf.mxu0 }
 0x3bb   :  { %v578_v17 = vpack.c.bf16 %v552_v16, %v552_v16 }
 0x3bc   :  { %v690_v21 = vpop.f32.mrf.mxu0 }
 0x3bd   :  { %909 = vmatmul.mubr.msk.bf16.vlgmr.msra.gmra.mxu1 %vm67_vm0, %v578_v17 }
 0x3be   :  { %924 = vmatprep.mubr.msk.bf16.mxu1 %vm984_vm1, %v983_v0  ;;  %v919_v19 = vpop.f32.mrf.mxu0  ;;  %921 = vmatpush3.bf16.msra.mxu1 %v961_v35 }
 0x3bf   :  { %922 = vmatprep.subr.bf16.mxu1 %v983_v0 }
 0x3c2   :  { %923 = vmatpush3.bf16.msra.mxu1 %v962_v36 }
 0x47d   :  { %v632_v28 = vpop.f32.mrf.mxu1 }
 0x47e   :  { %v688_v29 = vadd.f32 %v687_v20, %v632_v28 }
 0x47f   :  { %v910_v31 = vpop.f32.mrf.mxu1 }
 0x480   :  { %v693_v32 = vmul.f32 %v688_v29, %v572_v30 }
 0x481   :  { %v635_v33 = vpop.f32.mrf.mxu1 }
 0x482   :  { %703 = vrot.lane.b32.xlu1 %v693_v32, %s990_s7  ;;  %711 = vrot.lane.b32.xlu0 %v693_v32, %s992_s20  ;;  %v701_v39 = vadd.f32 %v837_v37, %v693_v32 }
 0x483   :  { %v911_v34 = vpop.f32.mrf.mxu1 }
 0x486   :  { %707 = vrot.lane.b32.xlu1 %v693_v32, %s991_s10 }
 0x4f4   :  { %v704_v38 = vpop.permute.xlu1 %703  ;;  %v712_v43 = vpop.permute.xlu0 %711 }
 0x4f5   :  { %v706_v40 = vadd.f32 %v704_v38, %v701_v39 }
 0x4f8   :  { %v708_v41 = vpop.permute.xlu1 %707 }
 0x4f9   :  { %v710_v42 = vadd.f32 %v708_v41, %v706_v40 }
 0x4fb   :  { %v714_v44 = vadd.f32 %v712_v43, %v710_v42 }
 0x4fd   :  { %v838_v45 = vmul.f32 -1.442695, %v714_v44 }
 0x4ff   :  { %979 = vpow2.f32 %v838_v45 }
 0x50c   :  { %v980_v46 = vpop.eup %979 }
 0x50d   :  { %v718_v0 = vadd.f32 1.0, %v980_v46 }
 0x50f   :  { %981 = vrcp.f32 %v718_v0 }
 0x51c   :  { %v982_v47 = vpop.eup %981 }
 0x51d   :  { %v721_v48 = vmul.f32 %v982_v47, %v714_v44 }
 0x51f   :  { %v722_v49 = vpack.c.bf16 %v721_v48, %v721_v48 }
 0x521   :  { %925 = vmatmul.mubr.msk.bf16.vlgmr.msra.gmra.mxu1 %vm67_vm0, %v722_v49 }
 0x5e1   :  { %v776_v50 = vpop.f32.mrf.mxu1 }
 0x5e2   :  { %v782_v51 = vmul.f32 %v776_v50, %v572_v30 }
 0x5e3   :  { %v926_v52 = vpop.f32.mrf.mxu1 }
 0x5e4   :  { %796 = vrot.lane.b32.xlu0 %v782_v51, %s991_s10  ;;  %792 = vrot.lane.b32.xlu1 %v782_v51, %s990_s7  ;;  %v790_v56 = vadd.f32 %v842_v55, %v782_v51 }
 0x5e5   :  { %v779_v53 = vpop.f32.mrf.mxu1 }
 0x5e7   :  { %v927_v54 = vpop.f32.mrf.mxu1 }
 0x5e8   :  { %800 = vrot.lane.b32.xlu1 %v782_v51, %s992_s20 }
 0x656   :  { %v793_v57 = vpop.permute.xlu1 %792  ;;  %v797_v59 = vpop.permute.xlu0 %796 }
 0x657   :  { %v795_v58 = vadd.f32 %v793_v57, %v790_v56 }
 0x659   :  { %v799_v60 = vadd.f32 %v797_v59, %v795_v58 }
 0x65a   :  { %v801_v61 = vpop.permute.xlu1 %800 }
 0x65b   :  { %v803_v62 = vadd.f32 %v801_v61, %v799_v60 }
 0x65d   :  { %v804_v63 = vadd.f32 %v803_v62, %v1223_v7 }
 0x65f   :  { %805 = vst.msk [vmem:[%s1286_s19] sm:$0xff] %vm67_vm0, %v804_v63 }

// kernel: edgesegnn_forward.11
= control target key start
LH: loop header
LB: loop body
LE: loop exit
PB: predicated region body
PF: predicated region fallthrough
CT: control target
= control target key end

     0   :  { %v758_v2 = vmov 0.0   ;;  %vm759_vm0 = vmmov 0   ;;  %vm115_vm1 = vcmask 130048   ;;  %v761_v27 = vmov 1   ;;  %s1001_s0 = inlined_call_operand.vmem [shape: f32[16,21], index: 0, kind: input, shape index: {}]   ;;  %s1002_s7 = inlined_call_operand.vmem [shape: bf16[16,64], index: 7, kind: input, shape index: {}]   ;;  %s1003_s9 = inlined_call_operand.vmem [shape: bf16[32,32], index: 9, kind: input, shape index: {}]   ;;  %s1004_s11 = inlined_call_operand.vmem [shape: bf16[32,32], index: 11, kind: input, shape index: {}]   ;;  %s1005_s5 = inlined_call_operand.vmem [shape: bf16[32,128], index: 5, kind: input, shape index: {}]   ;;  %s1006_s8 = inlined_call_operand.vmem [shape: f32[1,64], index: 8, kind: input, shape index: {}]   ;;  %s1007_s4 = inlined_call_operand.vmem [shape: bf16[32,128], index: 4, kind: input, shape index: {}]   ;;  %s1008_s2 = inlined_call_operand.vmem [shape: f32[16,32], index: 2, kind: input, shape index: {}]   ;;  %s1009_s1 = inlined_call_operand.vmem [shape: f32[16,32], index: 1, kind: input, shape index: {}]   ;;  %s1010_s13 = inlined_call_operand.vmem [shape: bf16[32,128], index: 13, kind: input, shape index: {}]   ;;  %s1011_s6 = inlined_call_operand.vmem [shape: f32[1,32], index: 6, kind: input, shape index: {}]   ;;  %s1012_s10 = inlined_call_operand.vmem [shape: f32[1,32], index: 10, kind: input, shape index: {}]   ;;  %s1013_s14 = inlined_call_operand.vmem [shape: f32[1,32], index: 14, kind: input, shape index: {}]   ;;  %s1014_s12 = inlined_call_operand.vmem [shape: f32[1,32], index: 12, kind: input, shape index: {}]   ;;  %s1015_s3 = inlined_call_operand.vmem [shape: f32[16,32], index: 3, kind: input, shape index: {}]   ;;  %s1016_s15 = inlined_call_operand.vmem [shape: f32[16,32], index: 15, kind: output, shape index: {}]  }
   0x1   :  { %v851_v0 = vld [vmem:[%s1001_s0] sm:$0xff]  ;;  %v856_v1 = vld [vmem:[%s1001_s0 + $0x8] sm:$0xff]  ;;  %660 = vmatprep.subr.bf16.mxu0 %v758_v2  ;;  %662 = vmatprep.mubr.msk.bf16.mxu0 %vm759_vm0, %v758_v2  ;;  %s760_s0 = smov 123   ;;  %v762_v28 = vmov 2   ;;  %vm87_vm2 = vcmask 261120   ;;  %v764_v35 = vmov 3  }
   0x2   :  { %v96_v3 = vpack.c.bf16 %v856_v1, %v851_v0  ;;  %v723_v4 = vld [vmem:[%s1002_s7] sm:$0xff]   ;;  %666 = vmatprep.subr.bf16.mxu1 %v758_v2  ;;  %670 = vmatprep.mubr.msk.bf16.mxu1 %vm759_vm0, %v758_v2  ;;  %v724_v6 = vld [vmem:[%s1003_s9 + $0x8] sm:$0xff]   ;;  %v765_v36 = vmov 4   ;;  %vm90_vm3 = vcmask 523264   ;;  %vm93_vm4 = vcmask 785408  }
   0x3   :  { %661 = vmatpush3.bf16.msra.mxu0 %v723_v4  ;;  %667 = vmatpush3.bf16.msra.mxu1 %v724_v6  ;;  %v725_v7 = vld [vmem:[%s1003_s9] sm:$0xff]   ;;  %v726_v8 = vld [vmem:[%s1004_s11 + $0x8] sm:$0xff]  }
   0x4   :  { %107 = vrot.lane.b32.xlu0 %v96_v3, %s760_s0  ;;  %674 = vmatprep.subr.bf16.mxu0 %v758_v2  ;;  %v728_v9 = vld [vmem:[%s1004_s11] sm:$0xff]   ;;  %v727_v29 = vld [vmem:[%s1005_s5 + $0x8] sm:$0xff]   ;;  %s763_s11 = smov 96  }
   0x5   :  { %668 = vmatprep.subr.bf16.mxu1 %v758_v2  ;;  %v615_v10 = vld [vmem:[%s1006_s8] ss:$0 sm:$0xff]  ;;  %716 = vset.pattern.permute.xlu1 %v761_v27  ;;  %v320_v33 = vld [vmem:[%s1008_s2 + $0x8] sm:$0xff] }
   0x6   :  { %717 = vset.pattern.permute.xlu0 %v762_v28  ;;  %55 = vperm.xlu1 %716, %v851_v0   ;;  %v729_v31 = vld [vmem:[%s1005_s5] sm:$0xff]   ;;  %v730_v37 = vld [vmem:[%s1007_s4 + $0x8] sm:$0xff]  }
   0x7   :  { %669 = vmatpush3.bf16.msra.mxu1 %v725_v7  ;;  %v319_v32 = vld [vmem:[%s1008_s2] sm:$0xff]  ;;  %v313_v41 = vld [vmem:[%s1009_s1 + $0x8] sm:$0xff] }
   0x8   :  { %682 = vmatprep.subr.bf16.mxu1 %v758_v2  ;;  %v321_v34 = vpack.c.bf16 %v320_v33, %v319_v32  ;;  %v731_v39 = vld [vmem:[%s1007_s4] sm:$0xff]   ;;  %s767_s4 = smov 32  }
   0x9   :  { %v312_v40 = vld [vmem:[%s1009_s1] sm:$0xff]  ;;  %s766_s1 = smov 64  }
   0xa   :  { %60 = vperm.xlu1 %716, %v856_v1   ;;  %v314_v42 = vpack.c.bf16 %v313_v41, %v312_v40 }
   0xe   :  { %718 = vset.pattern.permute.xlu1 %v762_v28 }
   0xf   :  { %68 = vperm.xlu1 %718, %v856_v1  }
  0x13   :  { %719 = vset.pattern.permute.xlu1 %v764_v35 }
  0x14   :  { %72 = vperm.xlu1 %719, %v851_v0  }
  0x18   :  { %721 = vset.pattern.permute.xlu1 %v765_v36 }
  0x19   :  { %80 = vperm.xlu1 %721, %v851_v0  }
  0x1d   :  { %84 = vperm.xlu1 %721, %v856_v1  }
  0x76   :  { %v108_v5 = vpop.permute.xlu0 %107 }
  0x77   :  { %663 = vmatmul.mubr.msk.bf16.vlgmr.msra.gmra.mxu0 %vm115_vm1, %v108_v5 }
  0x78   :  { %678 = vmatprep.mubr.msk.bf16.mxu0 %vm759_vm0, %v758_v2  ;;  %675 = vmatpush3.bf16.msra.mxu0 %v726_v8 }
  0x79   :  { %676 = vmatprep.subr.bf16.mxu0 %v758_v2 }
  0x7c   :  { %677 = vmatpush3.bf16.msra.mxu0 %v728_v9 }
  0x7d   :  { %690 = vmatprep.subr.bf16.mxu0 %v758_v2 }
  0x81   :  { %v56_v51 = vpop.permute.xlu1 %55 }
  0x85   :  { %v61_v52 = vpop.permute.xlu1 %60 }
  0x8a   :  { %v69_v53 = vpop.permute.xlu1 %68 }
  0x8b   :  { %v89_v63 = vsel %vm87_vm2, %v61_v52, %v69_v53  ;;  %v640_v52 = vld [vmem:[%s1013_s14] ss:$0 sm:$0xff] }
  0x8f   :  { %v73_v54 = vpop.permute.xlu1 %72 }
  0x94   :  { %v81_v60 = vpop.permute.xlu1 %80 }
  0x98   :  { %v85_v7 = vpop.permute.xlu1 %84 }
 0x137   :  { %v153_v11 = vpop.f32.mrf.mxu0 }
 0x138   :  { %v154_v12 = vadd.f32 %v615_v10, %v153_v11 }
 0x139   :  { %v664_v13 = vpop.f32.mrf.mxu0 }
 0x13a   :  { %v618_v14 = vmul.f32 -1.442695, %v154_v12 }
 0x13b   :  { %v156_v15 = vpop.f32.mrf.mxu0 }
 0x13c   :  { %734 = vpow2.f32 %v618_v14  ;;  %v157_v16 = vadd.f32 %v615_v10, %v156_v15  ;;  %v732_v14 = vld [vmem:[%s1010_s13 + $0x8] sm:$0xff]   ;;  %v733_v15 = vld [vmem:[%s1010_s13] sm:$0xff]  }
 0x13d   :  { %v665_v17 = vpop.f32.mrf.mxu0 }
 0x13e   :  { %v619_v18 = vmul.f32 -1.442695, %v157_v16 }
 0x140   :  { %736 = vpow2.f32 %v619_v18 }
 0x149   :  { %v735_v19 = vpop.eup %734 }
 0x14a   :  { %v166_v20 = vadd.f32 1.0, %v735_v19 }
 0x14c   :  { %738 = vrcp.f32 %v166_v20 }
 0x14d   :  { %v737_v21 = vpop.eup %736 }
 0x14e   :  { %v167_v22 = vadd.f32 1.0, %v737_v21 }
 0x150   :  { %740 = vrcp.f32 %v167_v22  ;;  %v620_v22 = vld [vmem:[%s1012_s10] ss:$0 sm:$0xff] }
 0x159   :  { %v739_v23 = vpop.eup %738 }
 0x15a   :  { %v172_v25 = vmul.f32 %v739_v23, %v154_v12 }
 0x15d   :  { %v741_v24 = vpop.eup %740 }
 0x15e   :  { %v173_v26 = vmul.f32 %v741_v24, %v157_v16  ;;  %v634_v16 = vld [vmem:[%s1011_s6] ss:$0 sm:$0xff] }
 0x160   :  { %v174_v30 = vpack.c.bf16 %v173_v26, %v172_v25 }
 0x162   :  { %254 = vrot.lane.b32.xlu0 %v174_v30, %s763_s11  ;;  %671 = vmatmul.mubr.msk.bf16.vlgmr.msra.gmra.mxu1 %vm87_vm2, %v174_v30 }
 0x163   :  { %683 = vmatpush3.bf16.msra.mxu1 %v727_v29  ;;  %686 = vmatprep.mubr.msk.bf16.mxu1 %vm759_vm0, %v758_v2 }
 0x164   :  { %684 = vmatprep.subr.bf16.mxu1 %v758_v2 }
 0x166   :  { %64 = vperm.xlu0 %717, %v851_v0  }
 0x167   :  { %685 = vmatpush3.bf16.msra.mxu1 %v729_v31 }
 0x168   :  { %698 = vmatprep.subr.bf16.mxu1 %v758_v2 }
 0x16a   :  { %687 = vmatmul.mubr.msk.bf16.vlgmr.msra.gmra.mxu1 %vm87_vm2, %v321_v34  ;;  %720 = vset.pattern.permute.xlu0 %v764_v35 }
 0x16b   :  { %76 = vperm.xlu0 %720, %v856_v1   ;;  %702 = vmatprep.mubr.msk.bf16.mxu1 %vm759_vm0, %v758_v2 }
 0x16c   :  { %699 = vmatpush3.bf16.msra.mxu1 %v732_v14 }
 0x16d   :  { %700 = vmatprep.subr.bf16.mxu1 %v758_v2 }
 0x16f   :  { %722 = vset.pattern.permute.xlu0 %v765_v36 }
 0x170   :  { %701 = vmatpush3.bf16.msra.mxu1 %v733_v15 }
 0x1d4   :  { %v255_v38 = vpop.permute.xlu0 %254 }
 0x1d5   :  { %679 = vmatmul.mubr.msk.bf16.vlgmr.msra.gmra.mxu0 %vm87_vm2, %v255_v38 }
 0x1d6   :  { %691 = vmatpush3.bf16.msra.mxu0 %v730_v37  ;;  %694 = vmatprep.mubr.msk.bf16.mxu0 %vm759_vm0, %v758_v2 }
 0x1d7   :  { %692 = vmatprep.subr.bf16.mxu0 %v758_v2 }
 0x1da   :  { %693 = vmatpush3.bf16.msra.mxu0 %v731_v39 }
 0x1dd   :  { %695 = vmatmul.mubr.msk.bf16.vlgmr.msra.gmra.mxu0 %vm87_vm2, %v314_v42 }
 0x1e1   :  { %v65_v56 = vpop.permute.xlu0 %64 }
 0x1e2   :  { %v88_v58 = vsel %vm87_vm2, %v56_v51, %v65_v56 }
 0x1e3   :  { %v91_v62 = vsel %vm90_vm3, %v88_v58, %v73_v54 }
 0x1e4   :  { %v947_v4 = vsel %vm93_vm4, %v91_v62, %v81_v60  ;;  %v624_v60 = vld [vmem:[%s1014_s12] ss:$0 sm:$0xff] }
 0x1e6   :  { %v77_v0 = vpop.permute.xlu0 %76 }
 0x1e7   :  { %v92_v6 = vsel %vm90_vm3, %v89_v63, %v77_v0 }
 0x1e8   :  { %v95_v11 = vsel %vm93_vm4, %v92_v6, %v85_v7 }
 0x222   :  { %v937_v43 = vpop.f32.mrf.mxu1 }
 0x223   :  { %v236_v26 = vadd.f32 %v620_v22, %v937_v43 }
 0x224   :  { %v672_v44 = vpop.f32.mrf.mxu1 }
 0x226   :  { %v939_v45 = vpop.f32.mrf.mxu1 }
 0x227   :  { %v239_v32 = vadd.f32 %v620_v22, %v939_v45 }
 0x228   :  { %v673_v46 = vpop.f32.mrf.mxu1 }
 0x22a   :  { %v375_v47 = vpop.f32.mrf.mxu1 }
 0x22c   :  { %v688_v48 = vpop.f32.mrf.mxu1 }
 0x22e   :  { %v378_v49 = vpop.f32.mrf.mxu1 }
 0x230   :  { %v689_v50 = vpop.f32.mrf.mxu1 }
 0x295   :  { %v941_v55 = vpop.f32.mrf.mxu0 }
 0x297   :  { %v680_v57 = vpop.f32.mrf.mxu0 }
 0x299   :  { %v944_v59 = vpop.f32.mrf.mxu0 }
 0x29b   :  { %v681_v61 = vpop.f32.mrf.mxu0 }
 0x29d   :  { %v431_v1 = vpop.f32.mrf.mxu0 }
 0x29e   :  { %v432_v3 = vadd.f32 %v431_v1, %v375_v47  ;;  %v306_v1 = vadd.f32 %v624_v60, %v941_v55 }
 0x29f   :  { %v696_v5 = vpop.f32.mrf.mxu0 }
 0x2a0   :  { %v438_v8 = vmul.f32 %v432_v3, %v947_v4 }
 0x2a1   :  { %v434_v9 = vpop.f32.mrf.mxu0 }
 0x2a2   :  { %v435_v10 = vadd.f32 %v434_v9, %v378_v49  ;;  %451 = vrot.lane.b32.xlu0 %v438_v8, %s763_s11  ;;  %v447_v18 = vadd.f32 %v634_v16, %v438_v8 }
 0x2a3   :  { %v697_v12 = vpop.f32.mrf.mxu0 }
 0x2a4   :  { %v439_v13 = vmul.f32 %v435_v10, %v95_v11 }
 0x2a6   :  { %459 = vrot.lane.b32.xlu0 %v438_v8, %s766_s1  ;;  %453 = vrot.lane.b32.xlu1 %v439_v13, %s763_s11  ;;  %v448_v2 = vadd.f32 %v634_v16, %v439_v13 }
 0x2aa   :  { %467 = vrot.lane.b32.xlu0 %v438_v8, %s767_s4  ;;  %461 = vrot.lane.b32.xlu1 %v439_v13, %s766_s1  ;;  %v309_v8 = vadd.f32 %v624_v60, %v944_v59 }
 0x2ae   :  { %469 = vrot.lane.b32.xlu1 %v439_v13, %s767_s4 }
 0x314   :  { %v452_v17 = vpop.permute.xlu0 %451 }
 0x315   :  { %v457_v21 = vadd.f32 %v452_v17, %v447_v18  ;;  %v605_v17 = vld [vmem:[%s1015_s3] sm:$0xff] }
 0x318   :  { %v460_v19 = vpop.permute.xlu0 %459  ;;  %v454_v20 = vpop.permute.xlu1 %453 }
 0x319   :  { %v465_v23 = vadd.f32 %v460_v19, %v457_v21  ;;  %v458_v27 = vadd.f32 %v454_v20, %v448_v2  ;;  %v606_v20 = vld [vmem:[%s1015_s3 + $0x8] sm:$0xff] }
 0x31c   :  { %v468_v24 = vpop.permute.xlu0 %467  ;;  %v462_v25 = vpop.permute.xlu1 %461 }
 0x31d   :  { %v473_v28 = vadd.f32 %v468_v24, %v465_v23  ;;  %v466_v30 = vadd.f32 %v462_v25, %v458_v27 }
 0x31f   :  { %v475_v29 = vmul.f32 %v473_v28, %v236_v26 }
 0x320   :  { %v470_v31 = vpop.permute.xlu1 %469 }
 0x321   :  { %v635_v33 = vmul.f32 -1.442695, %v475_v29  ;;  %v474_v34 = vadd.f32 %v470_v31, %v466_v30 }
 0x323   :  { %742 = vpow2.f32 %v635_v33  ;;  %v476_v35 = vmul.f32 %v474_v34, %v239_v32 }
 0x325   :  { %v636_v36 = vmul.f32 -1.442695, %v476_v35 }
 0x327   :  { %744 = vpow2.f32 %v636_v36 }
 0x330   :  { %v743_v37 = vpop.eup %742 }
 0x331   :  { %v483_v38 = vadd.f32 1.0, %v743_v37 }
 0x333   :  { %746 = vrcp.f32 %v483_v38 }
 0x334   :  { %v745_v39 = vpop.eup %744 }
 0x335   :  { %v484_v40 = vadd.f32 1.0, %v745_v39 }
 0x337   :  { %748 = vrcp.f32 %v484_v40 }
 0x340   :  { %v747_v41 = vpop.eup %746 }
 0x341   :  { %v489_v43 = vmul.f32 %v747_v41, %v475_v29 }
 0x344   :  { %v749_v42 = vpop.eup %748 }
 0x345   :  { %v490_v44 = vmul.f32 %v749_v42, %v476_v35 }
 0x347   :  { %v491_v46 = vpack.c.bf16 %v490_v44, %v489_v43 }
 0x349   :  { %703 = vmatmul.mubr.msk.bf16.vlgmr.msra.gmra.mxu1 %vm87_vm2, %v491_v46 }
 0x409   :  { %v545_v45 = vpop.f32.mrf.mxu1 }
 0x40a   :  { %v552_v47 = vmul.f32 %v545_v45, %v947_v4 }
 0x40b   :  { %v704_v48 = vpop.f32.mrf.mxu1 }
 0x40c   :  { %565 = vrot.lane.b32.xlu0 %v552_v47, %s763_s11  ;;  %v561_v54 = vadd.f32 %v640_v52, %v552_v47 }
 0x40d   :  { %v548_v49 = vpop.f32.mrf.mxu1 }
 0x40e   :  { %v553_v50 = vmul.f32 %v548_v49, %v95_v11 }
 0x40f   :  { %v705_v51 = vpop.f32.mrf.mxu1 }
 0x410   :  { %573 = vrot.lane.b32.xlu0 %v552_v47, %s766_s1  ;;  %567 = vrot.lane.b32.xlu1 %v553_v50, %s763_s11  ;;  %v562_v62 = vadd.f32 %v640_v52, %v553_v50 }
 0x414   :  { %581 = vrot.lane.b32.xlu0 %v552_v47, %s767_s4  ;;  %575 = vrot.lane.b32.xlu1 %v553_v50, %s766_s1 }
 0x418   :  { %583 = vrot.lane.b32.xlu1 %v553_v50, %s767_s4 }
 0x47e   :  { %v566_v53 = vpop.permute.xlu0 %565 }
 0x47f   :  { %v571_v58 = vadd.f32 %v566_v53, %v561_v54 }
 0x482   :  { %v574_v56 = vpop.permute.xlu0 %573  ;;  %v568_v57 = vpop.permute.xlu1 %567 }
 0x483   :  { %v579_v61 = vadd.f32 %v574_v56, %v571_v58  ;;  %v572_v3 = vadd.f32 %v568_v57, %v562_v62 }
 0x486   :  { %v582_v63 = vpop.permute.xlu0 %581  ;;  %v576_v0 = vpop.permute.xlu1 %575 }
 0x487   :  { %v587_v4 = vadd.f32 %v582_v63, %v579_v61  ;;  %v580_v6 = vadd.f32 %v576_v0, %v572_v3 }
 0x489   :  { %v589_v5 = vmul.f32 %v587_v4, %v306_v1 }
 0x48a   :  { %v584_v7 = vpop.permute.xlu1 %583 }
 0x48b   :  { %v641_v9 = vmul.f32 -1.442695, %v589_v5  ;;  %v588_v10 = vadd.f32 %v584_v7, %v580_v6 }
 0x48d   :  { %750 = vpow2.f32 %v641_v9  ;;  %v590_v11 = vmul.f32 %v588_v10, %v309_v8 }
 0x48f   :  { %v642_v12 = vmul.f32 -1.442695, %v590_v11 }
 0x491   :  { %752 = vpow2.f32 %v642_v12 }
 0x49a   :  { %v751_v13 = vpop.eup %750 }
 0x49b   :  { %v597_v14 = vadd.f32 1.0, %v751_v13 }
 0x49d   :  { %754 = vrcp.f32 %v597_v14 }
 0x49e   :  { %v753_v15 = vpop.eup %752 }
 0x49f   :  { %v598_v16 = vadd.f32 1.0, %v753_v15 }
 0x4a1   :  { %756 = vrcp.f32 %v598_v16 }
 0x4aa   :  { %v755_v55 = vpop.eup %754 }
 0x4ab   :  { %v603_v18 = vmul.f32 %v755_v55, %v589_v5 }
 0x4ad   :  { %v607_v19 = vadd.f32 %v605_v17, %v603_v18 }
 0x4ae   :  { %v757_v59 = vpop.eup %756 }
 0x4af   :  { %609 = vst.msk [vmem:[%s1016_s15] sm:$0xff] %vm87_vm2, %v607_v19  ;;  %v604_v21 = vmul.f32 %v757_v59, %v590_v11 }
 0x4b1   :  { %v608_v22 = vadd.f32 %v606_v20, %v604_v21 }
 0x4b3   :  { %610 = vst.msk [vmem:[%s1016_s15 + $0x8] sm:$0xff] %vm87_vm2, %v608_v22 }

// kernel: edgesegnn_forward.15
= control target key start
LH: loop header
LB: loop body
LE: loop exit
PB: predicated region body
PF: predicated region fallthrough
CT: control target
= control target key end

     0   :  { %v161_v0 = vmov 0.0   ;;  %vm162_vm0 = vmmov 0   ;;  %v163_v2 = vmov 0   ;;  %v164_v3 = vmov 2   ;;  %s215_s2 = inlined_call_operand.vmem [shape: bf16[32,64], index: 2, kind: input, shape index: {}]   ;;  %s216_s0 = inlined_call_operand.vmem [shape: f32[8,32], index: 0, kind: input, shape index: {}]   ;;  %s217_s1 = inlined_call_operand.vmem [shape: f32[8,4], index: 1, kind: input, shape index: {}]   ;;  %s218_s3 = inlined_call_operand.vmem [shape: f32[1,16], index: 3, kind: input, shape index: {}]   ;;  %s219_s4 = inlined_call_operand.vmem [shape: f32[8,16], index: 4, kind: output, shape index: {}]  }
   0x1   :  { %137 = vmatprep.subr.bf16.mxu0 %v161_v0  ;;  %v159_v1 = vld [vmem:[%s215_s2 + $0x8] sm:$0xff]   ;;  %141 = vmatprep.mubr.msk.bf16.mxu0 %vm162_vm0, %v161_v0  ;;  %v160_v4 = vld [vmem:[%s215_s2] sm:$0xff]   ;;  %vm38_vm1 = vcmask 261120   ;;  %v165_v8 = vmov 1   ;;  %v166_v9 = vmov 3   ;;  %vm36_vm2 = vcmask 130048  }
   0x2   :  { %154 = vset.pattern.permute.xlu0 %v163_v2  ;;  %156 = vset.pattern.permute.xlu1 %v164_v3  ;;  %v42_v5 = vld [vmem:[%s216_s0] sm:$0xff]  ;;  %vm40_vm3 = vcmask 392192   ;;  %s167_s0 = smov 96   ;;  %s169_s2 = smov 80  }
   0x3   :  { %138 = vmatpush3.bf16.msra.mxu0 %v159_v1  ;;  %v18_v6 = vld [vmem:[%s217_s1] sm:$0xff]  ;;  %v43_v7 = vpack.c.bf16 %v42_v5, %v42_v5  ;;  %s168_s1 = smov 112  }
   0x4   :  { %139 = vmatprep.subr.bf16.mxu0 %v161_v0  ;;  %21 = vperm.xlu0 %154, %v18_v6   ;;  %v133_v22 = vld [vmem:[%s218_s3] ss:$0 sm:$0xff] }
   0x5   :  { %29 = vperm.xlu1 %156, %v18_v6  }
   0x7   :  { %140 = vmatpush3.bf16.msra.mxu0 %v160_v4 }
   0x8   :  { %155 = vset.pattern.permute.xlu0 %v165_v8 }
   0x9   :  { %25 = vperm.xlu0 %155, %v18_v6   ;;  %157 = vset.pattern.permute.xlu1 %v166_v9 }
   0xa   :  { %142 = vmatmul.mubr.msk.bf16.vlgmr.msra.gmra.mxu0 %vm38_vm1, %v43_v7  ;;  %33 = vperm.xlu1 %157, %v18_v6  }
   0xd   :  { %158 = vset.pattern.permute.xlu0 %v166_v9 }
  0x7f   :  { %v22_v10 = vpop.permute.xlu0 %21 }
  0x80   :  { %v30_v11 = vpop.permute.xlu1 %29 }
  0x84   :  { %v26_v12 = vpop.permute.xlu0 %25 }
  0x85   :  { %v37_v13 = vsel %vm36_vm2, %v22_v10, %v26_v12  ;;  %v34_v14 = vpop.permute.xlu1 %33 }
  0x86   :  { %v39_v15 = vsel %vm38_vm1, %v37_v13, %v30_v11 }
  0x87   :  { %v41_v16 = vsel %vm40_vm3, %v39_v15, %v34_v14 }
  0xca   :  { %v97_v17 = vpop.f32.mrf.mxu0 }
  0xcb   :  { %v103_v18 = vmul.f32 %v97_v17, %v41_v16 }
  0xcc   :  { %v143_v19 = vpop.f32.mrf.mxu0 }
  0xcd   :  { %117 = vrot.lane.b32.xlu0 %v103_v18, %s167_s0  ;;  %113 = vrot.lane.b32.xlu1 %v103_v18, %s168_s1  ;;  %v111_v23 = vadd.f32 %v133_v22, %v103_v18 }
  0xce   :  { %v100_v20 = vpop.f32.mrf.mxu0 }
  0xd0   :  { %v144_v21 = vpop.f32.mrf.mxu0 }
  0xd1   :  { %121 = vrot.lane.b32.xlu1 %v103_v18, %s169_s2 }
 0x13f   :  { %v114_v24 = vpop.permute.xlu1 %113  ;;  %v118_v26 = vpop.permute.xlu0 %117 }
 0x140   :  { %v116_v25 = vadd.f32 %v114_v24, %v111_v23 }
 0x142   :  { %v120_v27 = vadd.f32 %v118_v26, %v116_v25 }
 0x143   :  { %v122_v28 = vpop.permute.xlu1 %121 }
 0x144   :  { %v124_v29 = vadd.f32 %v122_v28, %v120_v27 }
 0x146   :  { %125 = vst.msk [vmem:[%s219_s4] sm:$0xff] %vm36_vm2, %v124_v29 }

// kernel: edgesegnn_forward.14
= control target key start
LH: loop header
LB: loop body
LE: loop exit
PB: predicated region body
PF: predicated region fallthrough
CT: control target
= control target key end

     0   :  { %v401_v2 = vmov 0.0   ;;  %vm402_vm0 = vmmov 0   ;;  %v403_v5 = vmov 1   ;;  %s404_s11 = smov 123   ;;  %v405_v6 = vmov 2   ;;  %s410_s22 = smov 80   ;;  %s510_s0 = inlined_call_operand.vmem [shape: f32[16,21], index: 0, kind: input, shape index: {}]   ;;  %s511_s4 = inlined_call_operand.vmem [shape: bf16[16,32], index: 4, kind: input, shape index: {}]   ;;  %s512_s2 = inlined_call_operand.vmem [shape: bf16[32,64], index: 2, kind: input, shape index: {}]   ;;  %s513_s1 = inlined_call_operand.vmem [shape: f32[16,32], index: 1, kind: input, shape index: {}]   ;;  %s514_s6 = inlined_call_operand.vmem [shape: bf16[32,16], index: 6, kind: input, shape index: {}]   ;;  %s515_s5 = inlined_call_operand.vmem [shape: f32[1,32], index: 5, kind: input, shape index: {}]   ;;  %s516_s3 = inlined_call_operand.vmem [shape: f32[1,16], index: 3, kind: input, shape index: {}]   ;;  %s517_s7 = inlined_call_operand.vmem [shape: f32[1,16], index: 7, kind: input, shape index: {}]   ;;  %s518_s8 = inlined_call_operand.vmem [shape: f32[16,16], index: 8, kind: output, shape index: {}]  }
   0x1   :  { %v30_v0 = vld [vmem:[%s510_s0] sm:$0xff]  ;;  %v31_v1 = vld [vmem:[%s510_s0 + $0x8] sm:$0xff]  ;;  %349 = vmatprep.subr.bf16.mxu0 %v401_v2  ;;  %351 = vmatprep.mubr.msk.bf16.mxu0 %vm402_vm0, %v401_v2  ;;  %v406_v7 = vmov 3   ;;  %v407_v8 = vmov 4   ;;  %vm66_vm1 = vcmask 130048   ;;  %vm69_vm2 = vcmask 261120  }
   0x2   :  { %v75_v3 = vpack.c.bf16 %v31_v1, %v30_v0  ;;  %v388_v4 = vld [vmem:[%s511_s4] sm:$0xff]   ;;  %382 = vset.pattern.permute.xlu1 %v403_v5  ;;  %381 = vset.pattern.permute.xlu0 %v403_v5  ;;  %v389_v9 = vld [vmem:[%s512_s2 + $0x8] sm:$0xff]   ;;  %vm72_vm3 = vcmask 392192  }
   0x3   :  { %39 = vperm.xlu1 %382, %v31_v1   ;;  %355 = vmatprep.subr.bf16.mxu1 %v401_v2  ;;  %v390_v11 = vld [vmem:[%s512_s2] sm:$0xff]   ;;  %v221_v13 = vld [vmem:[%s513_s1 + $0x8] sm:$0xff] }
   0x4   :  { %86 = vrot.lane.b32.xlu0 %v75_v3, %s404_s11  ;;  %350 = vmatpush3.bf16.msra.mxu0 %v388_v4  ;;  %v220_v12 = vld [vmem:[%s513_s1] sm:$0xff]  ;;  %v391_v15 = vld [vmem:[%s514_s6 + $0x8] sm:$0xff]  }
   0x5   :  { %363 = vmatprep.subr.bf16.mxu0 %v401_v2  ;;  %359 = vmatprep.mubr.msk.bf16.mxu1 %vm402_vm0, %v401_v2  ;;  %v222_v14 = vpack.c.bf16 %v221_v13, %v220_v12  ;;  %v392_v16 = vld [vmem:[%s514_s6] sm:$0xff]   ;;  %s409_s6 = smov 112  }
   0x6   :  { %356 = vmatpush3.bf16.msra.mxu1 %v391_v15  ;;  %v328_v22 = vld [vmem:[%s515_s5] ss:$0 sm:$0xff]  ;;  %s408_s5 = smov 96  }
   0x7   :  { %383 = vset.pattern.permute.xlu1 %v405_v6  ;;  %357 = vmatprep.subr.bf16.mxu1 %v401_v2  ;;  %v340_v56 = vld [vmem:[%s516_s3] ss:$0 sm:$0xff] }
   0x8   :  { %43 = vperm.xlu1 %383, %v30_v0   ;;  %34 = vperm.xlu0 %381, %v30_v0  }
   0xa   :  { %358 = vmatpush3.bf16.msra.mxu1 %v392_v16 }
   0xc   :  { %47 = vperm.xlu1 %383, %v31_v1   ;;  %384 = vset.pattern.permute.xlu0 %v406_v7 }
   0xd   :  { %51 = vperm.xlu0 %384, %v30_v0  }
  0x10   :  { %385 = vset.pattern.permute.xlu1 %v406_v7 }
  0x11   :  { %55 = vperm.xlu1 %385, %v31_v1   ;;  %387 = vset.pattern.permute.xlu0 %v407_v8 }
  0x12   :  { %63 = vperm.xlu0 %387, %v31_v1  }
  0x15   :  { %386 = vset.pattern.permute.xlu1 %v407_v8 }
  0x16   :  { %59 = vperm.xlu1 %386, %v30_v0   ;;  %v333_v0 = vld [vmem:[%s517_s7] ss:$0 sm:$0xff] }
  0x76   :  { %v87_v10 = vpop.permute.xlu0 %86 }
  0x77   :  { %352 = vmatmul.mubr.msk.bf16.vlgmr.msra.gmra.mxu0 %vm66_vm1, %v87_v10 }
  0x78   :  { %364 = vmatpush3.bf16.msra.mxu0 %v389_v9  ;;  %367 = vmatprep.mubr.msk.bf16.mxu0 %vm402_vm0, %v401_v2 }
  0x79   :  { %365 = vmatprep.subr.bf16.mxu0 %v401_v2 }
  0x7c   :  { %366 = vmatpush3.bf16.msra.mxu0 %v390_v11 }
  0x7e   :  { %v40_v17 = vpop.permute.xlu1 %39 }
  0x7f   :  { %368 = vmatmul.mubr.msk.bf16.vlgmr.msra.gmra.mxu0 %vm69_vm2, %v222_v14 }
  0x83   :  { %v44_v18 = vpop.permute.xlu1 %43  ;;  %v35_v20 = vpop.permute.xlu0 %34 }
  0x84   :  { %v67_v24 = vsel %vm66_vm1, %v35_v20, %v44_v18 }
  0x87   :  { %v48_v19 = vpop.permute.xlu1 %47 }
  0x88   :  { %v52_v25 = vpop.permute.xlu0 %51  ;;  %v68_v31 = vsel %vm66_vm1, %v40_v17, %v48_v19 }
  0x89   :  { %v70_v29 = vsel %vm69_vm2, %v67_v24, %v52_v25 }
  0x8c   :  { %v56_v21 = vpop.permute.xlu1 %55 }
  0x8d   :  { %v71_v36 = vsel %vm69_vm2, %v68_v31, %v56_v21  ;;  %v64_v38 = vpop.permute.xlu0 %63 }
  0x8e   :  { %v74_v42 = vsel %vm72_vm3, %v71_v36, %v64_v38 }
  0x91   :  { %v60_v30 = vpop.permute.xlu1 %59 }
  0x92   :  { %v73_v35 = vsel %vm72_vm3, %v70_v29, %v60_v30 }
 0x137   :  { %v131_v23 = vpop.f32.mrf.mxu0 }
 0x138   :  { %v132_v26 = vadd.f32 %v328_v22, %v131_v23 }
 0x139   :  { %v353_v27 = vpop.f32.mrf.mxu0 }
 0x13a   :  { %v331_v28 = vmul.f32 -1.442695, %v132_v26 }
 0x13b   :  { %v134_v32 = vpop.f32.mrf.mxu0 }
 0x13c   :  { %393 = vpow2.f32 %v331_v28  ;;  %v135_v33 = vadd.f32 %v328_v22, %v134_v32 }
 0x13d   :  { %v354_v34 = vpop.f32.mrf.mxu0 }
 0x13e   :  { %v332_v37 = vmul.f32 -1.442695, %v135_v33 }
 0x13f   :  { %v276_v39 = vpop.f32.mrf.mxu0 }
 0x140   :  { %395 = vpow2.f32 %v332_v37  ;;  %v283_v40 = vmul.f32 %v276_v39, %v73_v35 }
 0x141   :  { %v369_v41 = vpop.f32.mrf.mxu0 }
 0x142   :  { %304 = vrot.lane.b32.xlu0 %v283_v40, %s408_s5  ;;  %296 = vrot.lane.b32.xlu1 %v283_v40, %s409_s6  ;;  %v292_v58 = vadd.f32 %v340_v56, %v283_v40 }
 0x143   :  { %v279_v43 = vpop.f32.mrf.mxu0 }
 0x144   :  { %v284_v44 = vmul.f32 %v279_v43, %v74_v42 }
 0x145   :  { %v370_v45 = vpop.f32.mrf.mxu0 }
 0x146   :  { %312 = vrot.lane.b32.xlu0 %v283_v40, %s410_s22  ;;  %298 = vrot.lane.b32.xlu1 %v284_v44, %s409_s6  ;;  %v293_v1 = vadd.f32 %v340_v56, %v284_v44 }
 0x149   :  { %v394_v46 = vpop.eup %393 }
 0x14a   :  { %v144_v47 = vadd.f32 1.0, %v394_v46  ;;  %306 = vrot.lane.b32.xlu1 %v284_v44, %s408_s5 }
 0x14c   :  { %397 = vrcp.f32 %v144_v47 }
 0x14d   :  { %v396_v48 = vpop.eup %395 }
 0x14e   :  { %v145_v49 = vadd.f32 1.0, %v396_v48  ;;  %314 = vrot.lane.b32.xlu1 %v284_v44, %s410_s22 }
 0x150   :  { %399 = vrcp.f32 %v145_v49 }
 0x159   :  { %v398_v50 = vpop.eup %397 }
 0x15a   :  { %v150_v52 = vmul.f32 %v398_v50, %v132_v26 }
 0x15d   :  { %v400_v51 = vpop.eup %399 }
 0x15e   :  { %v151_v53 = vmul.f32 %v400_v51, %v135_v33 }
 0x160   :  { %v152_v54 = vpack.c.bf16 %v151_v53, %v150_v52 }
 0x162   :  { %360 = vmatmul.mubr.msk.bf16.vlgmr.msra.gmra.mxu1 %vm69_vm2, %v152_v54 }
 0x1b4   :  { %v297_v55 = vpop.permute.xlu1 %296  ;;  %v305_v59 = vpop.permute.xlu0 %304 }
 0x1b5   :  { %v302_v60 = vadd.f32 %v297_v55, %v292_v58 }
 0x1b7   :  { %v310_v62 = vadd.f32 %v305_v59, %v302_v60 }
 0x1b8   :  { %v299_v57 = vpop.permute.xlu1 %298  ;;  %v313_v63 = vpop.permute.xlu0 %312 }
 0x1b9   :  { %v303_v3 = vadd.f32 %v299_v57, %v293_v1  ;;  %v318_v4 = vadd.f32 %v313_v63, %v310_v62 }
 0x1bc   :  { %v307_v61 = vpop.permute.xlu1 %306 }
 0x1bd   :  { %v311_v8 = vadd.f32 %v307_v61, %v303_v3 }
 0x1c0   :  { %v315_v6 = vpop.permute.xlu1 %314 }
 0x1c1   :  { %v319_v11 = vadd.f32 %v315_v6, %v311_v8 }
 0x222   :  { %v213_v2 = vpop.f32.mrf.mxu1 }
 0x223   :  { %v214_v5 = vadd.f32 %v333_v0, %v213_v2 }
 0x224   :  { %v361_v7 = vpop.f32.mrf.mxu1 }
 0x225   :  { %v320_v9 = vmul.f32 %v318_v4, %v214_v5 }
 0x226   :  { %v216_v10 = vpop.f32.mrf.mxu1 }
 0x227   :  { %322 = vst.msk [vmem:[%s518_s8] sm:$0xff] %vm66_vm1, %v320_v9  ;;  %v217_v12 = vadd.f32 %v333_v0, %v216_v10 }
 0x228   :  { %v362_v13 = vpop.f32.mrf.mxu1 }
 0x229   :  { %v321_v14 = vmul.f32 %v319_v11, %v217_v12 }
 0x22b   :  { %323 = vst.msk [vmem:[%s518_s8 + $0x8] sm:$0xff] %vm66_vm1, %v321_v14 }

</bundles_post_ra>
